<compile_context>
chip_gen: v7x
topology: tpu7x:2x2x1
jax: 0.10.0
libtpu: 0.0.40
codegen_flags: <defaults>
</compile_context>

<pallas_src>
import functools

import jax
import jax.numpy as jnp
from jax.experimental import pallas as pl
from jax.experimental.pallas import tpu as pltpu

SUBLANE = 8
LANE = 128
HIDDEN = 1024          # hidden width (multiple of 128)
OUT_PAD = 128          # classifier output padded to one full lane group


def _ffn_kernel(x_ref, w_ref, b_ref, wo_ref, bo_ref, o_ref, h_ref):
    """Grid axis 0 iterates over the hidden (Linear+ReLU) layers.

    x_ref  : (Bp, H)        padded input, resident across the grid
    w_ref  : (1, H, H)      bf16 weight of the CURRENT hidden layer (streamed)
    b_ref  : (1, 1, H)      bf16 bias of the current hidden layer (streamed)
    wo_ref : (H, OUT_PAD)   bf16 classifier head weight, resident
    bo_ref : (1, OUT_PAD)   bf16 classifier head bias, resident
    o_ref  : (Bp, OUT_PAD)  f32 output (written on the last grid step)
    h_ref  : (Bp, H)        f32 VMEM scratch holding the running activation
    """
    l = pl.program_id(0)
    last = pl.num_programs(0) - 1

    # First layer reads the (padded) flattened input.
    @pl.when(l == 0)
    def _():
        h_ref[...] = x_ref[...].astype(jnp.float32)

    # Hidden layer l: h = relu(h @ W_l + b_l), bf16 operands, f32 accumulation.
    a = h_ref[...].astype(jnp.bfloat16)
    y = jnp.dot(a, w_ref[0], preferred_element_type=jnp.float32)
    y = jnp.maximum(y + b_ref[0].astype(jnp.float32), 0.0)
    h_ref[...] = y

    # After the last hidden layer, run the small classifier head.
    @pl.when(l == last)
    def _():
        o = jnp.dot(y.astype(jnp.bfloat16), wo_ref[...],
                    preferred_element_type=jnp.float32)
        o_ref[...] = (o + bo_ref[...].astype(jnp.float32)).astype(o_ref.dtype)


@functools.partial(jax.jit, static_argnames=("n_classes",))
def ffn_forward(x_nchw, w_stack, b_stack, wo, bo, *, n_classes):
    """Reproduces FFN.forward: flatten, L x (Linear+ReLU), Linear head."""
    B = x_nchw.shape[0]
    x = x_nchw.reshape(B, -1).astype(jnp.float32)   # torch.flatten(x, 1)
    K = x.shape[1]
    L, Hf, _ = w_stack.shape
    No = wo.shape[1]

    # Pad batch to a whole number of sublanes and features to the (padded)
    # first-layer fan-in (extra rows/cols are zero -> contribute nothing).
    Bp = max(SUBLANE, ((B + SUBLANE - 1) // SUBLANE) * SUBLANE)
    x_pad = jnp.zeros((Bp, Hf), jnp.float32).at[:B, :K].set(x)

    out = pl.pallas_call(
        _ffn_kernel,
        out_shape=jax.ShapeDtypeStruct((Bp, No), jnp.float32),
        grid_spec=pltpu.PrefetchScalarGridSpec(
            num_scalar_prefetch=0,
            grid=(L,),
            in_specs=[
                pl.BlockSpec((Bp, Hf), lambda l: (0, 0)),       # x (resident)
                pl.BlockSpec((1, Hf, Hf), lambda l: (l, 0, 0)),  # W_l (streamed)
                pl.BlockSpec((1, 1, Hf), lambda l: (l, 0, 0)),   # b_l (streamed)
                pl.BlockSpec((Hf, No), lambda l: (0, 0)),        # head W (resident)
                pl.BlockSpec((1, No), lambda l: (0, 0)),         # head b (resident)
            ],
            out_specs=pl.BlockSpec((Bp, No), lambda l: (0, 0)),
            scratch_shapes=[pltpu.VMEM((Bp, Hf), jnp.float32)],  # activation
        ),
        compiler_params=pltpu.CompilerParams(
            dimension_semantics=("arbitrary",),   # layers are sequential
            vmem_limit_bytes=16 << 20,
        ),
    )(x_pad, w_stack, b_stack, wo, bo)

    return out[:B, :n_classes]


def init_ffn_params(key, layers: int, in_features=784, hidden=HIDDEN,
                    out_features=10, dtype=jnp.float32):
    """Deterministic synthetic params. Weights stored as (in, out) so the
    kernel computes x @ W (PyTorch nn.Linear computes x @ W.T + b)."""
    dims = ([(in_features, hidden)]
            + [(hidden, hidden)] * (layers - 1)
            + [(hidden, out_features)])
    params = []
    for (din, dout) in dims:
        key, kw, kb = jax.random.split(key, 3)
        bound = 1.0 / jnp.sqrt(jnp.float32(din))
        w = jax.random.uniform(kw, (din, dout), dtype, -bound, bound)
        b = jax.random.uniform(kb, (dout,), dtype, -bound, bound)
        params.append((w, b))
    return params


def pack_params(params, hidden=HIDDEN, out_pad=OUT_PAD, dtype=jnp.bfloat16):
    """Pad + stack + cast to bf16 for the fused kernel.

    Hidden layers -> w_stack (L, hidden, hidden), b_stack (L, 1, hidden);
    the head -> wo (hidden, out_pad), bo (1, out_pad). Zero padding rows/cols
    do not change the math."""
    hidden_params, (wo, bo) = params[:-1], params[-1]
    w_stack, b_stack = [], []
    for (w, b) in hidden_params:
        din, dout = w.shape
        assert dout == hidden
        w_stack.append(jnp.pad(w, ((0, hidden - din), (0, 0))))
        b_stack.append(b.reshape(1, hidden))
    w_stack = jnp.stack(w_stack).astype(dtype)
    b_stack = jnp.stack(b_stack).astype(dtype)

    n_classes = wo.shape[1]
    wo_p = jnp.pad(wo, ((0, 0), (0, out_pad - n_classes))).astype(dtype)
    bo_p = jnp.pad(bo.reshape(1, n_classes),
                   ((0, 0), (0, out_pad - n_classes))).astype(dtype)
    return w_stack, b_stack, wo_p, bo_p, n_classes


if __name__ == "__main__":
    key = jax.random.PRNGKey(0)
    k_x, k_p = jax.random.split(key)

    # cfg.layers = 2 -> Linear(784,1024)+ReLU, Linear(1024,1024)+ReLU, Linear(1024,10)
    layers = 2
    B = 2
    x = jax.random.normal(k_x, (B, 1, 28, 28), dtype=jnp.float32)

    params = init_ffn_params(k_p, layers)
    w_stack, b_stack, wo, bo, n_classes = pack_params(params)

    out = ffn_forward(x, w_stack, b_stack, wo, bo, n_classes=n_classes)
    jax.block_until_ready(out)
    assert out.shape == (B, n_classes), out.shape

    # Pure-JAX reference mirroring the kernel numerics (bf16 operands, f32 acc).
    ref = x.reshape(B, -1).astype(jnp.float32)
    n = len(params)
    for i, (w, b) in enumerate(params):
        wb = w.astype(jnp.bfloat16)
        bb = b.astype(jnp.bfloat16).astype(jnp.float32)
        ref = jnp.dot(ref.astype(jnp.bfloat16), wb,
                      preferred_element_type=jnp.float32) + bb
        if i < n - 1:
            ref = jnp.maximum(ref, 0.0)

    assert jnp.allclose(out, ref, atol=2e-3, rtol=2e-3), (
        float(jnp.max(jnp.abs(out - ref))))

    print("KERNEL_OK")
</pallas_src>

<mosaic_0001>
module attributes {stable_mosaic.version = 11 : i64} {
  func.func @_ffn_kernel(%arg0: i32, %arg1: memref<8x1024xf32, #tpu.memory_space<vmem>>, %arg2: memref<1x1024x1024xbf16, #tpu.memory_space<vmem>>, %arg3: memref<1x1x1024xbf16, #tpu.memory_space<vmem>>, %arg4: memref<1024x128xbf16, #tpu.memory_space<vmem>>, %arg5: memref<1x128xbf16, #tpu.memory_space<vmem>>, %arg6: memref<8x128xf32, #tpu.memory_space<vmem>>, %arg7: memref<8x1024xf32, #tpu.memory_space<vmem>>) attributes {dimension_semantics = [#tpu.dimension_semantics<arbitrary>], iteration_bounds = array<i64: 2>, scalar_prefetch = 0 : i64, scratch_operands = 1 : i64, tpu.core_type = #tpu.core_type<tc>, window_params = [{pipeline_mode = #tpu.pipeline_mode<synchronous>, transform_indices = @transform_0, window_bounds = array<i64: 8, 1024>}, {transform_indices = @transform_1, window_bounds = array<i64: 1, 1024, 1024>}, {transform_indices = @transform_2, window_bounds = array<i64: 1, 1, 1024>}, {pipeline_mode = #tpu.pipeline_mode<synchronous>, transform_indices = @transform_3, window_bounds = array<i64: 1024, 128>}, {pipeline_mode = #tpu.pipeline_mode<synchronous>, transform_indices = @transform_4, window_bounds = array<i64: 1, 128>}, {pipeline_mode = #tpu.pipeline_mode<synchronous>, transform_indices = @transform_5, window_bounds = array<i64: 8, 128>}]} {
    %c0_i32 = arith.constant 0 : i32
    %0 = arith.cmpi eq, %arg0, %c0_i32 : i32
    %1 = arith.extui %0 : i1 to i32
    %c0_i32_0 = arith.constant 0 : i32
    %2 = arith.cmpi ne, %1, %c0_i32_0 : i32
    scf.if %2 {
      %c0_12 = arith.constant 0 : index
      %c0_13 = arith.constant 0 : index
      %19 = vector.load %arg1[%c0_12, %c0_13] : memref<8x1024xf32, #tpu.memory_space<vmem>>, vector<8x1024xf32>
      %c0_14 = arith.constant 0 : index
      %c0_15 = arith.constant 0 : index
      %20 = vector.load %arg7[%c0_14, %c0_15] : memref<8x1024xf32, #tpu.memory_space<vmem>>, vector<8x1024xf32>
      tpu.vector_store %arg7[%c0_14, %c0_15], %19 {strides = array<i32>} : memref<8x1024xf32, #tpu.memory_space<vmem>>, vector<8x1024xf32>,
    } else {
    }
    %c0 = arith.constant 0 : index
    %c0_1 = arith.constant 0 : index
    %3 = vector.load %arg7[%c0, %c0_1] : memref<8x1024xf32, #tpu.memory_space<vmem>>, vector<8x1024xf32>
    %4 = arith.truncf %3 : vector<8x1024xf32> to vector<8x1024xbf16>
    %c0_2 = arith.constant 0 : index
    %c0_3 = arith.constant 0 : index
    %c0_4 = arith.constant 0 : index
    %5 = vector.load %arg2[%c0_2, %c0_3, %c0_4] : memref<1x1024x1024xbf16, #tpu.memory_space<vmem>>, vector<1x1024x1024xbf16>
    %6 = vector.shape_cast %5 : vector<1x1024x1024xbf16> to vector<1024x1024xbf16>
    %cst = arith.constant dense<0.000000e+00> : vector<8x1024xf32>
    %7 = tpu.matmul %4, %6, %cst {dimension_numbers = #tpu.dot_dimension_numbers<[1], [0], [0], [1], [0, 0, 1, 1], [], []>} : vector<8x1024xbf16>, vector<1024x1024xbf16>, vector<8x1024xf32> -> vector<8x1024xf32>
    %c0_5 = arith.constant 0 : index
    %c0_6 = arith.constant 0 : index
    %c0_7 = arith.constant 0 : index
    %8 = vector.load %arg3[%c0_5, %c0_6, %c0_7] : memref<1x1x1024xbf16, #tpu.memory_space<vmem>>, vector<1x1x1024xbf16>
    %9 = vector.shape_cast %8 : vector<1x1x1024xbf16> to vector<1x1024xbf16>
    %10 = arith.extf %9 : vector<1x1024xbf16> to vector<1x1024xf32>
    %11 = vector.broadcast %10 : vector<1x1024xf32> to vector<8x1024xf32>
    %12 = arith.addf %7, %11 : vector<8x1024xf32>
    %cst_8 = arith.constant 0.000000e+00 : f32
    %13 = vector.broadcast %cst_8 : f32 to vector<8x1024xf32>
    %14 = arith.maximumf %12, %13 : vector<8x1024xf32>
    %c0_9 = arith.constant 0 : index
    %c0_10 = arith.constant 0 : index
    %15 = vector.load %arg7[%c0_9, %c0_10] : memref<8x1024xf32, #tpu.memory_space<vmem>>, vector<8x1024xf32>
    tpu.vector_store %arg7[%c0_9, %c0_10], %14 {strides = array<i32>} : memref<8x1024xf32, #tpu.memory_space<vmem>>, vector<8x1024xf32>,
    %c1_i32 = arith.constant 1 : i32
    %16 = arith.cmpi eq, %arg0, %c1_i32 : i32
    %17 = arith.extui %16 : i1 to i32
    %c0_i32_11 = arith.constant 0 : i32
    %18 = arith.cmpi ne, %17, %c0_i32_11 : i32
    scf.if %18 {
      %19 = arith.truncf %14 : vector<8x1024xf32> to vector<8x1024xbf16>
      %c0_12 = arith.constant 0 : index
      %c0_13 = arith.constant 0 : index
      %20 = vector.load %arg4[%c0_12, %c0_13] : memref<1024x128xbf16, #tpu.memory_space<vmem>>, vector<1024x128xbf16>
      %cst_14 = arith.constant dense<0.000000e+00> : vector<8x128xf32>
      %21 = tpu.matmul %19, %20, %cst_14 {dimension_numbers = #tpu.dot_dimension_numbers<[1], [0], [0], [1], [0, 0, 1, 1], [], []>} : vector<8x1024xbf16>, vector<1024x128xbf16>, vector<8x128xf32> -> vector<8x128xf32>
      %c0_15 = arith.constant 0 : index
      %c0_16 = arith.constant 0 : index
      %22 = vector.load %arg5[%c0_15, %c0_16] : memref<1x128xbf16, #tpu.memory_space<vmem>>, vector<1x128xbf16>
      %23 = arith.extf %22 : vector<1x128xbf16> to vector<1x128xf32>
      %24 = vector.broadcast %23 : vector<1x128xf32> to vector<8x128xf32>
      %25 = arith.addf %21, %24 : vector<8x128xf32>
      %c0_17 = arith.constant 0 : index
      %c0_18 = arith.constant 0 : index
      %26 = vector.load %arg6[%c0_17, %c0_18] : memref<8x128xf32, #tpu.memory_space<vmem>>, vector<8x128xf32>
      tpu.vector_store %arg6[%c0_17, %c0_18], %25 {strides = array<i32>} : memref<8x128xf32, #tpu.memory_space<vmem>>, vector<8x128xf32>,
    } else {
    }
    return
  }
  func.func @transform_0(%arg0: i32) -> (i32, i32) {
    %c0_i32 = arith.constant 0 : i32
    %c0_i32_0 = arith.constant 0 : i32
    %c0_i32_1 = arith.constant 0 : i32
    return %c0_i32, %c0_i32_0 : i32, i32
  }
  func.func @transform_1(%arg0: i32) -> (i32, i32, i32) {
    %c0_i32 = arith.constant 0 : i32
    %c0_i32_0 = arith.constant 0 : i32
    %c0_i32_1 = arith.constant 0 : i32
    return %arg0, %c0_i32, %c0_i32_0 : i32, i32, i32
  }
  func.func @transform_2(%arg0: i32) -> (i32, i32, i32) {
    %c0_i32 = arith.constant 0 : i32
    %c0_i32_0 = arith.constant 0 : i32
    %c0_i32_1 = arith.constant 0 : i32
    return %arg0, %c0_i32, %c0_i32_0 : i32, i32, i32
  }
  func.func @transform_3(%arg0: i32) -> (i32, i32) {
    %c0_i32 = arith.constant 0 : i32
    %c0_i32_0 = arith.constant 0 : i32
    %c0_i32_1 = arith.constant 0 : i32
    return %c0_i32, %c0_i32_0 : i32, i32
  }
  func.func @transform_4(%arg0: i32) -> (i32, i32) {
    %c0_i32 = arith.constant 0 : i32
    %c0_i32_0 = arith.constant 0 : i32
    %c0_i32_1 = arith.constant 0 : i32
    return %c0_i32, %c0_i32_0 : i32, i32
  }
  func.func @transform_5(%arg0: i32) -> (i32, i32) {
    %c0_i32 = arith.constant 0 : i32
    %c0_i32_0 = arith.constant 0 : i32
    %c0_i32_1 = arith.constant 0 : i32
    return %c0_i32, %c0_i32_0 : i32, i32
  }
}

</mosaic_0001>

<bundles_post_ra>
// kernel: ffn_forward.1
= control target key start
LH: loop header
LB: loop body
LE: loop exit
PB: predicated region body
PF: predicated region fallthrough
CT: control target
= control target key end

     0   :  { %10 = vsyncpa [#allocation4], 0  ;;  %s6769_s0 = inlined_call_operand.vmem [shape: f32[8,1024], index: 0, kind: input, shape index: {}]   ;;  %s6770_s1 = inlined_call_operand.hbm [shape: bf16[2,1024,1024], index: 1, kind: input, shape index: {}]   ;;  %s6771_s2 = inlined_call_operand.vmem [shape: bf16[2,1,1024], index: 2, kind: input, shape index: {}]   ;;  %s6772_s3 = inlined_call_operand.hbm [shape: bf16[1024,128], index: 3, kind: input, shape index: {}]   ;;  %s6773_s4 = inlined_call_operand.hbm [shape: bf16[1,128], index: 4, kind: input, shape index: {}]   ;;  %s6774_s5 = inlined_call_operand.vmem [shape: f32[8,128], index: 5, kind: output, shape index: {}]  }
   0x1   :  { %12 = vsyncpa [#allocation4 + $0x1], 0 }
   0x2   :  { %13 = vsyncpa [#allocation6], 0  ;;  %s5922_s18 = smov 0   ;;  %s5924_s19 = smov 0  }
   0x3   :  { %s5926_s20 = smov 0   ;;  %s5928_s21 = smov 0  }
   0x4 LB: > { %s5941_s22 = sadd.s32 4294967295, %s5883_s21   ;;  %p60_p0 = scmp.ne.s32.totalorder %s5875_s19, %s5871_s18  ;;  %s5883_s21 = sphi %s5928_s21, %s6790_s21   ;;  %s5879_s20 = sphi %s5926_s20, %s6789_s20   ;;  %s5875_s19 = sphi %s5924_s19, %s6788_s19   ;;  %s5871_s18 = sphi %s5922_s18, %s6787_s18  }
   0x5   : > { %p6775_p1 = scmp.eq.s32.totalorder %s5941_s22, 0  ;;  %p4894_p2 = scmp.ge.s32.totalorder %s5883_s21, 1 }
   0x6   : > { %p160_p3 = scmp.lt.s32.totalorder %s5883_s21, 3  ;;  %s5885_s25 = smov [#allocation5]  }
   0x7   : > { %p5950_p5 = por %p6775_p1, %p60_p0  ;;  %s175_s26 = sshll.u32 %s5885_s25, 4  ;;  %s176_s26 = int_to_ptr.vmem [resolvable:$true] %s175_s26 }
   0x8   : > { %p5954_p6 = pnand %p4894_p2, %p160_p3  ;;  %s5886_s28 = smov [#allocation7]  }
   0x9   : > { %s6778_s23 = scalar_select %p5950_p5, 1, 0 }
   0xa   : > { %s6779_s24 = scalar_select %p5954_p6, 1, 0 }
   0xb   : > { %p5641_p7 = pneg %p5954_p6  ;;  %s189_s29 = sshll.u32 %s5886_s28, 4  ;;  %s5966_s29 = int_to_ptr.vmem [resolvable:$true] %s189_s29 }
   0xc   : > { %s5759_s7 = scalar_lea.hbm %s6772_s3, 8192 }
   0xd   : > { %p5962_p8 = pnand %p5641_p7, %p6775_p1  ;;  %p5760_p9 = scmp.ne.s32.totalorder %s6772_s3, %s5759_s7 }
   0xe   : > { %p5766_p13 = scmp.lt.u32.totalorder %s5759_s7, %s6772_s3 }
   0xf   : > { %p5761_p10 = pneg %p5962_p8 }
  0x11   : > { %p5762_p11 = pnand %p5761_p10, %p5760_p9 }
  0x13   : > { %p5763_p12 = pneg %p5762_p11 }
  0x15   : > { %p5768_p0 = pnand %p5766_p13, %p5763_p12 }
  0x17   : > { %5771 = shalt.err (!%p5768_p0)
}
  0x18   : > { %s5772_s12 = scalar_lea.vmem %s176_s26, 8192  ;;  %p5780_p4 = scmp.lt.s32.totalorder %s176_s26, %s176_s26 }
  0x19   : > { %p5773_p2 = scmp.ne.s32.totalorder %s176_s26, %s5772_s12  ;;  %p5781_p1 = scmp.lt.s32.totalorder %s5772_s12, %s5772_s12 }
  0x1b   : > { %p5775_p3 = pnand %p5773_p2, %p5761_p10  ;;  %p5782_p5 = por %p5781_p1, %p5780_p4 }
  0x1d   : > { %p5776_p7 = pneg %p5775_p3 }
  0x1f   : > { %p5783_p6 = pnand %p5782_p5, %p5776_p7 }
  0x21   : > { %5786 = shalt.err (!%p5783_p6)
}
  0x22   : > { %s5887_s13 = smov 64   ;;  %s5888_s14 = smov 4  }
  0x23   : > { %5644 = dma.hbm_to_vmem [thread:$0]  (!%p5962_p8), %s6772_s3, 8192, %s176_s26, [#allocation6], %s5887_s13, %s5887_s13, %s5888_s14  }
  0x24   : > { %s5787_s25 = scalar_lea.hbm %s6773_s4, 16 }
  0x25   : > { %p5788_p9 = scmp.ne.s32.totalorder %s6773_s4, %s5787_s25  ;;  %p5794_p5 = scmp.lt.u32.totalorder %s5787_s25, %s6773_s4 }
  0x27   : > { %p5790_p1 = pnand %p5788_p9, %p5761_p10 }
  0x29   : > { %p5791_p4 = pneg %p5790_p1 }
  0x2b   : > { %p5796_p6 = pnand %p5794_p5, %p5791_p4 }
  0x2d   : > { %5799 = shalt.err (!%p5796_p6)
}
  0x2e   : > { %s5800_s26 = scalar_lea.vmem %s5966_s29, 16  ;;  %s5807_s8 = scalar_lea.vmem %s5966_s29, 32 }
  0x2f   : > { %p5801_p11 = scmp.ne.s32.totalorder %s5966_s29, %s5800_s26  ;;  %p5808_p0 = scmp.lt.s32.totalorder %s5966_s29, %s5966_s29 }
  0x30   : > { %p5809_p2 = scmp.lt.s32.totalorder %s5807_s8, %s5800_s26 }
  0x31   : > { %p5803_p12 = pnand %p5801_p11, %p5761_p10 }
  0x32   : > { %p5810_p3 = por %p5809_p2, %p5808_p0 }
  0x33   : > { %p5804_p13 = pneg %p5803_p12 }
  0x35   : > { %p5811_p7 = pnand %p5810_p3, %p5804_p13 }
  0x37   : > { %5814 = shalt.err (!%p5811_p7)
}
  0x38   : > { %5647 = dma.hbm_to_vmem [thread:$0]  (!%p5962_p8), %s6773_s4, 16, %s5966_s29, [#allocation6]  }
  0x39   : > { %s6017_s11 = sadd.s32 1, %s5883_s21   ;;  %s47_s12 = sadd.s32 1, %s5879_s20 }
  0x3a   : > { %s44_s27 = ssub.s32 %s5883_s21, %s6017_s11  ;;  %p54_p10 = scmp.ne.s32.totalorder %s5879_s20, %s5875_s19 }
  0x3b   : > { %p45_p9 = scmp.eq.s32.totalorder %s44_s27, 0  ;;  %p55_p1 = scmp.eq.s32.totalorder %s5883_s21, 0 }
  0x3c   : > { %p5654_p4 = scmp.lt.s32.totalorder %s5883_s21, 2  ;;  %s200_s13 = sand.u32 1, %s5879_s20  }
  0x3d   : > { %s6028_s14 = scalar_select %p45_p9, %s5879_s20, %s47_s12  }
  0x3e   : > { %p56_p5 = por %p55_p1, %p54_p10  ;;  %s4898_s15 = sshll.u32 %s200_s13, 12 }
  0x3f   : > { %s5486_s16 = sshll.u32 %s5883_s21, 16  ;;  %s204_s29 = scalar_lea.vmem [#allocation3], %s4898_s15 }
  0x40   : > { %s6034_s25 = scalar_lea.hbm %s6770_s1, %s5486_s16  ;;  %s211_s28 = sshll.u32 %s204_s29, 4  ;;  %s6040_s28 = int_to_ptr.vmem [resolvable:$true] %s211_s28 }
  0x41   : > { %p6036_p8 = pnand %p5654_p4, %p56_p5  ;;  %s6042_s21 = scalar_lea.sflag [#allocation4], %s200_s13 }
  0x42   : > { %s5815_s6 = scalar_lea.hbm %s6034_s25, 65536  ;;  %s5820_s8 = scalar_lea.hbm %s6770_s1, 131072 }
  0x43   : > { %p5816_p6 = scmp.ne.s32.totalorder %s6034_s25, %s5815_s6  ;;  %p5817_p11 = pneg %p6036_p8 }
  0x44   : > { %p5821_p0 = scmp.lt.u32.totalorder %s6034_s25, %s6770_s1  ;;  %p5822_p2 = scmp.lt.u32.totalorder %s5820_s8, %s5815_s6 }
  0x45   : > { %p5818_p12 = pnand %p5817_p11, %p5816_p6  ;;  %p5824_p7 = scmp.lt.u32.totalorder %s5815_s6, %s6034_s25 }
  0x46   : > { %p5823_p3 = por %p5822_p2, %p5821_p0 }
  0x47   : > { %p5819_p13 = pneg %p5818_p12 }
  0x48   : > { %p5825_p10 = por %p5824_p7, %p5823_p3 }
  0x4a   : > { %p5826_p9 = pnand %p5825_p10, %p5819_p13 }
  0x4c   : > { %5829 = shalt.err (!%p5826_p9)
}
  0x4d   : > { %s5830_s12 = scalar_lea.vmem %s6040_s28, 65536  ;;  %s5889_s27 = smov [#allocation3]  }
  0x4e   : > { %p5831_p1 = scmp.ne.s32.totalorder %s6040_s28, %s5830_s12  ;;  %s5835_s13 = sshll.u32 %s5889_s27, 4  ;;  %s5836_s13 = int_to_ptr.vmem [resolvable:$false] %s5835_s13 }
  0x4f   : > { %s5837_s15 = scalar_lea.vmem %s5836_s13, 131072  ;;  %p5838_p6 = scmp.lt.s32.totalorder %s6040_s28, %s5836_s13 }
  0x50   : > { %p5833_p4 = pnand %p5831_p1, %p5817_p11  ;;  %p5839_p12 = scmp.lt.s32.totalorder %s5837_s15, %s5830_s12 }
  0x52   : > { %p5834_p5 = pneg %p5833_p4  ;;  %p5840_p0 = por %p5839_p12, %p5838_p6 }
  0x54   : > { %p5841_p2 = pnand %p5840_p0, %p5834_p5 }
  0x56   : > { %5844 = shalt.err (!%p5841_p2)
}
  0x57   : > { %s5890_s16 = smov 512   ;;  %s5891_s17 = smov 32  }
  0x58   : > { %5651 = dma.hbm_to_vmem [thread:$0]  (!%p6036_p8), %s6034_s25, 65536, %s6040_s28, %s6042_s21, %s5890_s16, %s5890_s16, %s5891_s17  }
  0x59   : > { %p6782_p11 = scmp.ne.s32.totalorder %s6779_s24, 0 }
  0x5a   : > { %s232_s18 = sand.u32 (!%p6782_p11), 1, %s5875_s19   ;;  %p6783_p13 = scmp.ne.s32.totalorder (!%p6782_p11), %s6778_s23, 0 }
  0x5b   : > { %230 = sbr.rel (%p6782_p11) target bundleno = 1090 (0x442), region = 40  ;;  %s4902_s29 = sshll.u32 (!%p6782_p11), %s232_s18, 12 }
  0x5c   : > { %s233_s6 = scalar_lea.sflag (!%p6782_p11), [#allocation4], %s232_s18  ;;  %s6073_s7 = scalar_lea.vmem (!%p6782_p11), [#allocation3], %s4902_s29 }
  0x62   : > { %5862 = dma.done.wait (%p6783_p13), %s233_s6, 65536  }
  0x63   : > { %5864 = vsyncadd (%p6783_p13), %s233_s6, 4294901760  ;;  %p6784_p3 = scmp.eq.s32.totalorder %s5941_s22, 0 }
  0x65   : > { %5866 = dma.done.wait (%p6784_p3), [#allocation6], 8208   ;;  %p6785_p8 = pmov %p6784_p3 }
  0x66   : > { %p270_p7 = scmp.lt.s32.totalorder %s5941_s22, 1  ;;  %p6786_p10 = scmp.ne.s32.totalorder %s5941_s22, 0 }
  0x67   : > { %5868 = vsyncadd (%p6785_p8), [#allocation6], 4294959088  ;;  %v279_v0 = vld [vmem:[%s6769_s0] sm:$0xff] (!%p6786_p10)  ;;  %v280_v1 = vld [vmem:[%s6769_s0 + $0x8] sm:$0xff] (!%p6786_p10) }
  0x68   : > { %s271_s24 = scalar_select %p270_p7, %s5941_s22, 1 }
  0x69   : > { %278 = sbr.rel (%p6786_p10) target bundleno = 112 (0x70), region = 56  ;;  %v281_v2 = vld [vmem:[%s6769_s0 + $0x10] sm:$0xff] (!%p6786_p10)  ;;  %287 = vst [vmem:[#allocation2] sm:$0xff] (!%p6786_p10), %v279_v0  ;;  %288 = vst [vmem:[#allocation2 + $0x8] sm:$0xff] (!%p6786_p10), %v280_v1  ;;  %v282_v3 = vld [vmem:[%s6769_s0 + $0x18] sm:$0xff] (!%p6786_p10) }
  0x6a   : > { %s4905_s25 = sshll.u32 %s271_s24, 3  ;;  %289 = vst [vmem:[#allocation2 + $0x10] sm:$0xff] (!%p6786_p10), %v281_v2  ;;  %v283_v4 = vld [vmem:[%s6769_s0 + $0x20] sm:$0xff] (!%p6786_p10)  ;;  %v284_v5 = vld [vmem:[%s6769_s0 + $0x28] sm:$0xff] (!%p6786_p10)  ;;  %290 = vst [vmem:[#allocation2 + $0x18] sm:$0xff] (!%p6786_p10), %v282_v3 }
  0x6b   : > { %s6088_s21 = scalar_lea.vmem %s6771_s2, %s4905_s25  ;;  %291 = vst [vmem:[#allocation2 + $0x20] sm:$0xff] (!%p6786_p10), %v283_v4  ;;  %292 = vst [vmem:[#allocation2 + $0x28] sm:$0xff] (!%p6786_p10), %v284_v5  ;;  %v285_v6 = vld [vmem:[%s6769_s0 + $0x30] sm:$0xff] (!%p6786_p10)  ;;  %v286_v7 = vld [vmem:[%s6769_s0 + $0x38] sm:$0xff] (!%p6786_p10) }
  0x6c   : > { %293 = vst [vmem:[#allocation2 + $0x30] sm:$0xff] (!%p6786_p10), %v285_v6  ;;  %294 = vst [vmem:[#allocation2 + $0x38] sm:$0xff] (!%p6786_p10), %v286_v7 }
  0x70 PF: > { %v311_v8 = vld [vmem:[%s6073_s7] sm:$0xff]  ;;  %v312_v10 = vld [vmem:[%s6073_s7 + $0x8] sm:$0xff]  ;;  %p5419_p9 = scmp.ne.s32.totalorder %s5941_s22, 1 }
  0x71   : > { %v315_v9 = vld [vmem:[%s6073_s7 + $0x20] sm:$0xff]  ;;  %v316_v12 = vld [vmem:[%s6073_s7 + $0x28] sm:$0xff] }
  0x72   : > { %v4908_v11 = vcombine.high %v311_v8, %v315_v9  ;;  %v4907_v13 = vcombine.low %v311_v8, %v315_v9  ;;  %v319_v14 = vld [vmem:[%s6073_s7 + $0x40] sm:$0xff]  ;;  %v4910_v16 = vcombine.high %v312_v10, %v316_v12  ;;  %v4909_v17 = vcombine.low %v312_v10, %v316_v12  ;;  %v320_v19 = vld [vmem:[%s6073_s7 + $0x48] sm:$0xff] }
  0x73   : > { %v323_v15 = vld [vmem:[%s6073_s7 + $0x60] sm:$0xff]  ;;  %v324_v20 = vld [vmem:[%s6073_s7 + $0x68] sm:$0xff] }
  0x74   : > { %v4916_v18 = vcombine.high %v319_v14, %v323_v15  ;;  %v327_v21 = vld [vmem:[%s6073_s7 + $0x80] sm:$0xff]  ;;  %3460 = vmatprep.subr.bf16.mxu0 %v4908_v11  ;;  %v4918_v22 = vcombine.high %v320_v19, %v324_v20  ;;  %v328_v24 = vld [vmem:[%s6073_s7 + $0x88] sm:$0xff]  ;;  %3624 = vmatprep.subr.bf16.mxu1 %v4910_v16  ;;  %v4915_v26 = vcombine.low %v319_v14, %v323_v15 }
  0x75   : > { %v331_v23 = vld [vmem:[%s6073_s7 + $0xa0] sm:$0xff]  ;;  %v332_v25 = vld [vmem:[%s6073_s7 + $0xa8] sm:$0xff]  ;;  %3461 = vmatpush1.bf16.msra.mxu0 %v4907_v13  ;;  %3625 = vmatpush1.bf16.msra.mxu1 %v4909_v17  ;;  %v4917_v27 = vcombine.low %v320_v19, %v324_v20 }
  0x76   : > { %3462 = vmatprep.subr.bf16.mxu0 %v4916_v18  ;;  %v4924_v28 = vcombine.high %v327_v21, %v331_v23  ;;  %3626 = vmatprep.subr.bf16.mxu1 %v4918_v22  ;;  %v4926_v29 = vcombine.high %v328_v24, %v332_v25  ;;  %v335_v30 = vld [vmem:[%s6073_s7 + $0xc0] sm:$0xff]  ;;  %v336_v32 = vld [vmem:[%s6073_s7 + $0xc8] sm:$0xff]  ;;  %v4923_v34 = vcombine.low %v327_v21, %v331_v23 }
  0x77   : > { %v339_v31 = vld [vmem:[%s6073_s7 + $0xe0] sm:$0xff]  ;;  %v340_v33 = vld [vmem:[%s6073_s7 + $0xe8] sm:$0xff]  ;;  %v4925_v35 = vcombine.low %v328_v24, %v332_v25 }
  0x78   : > { %v4932_v36 = vcombine.high %v335_v30, %v339_v31  ;;  %v4934_v37 = vcombine.high %v336_v32, %v340_v33  ;;  %v343_v38 = vld [vmem:[%s6073_s7 + $0x100] sm:$0xff]  ;;  %v344_v40 = vld [vmem:[%s6073_s7 + $0x108] sm:$0xff]  ;;  %v4931_v42 = vcombine.low %v335_v30, %v339_v31  ;;  %v4933_v43 = vcombine.low %v336_v32, %v340_v33 }
  0x79   : > { %3463 = vmatpush1.bf16.msra.mxu0 %v4915_v26  ;;  %3627 = vmatpush1.bf16.msra.mxu1 %v4917_v27  ;;  %v347_v39 = vld [vmem:[%s6073_s7 + $0x120] sm:$0xff]  ;;  %v348_v41 = vld [vmem:[%s6073_s7 + $0x128] sm:$0xff] }
  0x7a   : > { %3464 = vmatprep.subr.bf16.mxu0 %v4924_v28  ;;  %3628 = vmatprep.subr.bf16.mxu1 %v4926_v29  ;;  %v4940_v44 = vcombine.high %v343_v38, %v347_v39  ;;  %v4942_v45 = vcombine.high %v344_v40, %v348_v41  ;;  %v351_v46 = vld [vmem:[%s6073_s7 + $0x140] sm:$0xff]  ;;  %v352_v48 = vld [vmem:[%s6073_s7 + $0x148] sm:$0xff]  ;;  %v4939_v50 = vcombine.low %v343_v38, %v347_v39 }
  0x7b   : > { %v355_v47 = vld [vmem:[%s6073_s7 + $0x160] sm:$0xff]  ;;  %v356_v49 = vld [vmem:[%s6073_s7 + $0x168] sm:$0xff]  ;;  %v4941_v51 = vcombine.low %v344_v40, %v348_v41 }
  0x7c   : > { %v4948_v52 = vcombine.high %v351_v46, %v355_v47  ;;  %v4950_v53 = vcombine.high %v352_v48, %v356_v49  ;;  %v359_v54 = vld [vmem:[%s6073_s7 + $0x180] sm:$0xff]  ;;  %v360_v56 = vld [vmem:[%s6073_s7 + $0x188] sm:$0xff]  ;;  %v4947_v58 = vcombine.low %v351_v46, %v355_v47  ;;  %v4949_v59 = vcombine.low %v352_v48, %v356_v49 }
  0x7d   : > { %3465 = vmatpush1.bf16.msra.mxu0 %v4923_v34  ;;  %3629 = vmatpush1.bf16.msra.mxu1 %v4925_v35  ;;  %v363_v55 = vld [vmem:[%s6073_s7 + $0x1a0] sm:$0xff]  ;;  %v364_v57 = vld [vmem:[%s6073_s7 + $0x1a8] sm:$0xff] }
  0x7e   : > { %3466 = vmatprep.subr.bf16.mxu0 %v4932_v36  ;;  %3630 = vmatprep.subr.bf16.mxu1 %v4934_v37  ;;  %v4956_v60 = vcombine.high %v359_v54, %v363_v55  ;;  %v296_v61 = vld [vmem:[#allocation2 + $0x8] sm:$0xff]  ;;  %v4958_v62 = vcombine.high %v360_v56, %v364_v57  ;;  %v367_v63 = vld [vmem:[%s6073_s7 + $0x1c0] sm:$0xff]  ;;  %v4955_v4 = vcombine.low %v359_v54, %v363_v55 }
  0x7f   : > { %v371_v0 = vld [vmem:[%s6073_s7 + $0x1e0] sm:$0xff]  ;;  %v6146_v1 = vpack.c.bf16 %v296_v61, %v296_v61  ;;  %v368_v2 = vld [vmem:[%s6073_s7 + $0x1c8] sm:$0xff]  ;;  %v4957_v5 = vcombine.low %v360_v56, %v364_v57 }
  0x80   : > { %v372_v3 = vld [vmem:[%s6073_s7 + $0x1e8] sm:$0xff]  ;;  %v4964_v6 = vcombine.high %v367_v63, %v371_v0  ;;  %v375_v8 = vld [vmem:[%s6073_s7 + $0x200] sm:$0xff]  ;;  %v4963_v12 = vcombine.low %v367_v63, %v371_v0 }
  0x81   : > { %3467 = vmatpush1.bf16.msra.mxu0 %v4931_v42  ;;  %3631 = vmatpush1.bf16.msra.mxu1 %v4933_v43  ;;  %v4966_v7 = vcombine.high %v368_v2, %v372_v3  ;;  %v379_v9 = vld [vmem:[%s6073_s7 + $0x220] sm:$0xff]  ;;  %v376_v10 = vld [vmem:[%s6073_s7 + $0x208] sm:$0xff]  ;;  %v4965_v13 = vcombine.low %v368_v2, %v372_v3 }
  0x82   : > { %3468 = vmatprep.subr.bf16.mxu0 %v4940_v44  ;;  %3632 = vmatprep.subr.bf16.mxu1 %v4942_v45  ;;  %v380_v11 = vld [vmem:[%s6073_s7 + $0x228] sm:$0xff]  ;;  %v4972_v14 = vcombine.high %v375_v8, %v379_v9  ;;  %v383_v16 = vld [vmem:[%s6073_s7 + $0x240] sm:$0xff]  ;;  %v4971_v20 = vcombine.low %v375_v8, %v379_v9 }
  0x83   : > { %3492 = vmatprep.mubr.bf16.mxu0 %v6146_v1  ;;  %3656 = vmatprep.mubr.bf16.mxu1 %v6146_v1  ;;  %v4974_v15 = vcombine.high %v376_v10, %v380_v11  ;;  %v387_v17 = vld [vmem:[%s6073_s7 + $0x260] sm:$0xff]  ;;  %v384_v18 = vld [vmem:[%s6073_s7 + $0x248] sm:$0xff]  ;;  %v4973_v21 = vcombine.low %v376_v10, %v380_v11 }
  0x84   : > { %v388_v19 = vld [vmem:[%s6073_s7 + $0x268] sm:$0xff]  ;;  %v4980_v22 = vcombine.high %v383_v16, %v387_v17  ;;  %v391_v24 = vld [vmem:[%s6073_s7 + $0x280] sm:$0xff]  ;;  %v4979_v28 = vcombine.low %v383_v16, %v387_v17 }
  0x85   : > { %3469 = vmatpush1.bf16.msra.mxu0 %v4939_v50  ;;  %3633 = vmatpush1.bf16.msra.mxu1 %v4941_v51  ;;  %v4982_v23 = vcombine.high %v384_v18, %v388_v19  ;;  %v395_v25 = vld [vmem:[%s6073_s7 + $0x2a0] sm:$0xff]  ;;  %v392_v26 = vld [vmem:[%s6073_s7 + $0x288] sm:$0xff]  ;;  %v4981_v29 = vcombine.low %v384_v18, %v388_v19 }
  0x86   : > { %3470 = vmatprep.subr.bf16.mxu0 %v4948_v52  ;;  %3634 = vmatprep.subr.bf16.mxu1 %v4950_v53  ;;  %v396_v27 = vld [vmem:[%s6073_s7 + $0x2a8] sm:$0xff]  ;;  %v4988_v30 = vcombine.high %v391_v24, %v395_v25  ;;  %v399_v32 = vld [vmem:[%s6073_s7 + $0x2c0] sm:$0xff]  ;;  %v4987_v36 = vcombine.low %v391_v24, %v395_v25 }
  0x87   : > { %v4990_v31 = vcombine.high %v392_v26, %v396_v27  ;;  %v403_v33 = vld [vmem:[%s6073_s7 + $0x2e0] sm:$0xff]  ;;  %v400_v34 = vld [vmem:[%s6073_s7 + $0x2c8] sm:$0xff]  ;;  %v4989_v37 = vcombine.low %v392_v26, %v396_v27 }
  0x88   : > { %v404_v35 = vld [vmem:[%s6073_s7 + $0x2e8] sm:$0xff]  ;;  %v4996_v38 = vcombine.high %v399_v32, %v403_v33  ;;  %v407_v40 = vld [vmem:[%s6073_s7 + $0x300] sm:$0xff]  ;;  %v4995_v44 = vcombine.low %v399_v32, %v403_v33 }
  0x89   : > { %3471 = vmatpush1.bf16.msra.mxu0 %v4947_v58  ;;  %3635 = vmatpush1.bf16.msra.mxu1 %v4949_v59  ;;  %v4998_v39 = vcombine.high %v400_v34, %v404_v35  ;;  %v411_v41 = vld [vmem:[%s6073_s7 + $0x320] sm:$0xff]  ;;  %v408_v42 = vld [vmem:[%s6073_s7 + $0x308] sm:$0xff]  ;;  %v4997_v45 = vcombine.low %v400_v34, %v404_v35 }
  0x8a   : > { %3472 = vmatprep.subr.bf16.mxu0 %v4956_v60  ;;  %3636 = vmatprep.subr.bf16.mxu1 %v4958_v62  ;;  %v412_v43 = vld [vmem:[%s6073_s7 + $0x328] sm:$0xff]  ;;  %v5004_v46 = vcombine.high %v407_v40, %v411_v41  ;;  %v415_v48 = vld [vmem:[%s6073_s7 + $0x340] sm:$0xff]  ;;  %v5003_v52 = vcombine.low %v407_v40, %v411_v41 }
  0x8b   : > { %v5006_v47 = vcombine.high %v408_v42, %v412_v43  ;;  %v419_v49 = vld [vmem:[%s6073_s7 + $0x360] sm:$0xff]  ;;  %v416_v50 = vld [vmem:[%s6073_s7 + $0x348] sm:$0xff]  ;;  %v5005_v53 = vcombine.low %v408_v42, %v412_v43 }
  0x8c   : > { %v420_v51 = vld [vmem:[%s6073_s7 + $0x368] sm:$0xff]  ;;  %v5012_v54 = vcombine.high %v415_v48, %v419_v49  ;;  %v423_v56 = vld [vmem:[%s6073_s7 + $0x380] sm:$0xff]  ;;  %v5011_v60 = vcombine.low %v415_v48, %v419_v49 }
  0x8d   : > { %3473 = vmatpush1.bf16.msra.mxu0 %v4955_v4  ;;  %3637 = vmatpush1.bf16.msra.mxu1 %v4957_v5  ;;  %v5014_v55 = vcombine.high %v416_v50, %v420_v51  ;;  %v427_v57 = vld [vmem:[%s6073_s7 + $0x3a0] sm:$0xff]  ;;  %v424_v58 = vld [vmem:[%s6073_s7 + $0x388] sm:$0xff]  ;;  %v5013_v61 = vcombine.low %v416_v50, %v420_v51 }
  0x8e   : > { %3474 = vmatprep.subr.bf16.mxu0 %v4964_v6  ;;  %3638 = vmatprep.subr.bf16.mxu1 %v4966_v7  ;;  %v428_v59 = vld [vmem:[%s6073_s7 + $0x3a8] sm:$0xff]  ;;  %v5020_v62 = vcombine.high %v423_v56, %v427_v57  ;;  %v431_v0 = vld [vmem:[%s6073_s7 + $0x3c0] sm:$0xff]  ;;  %v5019_v5 = vcombine.low %v423_v56, %v427_v57 }
  0x8f   : > { %v5022_v63 = vcombine.high %v424_v58, %v428_v59  ;;  %v435_v2 = vld [vmem:[%s6073_s7 + $0x3e0] sm:$0xff]  ;;  %v432_v3 = vld [vmem:[%s6073_s7 + $0x3c8] sm:$0xff]  ;;  %v5021_v6 = vcombine.low %v424_v58, %v428_v59 }
  0x90   : > { %v436_v4 = vld [vmem:[%s6073_s7 + $0x3e8] sm:$0xff]  ;;  %v5028_v7 = vcombine.high %v431_v0, %v435_v2  ;;  %v439_v9 = vld [vmem:[%s6073_s7 + $0x400] sm:$0xff] }
  0x91   : > { %3475 = vmatpush1.bf16.msra.mxu0 %v4963_v12  ;;  %3639 = vmatpush1.bf16.msra.mxu1 %v4965_v13  ;;  %v5030_v8 = vcombine.high %v432_v3, %v436_v4  ;;  %v443_v10 = vld [vmem:[%s6073_s7 + $0x420] sm:$0xff]  ;;  %v440_v11 = vld [vmem:[%s6073_s7 + $0x408] sm:$0xff]  ;;  %v5027_v13 = vcombine.low %v431_v0, %v435_v2 }
  0x92   : > { %3476 = vmatprep.subr.bf16.mxu0 %v4972_v14  ;;  %3640 = vmatprep.subr.bf16.mxu1 %v4974_v15  ;;  %v444_v12 = vld [vmem:[%s6073_s7 + $0x428] sm:$0xff]  ;;  %v295_v14 = vld [vmem:[#allocation2] sm:$0xff]  ;;  %v5029_v15 = vcombine.low %v432_v3, %v436_v4  ;;  %v5036_v16 = vcombine.high %v439_v9, %v443_v10  ;;  %v5035_v24 = vcombine.low %v439_v9, %v443_v10 }
  0x93   : > { %v5038_v17 = vcombine.high %v440_v11, %v444_v12  ;;  %v447_v18 = vld [vmem:[%s6073_s7 + $0x440] sm:$0xff]  ;;  %v5037_v25 = vcombine.low %v440_v11, %v444_v12  ;;  %v460_v32 = vld [vmem:[%s6073_s7 + $0x4a8] sm:$0xff] }
  0x94   : > { %v451_v19 = vld [vmem:[%s6073_s7 + $0x460] sm:$0xff]  ;;  %v468_v40 = vld [vmem:[%s6073_s7 + $0x4e8] sm:$0xff] }
  0x95   : > { %3477 = vmatpush1.bf16.msra.mxu0 %v4971_v20  ;;  %3641 = vmatpush1.bf16.msra.mxu1 %v4973_v21  ;;  %v6190_v20 = vpack.c.bf16 %v295_v14, %v295_v14  ;;  %v448_v21 = vld [vmem:[%s6073_s7 + $0x448] sm:$0xff]  ;;  %v5044_v26 = vcombine.high %v447_v18, %v451_v19  ;;  %v5043_v33 = vcombine.low %v447_v18, %v451_v19  ;;  %v503_v14 = vld [vmem:[%s6073_s7 + $0x600] sm:$0xff] }
  0x96   : > { %3478 = vmatprep.subr.bf16.mxu0 %v4980_v22  ;;  %3642 = vmatprep.subr.bf16.mxu1 %v4982_v23  ;;  %v452_v22 = vld [vmem:[%s6073_s7 + $0x468] sm:$0xff]  ;;  %v298_v23 = vld [vmem:[#allocation2 + $0x18] sm:$0xff] }
  0x97   : > { %v5046_v27 = vcombine.high %v448_v21, %v452_v22  ;;  %v5045_v34 = vcombine.low %v448_v21, %v452_v22  ;;  %v476_v48 = vld [vmem:[%s6073_s7 + $0x528] sm:$0xff] }
  0x98   : > { %v484_v56 = vld [vmem:[%s6073_s7 + $0x568] sm:$0xff] }
  0x99   : > { %3479 = vmatpush1.bf16.msra.mxu0 %v4979_v28  ;;  %3643 = vmatpush1.bf16.msra.mxu1 %v4981_v29  ;;  %v455_v28 = vld [vmem:[%s6073_s7 + $0x480] sm:$0xff]  ;;  %v492_v0 = vld [vmem:[%s6073_s7 + $0x5a8] sm:$0xff] }
  0x9a   : > { %3480 = vmatprep.subr.bf16.mxu0 %v4988_v30  ;;  %3644 = vmatprep.subr.bf16.mxu1 %v4990_v31  ;;  %v459_v29 = vld [vmem:[%s6073_s7 + $0x4a0] sm:$0xff]  ;;  %v6196_v30 = vpack.c.bf16 %v298_v23, %v298_v23  ;;  %v456_v31 = vld [vmem:[%s6073_s7 + $0x488] sm:$0xff] }
  0x9b   : > { %v5052_v35 = vcombine.high %v455_v28, %v459_v29  ;;  %v5051_v41 = vcombine.low %v455_v28, %v459_v29  ;;  %v5053_v42 = vcombine.low %v456_v31, %v460_v32  ;;  %v500_v9 = vld [vmem:[%s6073_s7 + $0x5e8] sm:$0xff]  ;;  %v511_v23 = vld [vmem:[%s6073_s7 + $0x640] sm:$0xff] }
  0x9d   : > { %3481 = vmatpush1.bf16.msra.mxu0 %v4987_v36  ;;  %3645 = vmatpush1.bf16.msra.mxu1 %v4989_v37  ;;  %v5054_v36 = vcombine.high %v456_v31, %v460_v32  ;;  %v463_v37 = vld [vmem:[%s6073_s7 + $0x4c0] sm:$0xff] }
  0x9e   : > { %3482 = vmatprep.subr.bf16.mxu0 %v4996_v38  ;;  %3646 = vmatprep.subr.bf16.mxu1 %v4998_v39  ;;  %v467_v38 = vld [vmem:[%s6073_s7 + $0x4e0] sm:$0xff]  ;;  %v464_v39 = vld [vmem:[%s6073_s7 + $0x4c8] sm:$0xff] }
  0x9f   : > { %v5060_v43 = vcombine.high %v463_v37, %v467_v38  ;;  %v5059_v49 = vcombine.low %v463_v37, %v467_v38  ;;  %v5061_v50 = vcombine.low %v464_v39, %v468_v40  ;;  %v519_v32 = vld [vmem:[%s6073_s7 + $0x680] sm:$0xff] }
  0xa1   : > { %3483 = vmatpush1.bf16.msra.mxu0 %v4995_v44  ;;  %3647 = vmatpush1.bf16.msra.mxu1 %v4997_v45  ;;  %v5062_v44 = vcombine.high %v464_v39, %v468_v40  ;;  %v471_v45 = vld [vmem:[%s6073_s7 + $0x500] sm:$0xff] }
  0xa2   : > { %3484 = vmatprep.subr.bf16.mxu0 %v5004_v46  ;;  %3648 = vmatprep.subr.bf16.mxu1 %v5006_v47  ;;  %v475_v46 = vld [vmem:[%s6073_s7 + $0x520] sm:$0xff]  ;;  %v472_v47 = vld [vmem:[%s6073_s7 + $0x508] sm:$0xff] }
  0xa3   : > { %v5068_v51 = vcombine.high %v471_v45, %v475_v46  ;;  %v5067_v57 = vcombine.low %v471_v45, %v475_v46  ;;  %v5069_v58 = vcombine.low %v472_v47, %v476_v48  ;;  %v527_v40 = vld [vmem:[%s6073_s7 + $0x6c0] sm:$0xff] }
  0xa5   : > { %3485 = vmatpush1.bf16.msra.mxu0 %v5003_v52  ;;  %3649 = vmatpush1.bf16.msra.mxu1 %v5005_v53  ;;  %v5070_v52 = vcombine.high %v472_v47, %v476_v48  ;;  %v479_v53 = vld [vmem:[%s6073_s7 + $0x540] sm:$0xff] }
  0xa6   : > { %3486 = vmatprep.subr.bf16.mxu0 %v5012_v54  ;;  %3650 = vmatprep.subr.bf16.mxu1 %v5014_v55  ;;  %v483_v54 = vld [vmem:[%s6073_s7 + $0x560] sm:$0xff]  ;;  %v480_v55 = vld [vmem:[%s6073_s7 + $0x548] sm:$0xff] }
  0xa7   : > { %v5076_v59 = vcombine.high %v479_v53, %v483_v54  ;;  %v5075_v2 = vcombine.low %v479_v53, %v483_v54  ;;  %v5077_v3 = vcombine.low %v480_v55, %v484_v56  ;;  %v535_v48 = vld [vmem:[%s6073_s7 + $0x700] sm:$0xff] }
  0xa9   : > { %3487 = vmatpush1.bf16.msra.mxu0 %v5011_v60  ;;  %3651 = vmatpush1.bf16.msra.mxu1 %v5013_v61  ;;  %v5078_v60 = vcombine.high %v480_v55, %v484_v56  ;;  %v487_v61 = vld [vmem:[%s6073_s7 + $0x580] sm:$0xff] }
  0xaa   : > { %3488 = vmatprep.subr.bf16.mxu0 %v5020_v62  ;;  %3652 = vmatprep.subr.bf16.mxu1 %v5022_v63  ;;  %v491_v62 = vld [vmem:[%s6073_s7 + $0x5a0] sm:$0xff]  ;;  %v488_v63 = vld [vmem:[%s6073_s7 + $0x588] sm:$0xff] }
  0xab   : > { %v5084_v4 = vcombine.high %v487_v61, %v491_v62  ;;  %v5083_v10 = vcombine.low %v487_v61, %v491_v62  ;;  %v5085_v11 = vcombine.low %v488_v63, %v492_v0  ;;  %v543_v56 = vld [vmem:[%s6073_s7 + $0x740] sm:$0xff] }
  0xad   : > { %3489 = vmatpush1.bf16.msra.mxu0 %v5019_v5  ;;  %3653 = vmatpush1.bf16.msra.mxu1 %v5021_v6  ;;  %v5086_v5 = vcombine.high %v488_v63, %v492_v0  ;;  %v495_v6 = vld [vmem:[%s6073_s7 + $0x5c0] sm:$0xff] }
  0xae   : > { %3490 = vmatprep.subr.bf16.mxu0 %v5028_v7  ;;  %3654 = vmatprep.subr.bf16.mxu1 %v5030_v8  ;;  %v499_v7 = vld [vmem:[%s6073_s7 + $0x5e0] sm:$0xff]  ;;  %v496_v8 = vld [vmem:[%s6073_s7 + $0x5c8] sm:$0xff] }
  0xaf   : > { %v5092_v12 = vcombine.high %v495_v6, %v499_v7  ;;  %v5091_v18 = vcombine.low %v495_v6, %v499_v7  ;;  %v5093_v19 = vcombine.low %v496_v8, %v500_v9  ;;  %v551_v0 = vld [vmem:[%s6073_s7 + $0x780] sm:$0xff] }
  0xb1   : > { %3491 = vmatpush1.bf16.msra.mxu0 %v5027_v13  ;;  %3655 = vmatpush1.bf16.msra.mxu1 %v5029_v15  ;;  %v5094_v13 = vcombine.high %v496_v8, %v500_v9  ;;  %v507_v15 = vld [vmem:[%s6073_s7 + $0x620] sm:$0xff] }
  0xb2   : > { %3501 = vmatprep.subr.bf16.mxu0 %v5036_v16  ;;  %3665 = vmatprep.subr.bf16.mxu1 %v5038_v17  ;;  %v504_v16 = vld [vmem:[%s6073_s7 + $0x608] sm:$0xff]  ;;  %v5100_v21 = vcombine.high %v503_v14, %v507_v15  ;;  %v559_v9 = vld [vmem:[%s6073_s7 + $0x7c0] sm:$0xff] }
  0xb3   : > { %v508_v17 = vld [vmem:[%s6073_s7 + $0x628] sm:$0xff] }
  0xb4   : > { %3493 = vmatmul.mubr.bf16.vlgmr.msra.gmra.mrb[0].mxu0 %v6190_v20  ;;  %3657 = vmatmul.mubr.bf16.vlgmr.msra.gmra.mrb[0].mxu1 %v6190_v20  ;;  %v5102_v22 = vcombine.high %v504_v16, %v508_v17  ;;  %v5101_v28 = vcombine.low %v504_v16, %v508_v17  ;;  %v567_v17 = vld [vmem:[%s6073_s7 + $0x800] sm:$0xff] }
  0xb5   : > { %3502 = vmatpush1.bf16.msra.mxu0 %v5035_v24  ;;  %3666 = vmatpush1.bf16.msra.mxu1 %v5037_v25  ;;  %v515_v24 = vld [vmem:[%s6073_s7 + $0x660] sm:$0xff]  ;;  %v512_v25 = vld [vmem:[%s6073_s7 + $0x648] sm:$0xff] }
  0xb6   : > { %3503 = vmatprep.subr.bf16.mxu0 %v5044_v26  ;;  %3667 = vmatprep.subr.bf16.mxu1 %v5046_v27  ;;  %v516_v26 = vld [vmem:[%s6073_s7 + $0x668] sm:$0xff]  ;;  %v5099_v27 = vcombine.low %v503_v14, %v507_v15  ;;  %v5108_v29 = vcombine.high %v511_v23, %v515_v24 }
  0xb7   : > { %3533 = vmatprep.mubr.bf16.mxu0 %v6196_v30  ;;  %3697 = vmatprep.mubr.bf16.mxu1 %v6196_v30  ;;  %v5110_v31 = vcombine.high %v512_v25, %v516_v26  ;;  %v5109_v37 = vcombine.low %v512_v25, %v516_v26 }
  0xb9   : > { %3504 = vmatpush1.bf16.msra.mxu0 %v5043_v33  ;;  %3668 = vmatpush1.bf16.msra.mxu1 %v5045_v34  ;;  %v523_v33 = vld [vmem:[%s6073_s7 + $0x6a0] sm:$0xff]  ;;  %v520_v34 = vld [vmem:[%s6073_s7 + $0x688] sm:$0xff] }
  0xba   : > { %3505 = vmatprep.subr.bf16.mxu0 %v5052_v35  ;;  %3669 = vmatprep.subr.bf16.mxu1 %v5054_v36  ;;  %v524_v35 = vld [vmem:[%s6073_s7 + $0x6a8] sm:$0xff]  ;;  %v5107_v36 = vcombine.low %v511_v23, %v515_v24  ;;  %v5116_v38 = vcombine.high %v519_v32, %v523_v33  ;;  %v297_v23 = vld [vmem:[#allocation2 + $0x10] sm:$0xff] }
  0xbb   : > { %v5118_v39 = vcombine.high %v520_v34, %v524_v35  ;;  %v5117_v45 = vcombine.low %v520_v34, %v524_v35 }
  0xbd   : > { %3506 = vmatpush1.bf16.msra.mxu0 %v5051_v41  ;;  %3670 = vmatpush1.bf16.msra.mxu1 %v5053_v42  ;;  %v531_v41 = vld [vmem:[%s6073_s7 + $0x6e0] sm:$0xff]  ;;  %v528_v42 = vld [vmem:[%s6073_s7 + $0x6c8] sm:$0xff] }
  0xbe   : > { %3507 = vmatprep.subr.bf16.mxu0 %v5060_v43  ;;  %3671 = vmatprep.subr.bf16.mxu1 %v5062_v44  ;;  %v532_v43 = vld [vmem:[%s6073_s7 + $0x6e8] sm:$0xff]  ;;  %v5115_v44 = vcombine.low %v519_v32, %v523_v33  ;;  %v5124_v46 = vcombine.high %v527_v40, %v531_v41 }
  0xbf   : > { %v5126_v47 = vcombine.high %v528_v42, %v532_v43  ;;  %v5125_v53 = vcombine.low %v528_v42, %v532_v43  ;;  %v580_v32 = vld [vmem:[%s6073_s7 + $0x868] sm:$0xff] }
  0xc0   : > { %v300_v33 = vld [vmem:[#allocation2 + $0x28] sm:$0xff] }
  0xc1   : > { %3508 = vmatpush1.bf16.msra.mxu0 %v5059_v49  ;;  %3672 = vmatpush1.bf16.msra.mxu1 %v5061_v50  ;;  %v539_v49 = vld [vmem:[%s6073_s7 + $0x720] sm:$0xff]  ;;  %v536_v50 = vld [vmem:[%s6073_s7 + $0x708] sm:$0xff] }
  0xc2   : > { %3509 = vmatprep.subr.bf16.mxu0 %v5068_v51  ;;  %3673 = vmatprep.subr.bf16.mxu1 %v5070_v52  ;;  %v540_v51 = vld [vmem:[%s6073_s7 + $0x728] sm:$0xff]  ;;  %v5123_v52 = vcombine.low %v527_v40, %v531_v41  ;;  %v5132_v54 = vcombine.high %v535_v48, %v539_v49  ;;  %v6268_v40 = vpack.c.bf16 %v300_v33, %v300_v33 }
  0xc3   : > { %v5134_v55 = vcombine.high %v536_v50, %v540_v51  ;;  %v5133_v61 = vcombine.low %v536_v50, %v540_v51  ;;  %v584_v41 = vld [vmem:[%s6073_s7 + $0x888] sm:$0xff] }
  0xc4   : > { %v588_v42 = vld [vmem:[%s6073_s7 + $0x8a8] sm:$0xff] }
  0xc5   : > { %3510 = vmatpush1.bf16.msra.mxu0 %v5067_v57  ;;  %3674 = vmatpush1.bf16.msra.mxu1 %v5069_v58  ;;  %v547_v57 = vld [vmem:[%s6073_s7 + $0x760] sm:$0xff]  ;;  %v544_v58 = vld [vmem:[%s6073_s7 + $0x748] sm:$0xff] }
  0xc6   : > { %3511 = vmatprep.subr.bf16.mxu0 %v5076_v59  ;;  %3675 = vmatprep.subr.bf16.mxu1 %v5078_v60  ;;  %v548_v59 = vld [vmem:[%s6073_s7 + $0x768] sm:$0xff]  ;;  %v5131_v60 = vcombine.low %v535_v48, %v539_v49  ;;  %v5140_v62 = vcombine.high %v543_v56, %v547_v57  ;;  %v595_v48 = vld [vmem:[%s6073_s7 + $0x8e0] sm:$0xff] }
  0xc7   : > { %v5142_v63 = vcombine.high %v544_v58, %v548_v59  ;;  %v5141_v6 = vcombine.low %v544_v58, %v548_v59  ;;  %v592_v49 = vld [vmem:[%s6073_s7 + $0x8c8] sm:$0xff] }
  0xc8   : > { %v596_v50 = vld [vmem:[%s6073_s7 + $0x8e8] sm:$0xff] }
  0xc9   : > { %3512 = vmatpush1.bf16.msra.mxu0 %v5075_v2  ;;  %3676 = vmatpush1.bf16.msra.mxu1 %v5077_v3  ;;  %v555_v2 = vld [vmem:[%s6073_s7 + $0x7a0] sm:$0xff]  ;;  %v552_v3 = vld [vmem:[%s6073_s7 + $0x788] sm:$0xff] }
  0xca   : > { %3513 = vmatprep.subr.bf16.mxu0 %v5084_v4  ;;  %3677 = vmatprep.subr.bf16.mxu1 %v5086_v5  ;;  %v556_v4 = vld [vmem:[%s6073_s7 + $0x7a8] sm:$0xff]  ;;  %v5139_v5 = vcombine.low %v543_v56, %v547_v57  ;;  %v5148_v7 = vcombine.high %v551_v0, %v555_v2  ;;  %v603_v56 = vld [vmem:[%s6073_s7 + $0x920] sm:$0xff] }
  0xcb   : > { %v5150_v8 = vcombine.high %v552_v3, %v556_v4  ;;  %v5149_v14 = vcombine.low %v552_v3, %v556_v4  ;;  %v600_v57 = vld [vmem:[%s6073_s7 + $0x908] sm:$0xff] }
  0xcc   : > { %v604_v58 = vld [vmem:[%s6073_s7 + $0x928] sm:$0xff] }
  0xcd   : > { %3514 = vmatpush1.bf16.msra.mxu0 %v5083_v10  ;;  %3678 = vmatpush1.bf16.msra.mxu1 %v5085_v11  ;;  %v563_v10 = vld [vmem:[%s6073_s7 + $0x7e0] sm:$0xff]  ;;  %v560_v11 = vld [vmem:[%s6073_s7 + $0x7c8] sm:$0xff] }
  0xce   : > { %3515 = vmatprep.subr.bf16.mxu0 %v5092_v12  ;;  %3679 = vmatprep.subr.bf16.mxu1 %v5094_v13  ;;  %v564_v12 = vld [vmem:[%s6073_s7 + $0x7e8] sm:$0xff]  ;;  %v5147_v13 = vcombine.low %v551_v0, %v555_v2  ;;  %v5156_v15 = vcombine.high %v559_v9, %v563_v10  ;;  %v611_v0 = vld [vmem:[%s6073_s7 + $0x960] sm:$0xff] }
  0xcf   : > { %v5158_v16 = vcombine.high %v560_v11, %v564_v12  ;;  %v5157_v24 = vcombine.low %v560_v11, %v564_v12  ;;  %v608_v2 = vld [vmem:[%s6073_s7 + $0x948] sm:$0xff] }
  0xd0   : > { %v612_v3 = vld [vmem:[%s6073_s7 + $0x968] sm:$0xff] }
  0xd1   : > { %3516 = vmatpush1.bf16.msra.mxu0 %v5091_v18  ;;  %3680 = vmatpush1.bf16.msra.mxu1 %v5093_v19  ;;  %v571_v18 = vld [vmem:[%s6073_s7 + $0x820] sm:$0xff]  ;;  %v568_v19 = vld [vmem:[%s6073_s7 + $0x808] sm:$0xff] }
  0xd2   : > { %3517 = vmatprep.subr.bf16.mxu0 %v5100_v21  ;;  %3681 = vmatprep.subr.bf16.mxu1 %v5102_v22  ;;  %v572_v21 = vld [vmem:[%s6073_s7 + $0x828] sm:$0xff]  ;;  %v5155_v22 = vcombine.low %v559_v9, %v563_v10  ;;  %v5164_v25 = vcombine.high %v567_v17, %v571_v18  ;;  %v5163_v34 = vcombine.low %v567_v17, %v571_v18  ;;  %v619_v9 = vld [vmem:[%s6073_s7 + $0x9a0] sm:$0xff] }
  0xd3   : > { %v5166_v26 = vcombine.high %v568_v19, %v572_v21  ;;  %v5165_v35 = vcombine.low %v568_v19, %v572_v21  ;;  %v616_v10 = vld [vmem:[%s6073_s7 + $0x988] sm:$0xff]  ;;  %v627_v17 = vld [vmem:[%s6073_s7 + $0x9e0] sm:$0xff] }
  0xd4   : > { %v620_v11 = vld [vmem:[%s6073_s7 + $0x9a8] sm:$0xff] }
  0xd5   : > { %3518 = vmatpush1.bf16.msra.mxu0 %v5099_v27  ;;  %3682 = vmatpush1.bf16.msra.mxu1 %v5101_v28  ;;  %v575_v27 = vld [vmem:[%s6073_s7 + $0x840] sm:$0xff]  ;;  %v624_v18 = vld [vmem:[%s6073_s7 + $0x9c8] sm:$0xff] }
  0xd6   : > { %3519 = vmatprep.subr.bf16.mxu0 %v5108_v29  ;;  %3683 = vmatprep.subr.bf16.mxu1 %v5110_v31  ;;  %v579_v28 = vld [vmem:[%s6073_s7 + $0x860] sm:$0xff]  ;;  %v6262_v29 = vpack.c.bf16 %v297_v23, %v297_v23  ;;  %v576_v31 = vld [vmem:[%s6073_s7 + $0x848] sm:$0xff] }
  0xd7   : > { %v5171_v43 = vcombine.low %v575_v27, %v579_v28  ;;  %v628_v19 = vld [vmem:[%s6073_s7 + $0x9e8] sm:$0xff] }
  0xd9   : > { %3520 = vmatpush1.bf16.msra.mxu0 %v5107_v36  ;;  %3684 = vmatpush1.bf16.msra.mxu1 %v5109_v37  ;;  %v5172_v36 = vcombine.high %v575_v27, %v579_v28  ;;  %v5174_v37 = vcombine.high %v576_v31, %v580_v32  ;;  %v632_v27 = vld [vmem:[%s6073_s7 + $0xa08] sm:$0xff] }
  0xda   : > { %3521 = vmatprep.subr.bf16.mxu0 %v5116_v38  ;;  %3685 = vmatprep.subr.bf16.mxu1 %v5118_v39  ;;  %v583_v38 = vld [vmem:[%s6073_s7 + $0x880] sm:$0xff]  ;;  %v636_v28 = vld [vmem:[%s6073_s7 + $0xa28] sm:$0xff] }
  0xdb   : > { %v587_v39 = vld [vmem:[%s6073_s7 + $0x8a0] sm:$0xff] }
  0xdc   : > { %v5179_v51 = vcombine.low %v583_v38, %v587_v39 }
  0xdd   : > { %3522 = vmatpush1.bf16.msra.mxu0 %v5115_v44  ;;  %3686 = vmatpush1.bf16.msra.mxu1 %v5117_v45  ;;  %v5173_v44 = vcombine.low %v576_v31, %v580_v32  ;;  %v5180_v45 = vcombine.high %v583_v38, %v587_v39  ;;  %v5221_v32 = vcombine.low %v624_v18, %v628_v19  ;;  %v644_v38 = vld [vmem:[%s6073_s7 + $0xa68] sm:$0xff] }
  0xde   : > { %3523 = vmatprep.subr.bf16.mxu0 %v5124_v46  ;;  %3687 = vmatprep.subr.bf16.mxu1 %v5126_v47  ;;  %v5182_v46 = vcombine.high %v584_v41, %v588_v42  ;;  %v591_v47 = vld [vmem:[%s6073_s7 + $0x8c0] sm:$0xff] }
  0xdf   : > { %v5187_v59 = vcombine.low %v591_v47, %v595_v48 }
  0xe1   : > { %3524 = vmatpush1.bf16.msra.mxu0 %v5123_v52  ;;  %3688 = vmatpush1.bf16.msra.mxu1 %v5125_v53  ;;  %v5181_v52 = vcombine.low %v584_v41, %v588_v42  ;;  %v5188_v53 = vcombine.high %v591_v47, %v595_v48  ;;  %v5229_v41 = vcombine.low %v632_v27, %v636_v28  ;;  %v652_v47 = vld [vmem:[%s6073_s7 + $0xaa8] sm:$0xff] }
  0xe2   : > { %3525 = vmatprep.subr.bf16.mxu0 %v5132_v54  ;;  %3689 = vmatprep.subr.bf16.mxu1 %v5134_v55  ;;  %v5190_v54 = vcombine.high %v592_v49, %v596_v50  ;;  %v599_v55 = vld [vmem:[%s6073_s7 + $0x900] sm:$0xff] }
  0xe3   : > { %v5195_v4 = vcombine.low %v599_v55, %v603_v56 }
  0xe5   : > { %3526 = vmatpush1.bf16.msra.mxu0 %v5131_v60  ;;  %3690 = vmatpush1.bf16.msra.mxu1 %v5133_v61  ;;  %v5189_v60 = vcombine.low %v592_v49, %v596_v50  ;;  %v5196_v61 = vcombine.high %v599_v55, %v603_v56  ;;  %v660_v55 = vld [vmem:[%s6073_s7 + $0xae8] sm:$0xff] }
  0xe6   : > { %3527 = vmatprep.subr.bf16.mxu0 %v5140_v62  ;;  %3691 = vmatprep.subr.bf16.mxu1 %v5142_v63  ;;  %v5198_v62 = vcombine.high %v600_v57, %v604_v58  ;;  %v607_v63 = vld [vmem:[%s6073_s7 + $0x940] sm:$0xff] }
  0xe7   : > { %v5203_v12 = vcombine.low %v607_v63, %v611_v0 }
  0xe9   : > { %3528 = vmatpush1.bf16.msra.mxu0 %v5139_v5  ;;  %3692 = vmatpush1.bf16.msra.mxu1 %v5141_v6  ;;  %v5197_v5 = vcombine.low %v600_v57, %v604_v58  ;;  %v5204_v6 = vcombine.high %v607_v63, %v611_v0  ;;  %v668_v63 = vld [vmem:[%s6073_s7 + $0xb28] sm:$0xff] }
  0xea   : > { %3529 = vmatprep.subr.bf16.mxu0 %v5148_v7  ;;  %3693 = vmatprep.subr.bf16.mxu1 %v5150_v8  ;;  %v5206_v7 = vcombine.high %v608_v2, %v612_v3  ;;  %v615_v8 = vld [vmem:[%s6073_s7 + $0x980] sm:$0xff] }
  0xeb   : > { %v5211_v21 = vcombine.low %v615_v8, %v619_v9 }
  0xed   : > { %3530 = vmatpush1.bf16.msra.mxu0 %v5147_v13  ;;  %3694 = vmatpush1.bf16.msra.mxu1 %v5149_v14  ;;  %v5205_v13 = vcombine.low %v608_v2, %v612_v3  ;;  %v5212_v14 = vcombine.high %v615_v8, %v619_v9  ;;  %v676_v8 = vld [vmem:[%s6073_s7 + $0xb68] sm:$0xff] }
  0xee   : > { %3531 = vmatprep.subr.bf16.mxu0 %v5156_v15  ;;  %3695 = vmatprep.subr.bf16.mxu1 %v5158_v16  ;;  %v5214_v15 = vcombine.high %v616_v10, %v620_v11  ;;  %v623_v16 = vld [vmem:[%s6073_s7 + $0x9c0] sm:$0xff] }
  0xef   : > { %v5220_v23 = vcombine.high %v623_v16, %v627_v17  ;;  %v5219_v31 = vcombine.low %v623_v16, %v627_v17  ;;  %v684_v16 = vld [vmem:[%s6073_s7 + $0xba8] sm:$0xff] }
  0xf1   : > { %3532 = vmatpush1.bf16.msra.mxu0 %v5155_v22  ;;  %3696 = vmatpush1.bf16.msra.mxu1 %v5157_v24  ;;  %v5213_v22 = vcombine.low %v616_v10, %v620_v11  ;;  %v5222_v24 = vcombine.high %v624_v18, %v628_v19 }
  0xf2   : > { %3542 = vmatprep.subr.bf16.mxu0 %v5164_v25  ;;  %3706 = vmatprep.subr.bf16.mxu1 %v5166_v26  ;;  %v631_v25 = vld [vmem:[%s6073_s7 + $0xa00] sm:$0xff] }
  0xf3   : > { %v635_v26 = vld [vmem:[%s6073_s7 + $0xa20] sm:$0xff] }
  0xf4   : > { %3534 = vmatmul.mubr.bf16.vlgmr.msra.gmra.mrb[0].mxu0 %v6262_v29  ;;  %3698 = vmatmul.mubr.bf16.vlgmr.msra.gmra.mrb[0].mxu1 %v6262_v29  ;;  %v5228_v33 = vcombine.high %v631_v25, %v635_v26  ;;  %v5227_v39 = vcombine.low %v631_v25, %v635_v26  ;;  %v692_v25 = vld [vmem:[%s6073_s7 + $0xbe8] sm:$0xff] }
  0xf5   : > { %3543 = vmatpush1.bf16.msra.mxu0 %v5163_v34  ;;  %3707 = vmatpush1.bf16.msra.mxu1 %v5165_v35  ;;  %v5230_v34 = vcombine.high %v632_v27, %v636_v28  ;;  %v639_v35 = vld [vmem:[%s6073_s7 + $0xa40] sm:$0xff] }
  0xf6   : > { %3544 = vmatprep.subr.bf16.mxu0 %v5172_v36  ;;  %3708 = vmatprep.subr.bf16.mxu1 %v5174_v37  ;;  %v643_v36 = vld [vmem:[%s6073_s7 + $0xa60] sm:$0xff]  ;;  %v640_v37 = vld [vmem:[%s6073_s7 + $0xa48] sm:$0xff] }
  0xf7   : > { %3574 = vmatprep.mubr.bf16.mxu0 %v6268_v40  ;;  %3738 = vmatprep.mubr.bf16.mxu1 %v6268_v40  ;;  %v5236_v42 = vcombine.high %v639_v35, %v643_v36  ;;  %v5235_v48 = vcombine.low %v639_v35, %v643_v36  ;;  %v5237_v49 = vcombine.low %v640_v37, %v644_v38  ;;  %v700_v35 = vld [vmem:[%s6073_s7 + $0xc28] sm:$0xff] }
  0xf9   : > { %3545 = vmatpush1.bf16.msra.mxu0 %v5171_v43  ;;  %3709 = vmatpush1.bf16.msra.mxu1 %v5173_v44  ;;  %v5238_v43 = vcombine.high %v640_v37, %v644_v38  ;;  %v647_v44 = vld [vmem:[%s6073_s7 + $0xa80] sm:$0xff] }
  0xfa   : > { %3546 = vmatprep.subr.bf16.mxu0 %v5180_v45  ;;  %3710 = vmatprep.subr.bf16.mxu1 %v5182_v46  ;;  %v651_v45 = vld [vmem:[%s6073_s7 + $0xaa0] sm:$0xff]  ;;  %v648_v46 = vld [vmem:[%s6073_s7 + $0xa88] sm:$0xff] }
  0xfb   : > { %v5244_v50 = vcombine.high %v647_v44, %v651_v45  ;;  %v5243_v56 = vcombine.low %v647_v44, %v651_v45  ;;  %v5245_v57 = vcombine.low %v648_v46, %v652_v47  ;;  %v299_v37 = vld [vmem:[#allocation2 + $0x20] sm:$0xff]  ;;  %v704_v45 = vld [vmem:[%s6073_s7 + $0xc48] sm:$0xff] }
  0xfc   : > { %v6334_v44 = vpack.c.bf16 %v299_v37, %v299_v37 }
  0xfd   : > { %3547 = vmatpush1.bf16.msra.mxu0 %v5179_v51  ;;  %3711 = vmatpush1.bf16.msra.mxu1 %v5181_v52  ;;  %v5246_v51 = vcombine.high %v648_v46, %v652_v47  ;;  %v655_v52 = vld [vmem:[%s6073_s7 + $0xac0] sm:$0xff]  ;;  %v708_v46 = vld [vmem:[%s6073_s7 + $0xc68] sm:$0xff]  ;;  %v302_v47 = vld [vmem:[#allocation2 + $0x38] sm:$0xff] }
  0xfe   : > { %3548 = vmatprep.subr.bf16.mxu0 %v5188_v53  ;;  %3712 = vmatprep.subr.bf16.mxu1 %v5190_v54  ;;  %v659_v53 = vld [vmem:[%s6073_s7 + $0xae0] sm:$0xff]  ;;  %v656_v54 = vld [vmem:[%s6073_s7 + $0xac8] sm:$0xff] }
  0xff   : > { %v5252_v58 = vcombine.high %v655_v52, %v659_v53  ;;  %v5251_v0 = vcombine.low %v655_v52, %v659_v53  ;;  %v5253_v2 = vcombine.low %v656_v54, %v660_v55  ;;  %v711_v52 = vld [vmem:[%s6073_s7 + $0xc80] sm:$0xff] }
 0x100   : > { %v715_v53 = vld [vmem:[%s6073_s7 + $0xca0] sm:$0xff] }
 0x101   : > { %3549 = vmatpush1.bf16.msra.mxu0 %v5187_v59  ;;  %3713 = vmatpush1.bf16.msra.mxu1 %v5189_v60  ;;  %v5254_v59 = vcombine.high %v656_v54, %v660_v55  ;;  %v663_v60 = vld [vmem:[%s6073_s7 + $0xb00] sm:$0xff]  ;;  %v6340_v54 = vpack.c.bf16 %v302_v47, %v302_v47  ;;  %v712_v55 = vld [vmem:[%s6073_s7 + $0xc88] sm:$0xff] }
 0x102   : > { %3550 = vmatprep.subr.bf16.mxu0 %v5196_v61  ;;  %3714 = vmatprep.subr.bf16.mxu1 %v5198_v62  ;;  %v667_v61 = vld [vmem:[%s6073_s7 + $0xb20] sm:$0xff]  ;;  %v664_v62 = vld [vmem:[%s6073_s7 + $0xb08] sm:$0xff] }
 0x103   : > { %v5260_v3 = vcombine.high %v663_v60, %v667_v61  ;;  %v5259_v9 = vcombine.low %v663_v60, %v667_v61  ;;  %v5261_v10 = vcombine.low %v664_v62, %v668_v63  ;;  %v719_v61 = vld [vmem:[%s6073_s7 + $0xcc0] sm:$0xff] }
 0x105   : > { %3551 = vmatpush1.bf16.msra.mxu0 %v5195_v4  ;;  %3715 = vmatpush1.bf16.msra.mxu1 %v5197_v5  ;;  %v5262_v4 = vcombine.high %v664_v62, %v668_v63  ;;  %v671_v5 = vld [vmem:[%s6073_s7 + $0xb40] sm:$0xff]  ;;  %v720_v63 = vld [vmem:[%s6073_s7 + $0xcc8] sm:$0xff] }
 0x106   : > { %3552 = vmatprep.subr.bf16.mxu0 %v5204_v6  ;;  %3716 = vmatprep.subr.bf16.mxu1 %v5206_v7  ;;  %v675_v6 = vld [vmem:[%s6073_s7 + $0xb60] sm:$0xff]  ;;  %v672_v7 = vld [vmem:[%s6073_s7 + $0xb48] sm:$0xff] }
 0x107   : > { %v5268_v11 = vcombine.high %v671_v5, %v675_v6  ;;  %v5267_v17 = vcombine.low %v671_v5, %v675_v6  ;;  %v5269_v18 = vcombine.low %v672_v7, %v676_v8  ;;  %v723_v62 = vld [vmem:[%s6073_s7 + $0xce0] sm:$0xff] }
 0x108   : > { %v727_v6 = vld [vmem:[%s6073_s7 + $0xd00] sm:$0xff] }
 0x109   : > { %3553 = vmatpush1.bf16.msra.mxu0 %v5203_v12  ;;  %3717 = vmatpush1.bf16.msra.mxu1 %v5205_v13  ;;  %v5270_v12 = vcombine.high %v672_v7, %v676_v8  ;;  %v679_v13 = vld [vmem:[%s6073_s7 + $0xb80] sm:$0xff]  ;;  %v728_v8 = vld [vmem:[%s6073_s7 + $0xd08] sm:$0xff] }
 0x10a   : > { %3554 = vmatprep.subr.bf16.mxu0 %v5212_v14  ;;  %3718 = vmatprep.subr.bf16.mxu1 %v5214_v15  ;;  %v683_v14 = vld [vmem:[%s6073_s7 + $0xba0] sm:$0xff]  ;;  %v680_v15 = vld [vmem:[%s6073_s7 + $0xb88] sm:$0xff] }
 0x10b   : > { %v5276_v19 = vcombine.high %v679_v13, %v683_v14  ;;  %v5275_v26 = vcombine.low %v679_v13, %v683_v14  ;;  %v5277_v27 = vcombine.low %v680_v15, %v684_v16  ;;  %v731_v7 = vld [vmem:[%s6073_s7 + $0xd20] sm:$0xff] }
 0x10c   : > { %v735_v14 = vld [vmem:[%s6073_s7 + $0xd40] sm:$0xff] }
 0x10d   : > { %3555 = vmatpush1.bf16.msra.mxu0 %v5211_v21  ;;  %3719 = vmatpush1.bf16.msra.mxu1 %v5213_v22  ;;  %v5278_v21 = vcombine.high %v680_v15, %v684_v16  ;;  %v687_v22 = vld [vmem:[%s6073_s7 + $0xbc0] sm:$0xff]  ;;  %v736_v16 = vld [vmem:[%s6073_s7 + $0xd48] sm:$0xff] }
 0x10e   : > { %3556 = vmatprep.subr.bf16.mxu0 %v5220_v23  ;;  %3720 = vmatprep.subr.bf16.mxu1 %v5222_v24  ;;  %v691_v23 = vld [vmem:[%s6073_s7 + $0xbe0] sm:$0xff]  ;;  %v688_v24 = vld [vmem:[%s6073_s7 + $0xbc8] sm:$0xff] }
 0x10f   : > { %v5284_v28 = vcombine.high %v687_v22, %v691_v23  ;;  %v5283_v36 = vcombine.low %v687_v22, %v691_v23  ;;  %v5285_v38 = vcombine.low %v688_v24, %v692_v25  ;;  %v739_v15 = vld [vmem:[%s6073_s7 + $0xd60] sm:$0xff] }
 0x110   : > { %v743_v23 = vld [vmem:[%s6073_s7 + $0xd80] sm:$0xff] }
 0x111   : > { %3557 = vmatpush1.bf16.msra.mxu0 %v5219_v31  ;;  %3721 = vmatpush1.bf16.msra.mxu1 %v5221_v32  ;;  %v5286_v31 = vcombine.high %v688_v24, %v692_v25  ;;  %v695_v32 = vld [vmem:[%s6073_s7 + $0xc00] sm:$0xff]  ;;  %v744_v25 = vld [vmem:[%s6073_s7 + $0xd88] sm:$0xff] }
 0x112   : > { %3558 = vmatprep.subr.bf16.mxu0 %v5228_v33  ;;  %3722 = vmatprep.subr.bf16.mxu1 %v5230_v34  ;;  %v699_v33 = vld [vmem:[%s6073_s7 + $0xc20] sm:$0xff]  ;;  %v696_v34 = vld [vmem:[%s6073_s7 + $0xc08] sm:$0xff] }
 0x113   : > { %v747_v24 = vld [vmem:[%s6073_s7 + $0xda0] sm:$0xff] }
 0x114   : > { %v5339_v37 = vcombine.low %v743_v23, %v747_v24 }
 0x115   : > { %3559 = vmatpush1.bf16.msra.mxu0 %v5227_v39  ;;  %3723 = vmatpush1.bf16.msra.mxu1 %v5229_v41  ;;  %v5292_v39 = vcombine.high %v695_v32, %v699_v33  ;;  %v5294_v41 = vcombine.high %v696_v34, %v700_v35 }
 0x116   : > { %3560 = vmatprep.subr.bf16.mxu0 %v5236_v42  ;;  %3724 = vmatprep.subr.bf16.mxu1 %v5238_v43  ;;  %v703_v42 = vld [vmem:[%s6073_s7 + $0xc40] sm:$0xff] }
 0x117   : > { %v707_v43 = vld [vmem:[%s6073_s7 + $0xc60] sm:$0xff] }
 0x119   : > { %3561 = vmatpush1.bf16.msra.mxu0 %v5235_v48  ;;  %3725 = vmatpush1.bf16.msra.mxu1 %v5237_v49  ;;  %v5291_v48 = vcombine.low %v695_v32, %v699_v33  ;;  %v5293_v49 = vcombine.low %v696_v34, %v700_v35  ;;  %v751_v33 = vld [vmem:[%s6073_s7 + $0xdc0] sm:$0xff]  ;;  %v752_v35 = vld [vmem:[%s6073_s7 + $0xdc8] sm:$0xff] }
 0x11a   : > { %3562 = vmatprep.subr.bf16.mxu0 %v5244_v50  ;;  %3726 = vmatprep.subr.bf16.mxu1 %v5246_v51  ;;  %v5300_v50 = vcombine.high %v703_v42, %v707_v43  ;;  %v5302_v51 = vcombine.high %v704_v45, %v708_v46  ;;  %v755_v34 = vld [vmem:[%s6073_s7 + $0xde0] sm:$0xff] }
 0x11b   : > { %v5347_v47 = vcombine.low %v751_v33, %v755_v34 }
 0x11d   : > { %3563 = vmatpush1.bf16.msra.mxu0 %v5243_v56  ;;  %3727 = vmatpush1.bf16.msra.mxu1 %v5245_v57  ;;  %v716_v56 = vld [vmem:[%s6073_s7 + $0xca8] sm:$0xff]  ;;  %v5299_v57 = vcombine.low %v703_v42, %v707_v43  ;;  %v759_v42 = vld [vmem:[%s6073_s7 + $0xe00] sm:$0xff] }
 0x11e   : > { %3564 = vmatprep.subr.bf16.mxu0 %v5252_v58  ;;  %3728 = vmatprep.subr.bf16.mxu1 %v5254_v59  ;;  %v5301_v58 = vcombine.low %v704_v45, %v708_v46  ;;  %v5308_v59 = vcombine.high %v711_v52, %v715_v53  ;;  %v5310_v60 = vcombine.high %v712_v55, %v716_v56  ;;  %v763_v43 = vld [vmem:[%s6073_s7 + $0xe20] sm:$0xff]  ;;  %v760_v45 = vld [vmem:[%s6073_s7 + $0xe08] sm:$0xff] }
 0x11f   : > { %v764_v46 = vld [vmem:[%s6073_s7 + $0xe28] sm:$0xff] }
 0x121   : > { %3565 = vmatpush1.bf16.msra.mxu0 %v5251_v0  ;;  %3729 = vmatpush1.bf16.msra.mxu1 %v5253_v2  ;;  %v724_v0 = vld [vmem:[%s6073_s7 + $0xce8] sm:$0xff]  ;;  %v5307_v2 = vcombine.low %v711_v52, %v715_v53  ;;  %v771_v52 = vld [vmem:[%s6073_s7 + $0xe60] sm:$0xff] }
 0x122   : > { %3566 = vmatprep.subr.bf16.mxu0 %v5260_v3  ;;  %3730 = vmatprep.subr.bf16.mxu1 %v5262_v4  ;;  %v5309_v3 = vcombine.low %v712_v55, %v716_v56  ;;  %v5316_v4 = vcombine.high %v719_v61, %v723_v62  ;;  %v5318_v5 = vcombine.high %v720_v63, %v724_v0  ;;  %v768_v53 = vld [vmem:[%s6073_s7 + $0xe48] sm:$0xff] }
 0x123   : > { %v772_v55 = vld [vmem:[%s6073_s7 + $0xe68] sm:$0xff]  ;;  %v5355_v56 = vcombine.low %v759_v42, %v763_v43 }
 0x125   : > { %3567 = vmatpush1.bf16.msra.mxu0 %v5259_v9  ;;  %3731 = vmatpush1.bf16.msra.mxu1 %v5261_v10  ;;  %v732_v9 = vld [vmem:[%s6073_s7 + $0xd28] sm:$0xff]  ;;  %v5315_v10 = vcombine.low %v719_v61, %v723_v62  ;;  %v779_v61 = vld [vmem:[%s6073_s7 + $0xea0] sm:$0xff] }
 0x126   : > { %3568 = vmatprep.subr.bf16.mxu0 %v5268_v11  ;;  %3732 = vmatprep.subr.bf16.mxu1 %v5270_v12  ;;  %v5317_v11 = vcombine.low %v720_v63, %v724_v0  ;;  %v5324_v12 = vcombine.high %v727_v6, %v731_v7  ;;  %v5326_v13 = vcombine.high %v728_v8, %v732_v9  ;;  %v776_v62 = vld [vmem:[%s6073_s7 + $0xe88] sm:$0xff] }
 0x127   : > { %v780_v63 = vld [vmem:[%s6073_s7 + $0xea8] sm:$0xff] }
 0x129   : > { %3569 = vmatpush1.bf16.msra.mxu0 %v5267_v17  ;;  %3733 = vmatpush1.bf16.msra.mxu1 %v5269_v18  ;;  %v740_v17 = vld [vmem:[%s6073_s7 + $0xd68] sm:$0xff]  ;;  %v5323_v18 = vcombine.low %v727_v6, %v731_v7  ;;  %v787_v6 = vld [vmem:[%s6073_s7 + $0xee0] sm:$0xff] }
 0x12a   : > { %3570 = vmatprep.subr.bf16.mxu0 %v5276_v19  ;;  %3734 = vmatprep.subr.bf16.mxu1 %v5278_v21  ;;  %v5325_v19 = vcombine.low %v728_v8, %v732_v9  ;;  %v5332_v21 = vcombine.high %v735_v14, %v739_v15  ;;  %v5334_v22 = vcombine.high %v736_v16, %v740_v17  ;;  %v784_v7 = vld [vmem:[%s6073_s7 + $0xec8] sm:$0xff] }
 0x12b   : > { %v788_v8 = vld [vmem:[%s6073_s7 + $0xee8] sm:$0xff] }
 0x12d   : > { %3571 = vmatpush1.bf16.msra.mxu0 %v5275_v26  ;;  %3735 = vmatpush1.bf16.msra.mxu1 %v5277_v27  ;;  %v748_v26 = vld [vmem:[%s6073_s7 + $0xda8] sm:$0xff]  ;;  %v5331_v27 = vcombine.low %v735_v14, %v739_v15  ;;  %v795_v14 = vld [vmem:[%s6073_s7 + $0xf20] sm:$0xff] }
 0x12e   : > { %3572 = vmatprep.subr.bf16.mxu0 %v5284_v28  ;;  %3736 = vmatprep.subr.bf16.mxu1 %v5286_v31  ;;  %v5333_v28 = vcombine.low %v736_v16, %v740_v17  ;;  %v5340_v31 = vcombine.high %v743_v23, %v747_v24  ;;  %v5342_v32 = vcombine.high %v744_v25, %v748_v26  ;;  %v792_v15 = vld [vmem:[%s6073_s7 + $0xf08] sm:$0xff]  ;;  %v803_v23 = vld [vmem:[%s6073_s7 + $0xf60] sm:$0xff] }
 0x12f   : > { %v796_v16 = vld [vmem:[%s6073_s7 + $0xf28] sm:$0xff] }
 0x130   : > { %v800_v24 = vld [vmem:[%s6073_s7 + $0xf48] sm:$0xff] }
 0x131   : > { %3573 = vmatpush1.bf16.msra.mxu0 %v5283_v36  ;;  %3737 = vmatpush1.bf16.msra.mxu1 %v5285_v38  ;;  %v756_v36 = vld [vmem:[%s6073_s7 + $0xde8] sm:$0xff]  ;;  %v5341_v38 = vcombine.low %v744_v25, %v748_v26 }
 0x132   : > { %3583 = vmatprep.subr.bf16.mxu0 %v5292_v39  ;;  %3747 = vmatprep.subr.bf16.mxu1 %v5294_v41  ;;  %v5348_v39 = vcombine.high %v751_v33, %v755_v34  ;;  %v5350_v41 = vcombine.high %v752_v35, %v756_v36  ;;  %v804_v25 = vld [vmem:[%s6073_s7 + $0xf68] sm:$0xff]  ;;  %v811_v33 = vld [vmem:[%s6073_s7 + $0xfa0] sm:$0xff] }
 0x133   : > { %v808_v34 = vld [vmem:[%s6073_s7 + $0xf88] sm:$0xff] }
 0x134   : > { %3575 = vmatmul.mubr.bf16.vlgmr.msra.gmra.mrb[0].mxu0 %v6334_v44  ;;  %3739 = vmatmul.mubr.bf16.vlgmr.msra.gmra.mrb[0].mxu1 %v6334_v44 }
 0x135   : > { %3584 = vmatpush1.bf16.msra.mxu0 %v5291_v48  ;;  %3748 = vmatpush1.bf16.msra.mxu1 %v5293_v49  ;;  %v5349_v48 = vcombine.low %v752_v35, %v756_v36  ;;  %v5356_v49 = vcombine.high %v759_v42, %v763_v43  ;;  %v812_v35 = vld [vmem:[%s6073_s7 + $0xfa8] sm:$0xff]  ;;  %v819_v42 = vld [vmem:[%s6073_s7 + $0xfe0] sm:$0xff] }
 0x136   : > { %3585 = vmatprep.subr.bf16.mxu0 %v5300_v50  ;;  %3749 = vmatprep.subr.bf16.mxu1 %v5302_v51  ;;  %v5358_v50 = vcombine.high %v760_v45, %v764_v46  ;;  %v767_v51 = vld [vmem:[%s6073_s7 + $0xe40] sm:$0xff]  ;;  %v816_v43 = vld [vmem:[%s6073_s7 + $0xfc8] sm:$0xff] }
 0x137   : > { %3615 = vmatprep.mubr.bf16.mxu0 %v6340_v54  ;;  %3779 = vmatprep.mubr.bf16.mxu1 %v6340_v54  ;;  %v5363_v0 = vcombine.low %v767_v51, %v771_v52 }
 0x139   : > { %3586 = vmatpush1.bf16.msra.mxu0 %v5299_v57  ;;  %3750 = vmatpush1.bf16.msra.mxu1 %v5301_v58  ;;  %v5357_v57 = vcombine.low %v760_v45, %v764_v46  ;;  %v5364_v58 = vcombine.high %v767_v51, %v771_v52  ;;  %v820_v45 = vld [vmem:[%s6073_s7 + $0xfe8] sm:$0xff]  ;;  %v317_v51 = vld [vmem:[%s6073_s7 + $0x30] sm:$0xff]  ;;  %v314_v52 = vld [vmem:[%s6073_s7 + $0x18] sm:$0xff] }
 0x13a   : > { %3587 = vmatprep.subr.bf16.mxu0 %v5308_v59  ;;  %3751 = vmatprep.subr.bf16.mxu1 %v5310_v60  ;;  %v5366_v59 = vcombine.high %v768_v53, %v772_v55  ;;  %v775_v60 = vld [vmem:[%s6073_s7 + $0xe80] sm:$0xff] }
 0x13b   : > { %v5371_v9 = vcombine.low %v775_v60, %v779_v61 }
 0x13d   : > { %3588 = vmatpush1.bf16.msra.mxu0 %v5307_v2  ;;  %3752 = vmatpush1.bf16.msra.mxu1 %v5309_v3  ;;  %v5365_v2 = vcombine.low %v768_v53, %v772_v55  ;;  %v5372_v3 = vcombine.high %v775_v60, %v779_v61  ;;  %v318_v53 = vld [vmem:[%s6073_s7 + $0x38] sm:$0xff]  ;;  %v321_v60 = vld [vmem:[%s6073_s7 + $0x50] sm:$0xff] }
 0x13e   : > { %3589 = vmatprep.subr.bf16.mxu0 %v5316_v4  ;;  %3753 = vmatprep.subr.bf16.mxu1 %v5318_v5  ;;  %v5374_v4 = vcombine.high %v776_v62, %v780_v63  ;;  %v783_v5 = vld [vmem:[%s6073_s7 + $0xec0] sm:$0xff]  ;;  %v325_v61 = vld [vmem:[%s6073_s7 + $0x70] sm:$0xff] }
 0x13f   : > { %v5379_v17 = vcombine.low %v783_v5, %v787_v6 }
 0x141   : > { %3590 = vmatpush1.bf16.msra.mxu0 %v5315_v10  ;;  %3754 = vmatpush1.bf16.msra.mxu1 %v5317_v11  ;;  %v5373_v10 = vcombine.low %v776_v62, %v780_v63  ;;  %v5380_v11 = vcombine.high %v783_v5, %v787_v6  ;;  %v322_v63 = vld [vmem:[%s6073_s7 + $0x58] sm:$0xff]  ;;  %v329_v6 = vld [vmem:[%s6073_s7 + $0x90] sm:$0xff] }
 0x142   : > { %3591 = vmatprep.subr.bf16.mxu0 %v5324_v12  ;;  %3755 = vmatprep.subr.bf16.mxu1 %v5326_v13  ;;  %v5382_v12 = vcombine.high %v784_v7, %v788_v8  ;;  %v791_v13 = vld [vmem:[%s6073_s7 + $0xf00] sm:$0xff] }
 0x143   : > { %v5387_v26 = vcombine.low %v791_v13, %v795_v14 }
 0x145   : > { %3592 = vmatpush1.bf16.msra.mxu0 %v5323_v18  ;;  %3756 = vmatpush1.bf16.msra.mxu1 %v5325_v19  ;;  %v5381_v18 = vcombine.low %v784_v7, %v788_v8  ;;  %v5388_v19 = vcombine.high %v791_v13, %v795_v14  ;;  %v333_v7 = vld [vmem:[%s6073_s7 + $0xb0] sm:$0xff]  ;;  %v330_v8 = vld [vmem:[%s6073_s7 + $0x98] sm:$0xff] }
 0x146   : > { %3593 = vmatprep.subr.bf16.mxu0 %v5332_v21  ;;  %3757 = vmatprep.subr.bf16.mxu1 %v5334_v22  ;;  %v5390_v21 = vcombine.high %v792_v15, %v796_v16  ;;  %v799_v22 = vld [vmem:[%s6073_s7 + $0xf40] sm:$0xff]  ;;  %v337_v14 = vld [vmem:[%s6073_s7 + $0xd0] sm:$0xff] }
 0x147   : > { %v5395_v36 = vcombine.low %v799_v22, %v803_v23 }
 0x149   : > { %3594 = vmatpush1.bf16.msra.mxu0 %v5331_v27  ;;  %3758 = vmatpush1.bf16.msra.mxu1 %v5333_v28  ;;  %v5389_v27 = vcombine.low %v792_v15, %v796_v16  ;;  %v5396_v28 = vcombine.high %v799_v22, %v803_v23  ;;  %v341_v15 = vld [vmem:[%s6073_s7 + $0xf0] sm:$0xff]  ;;  %v338_v16 = vld [vmem:[%s6073_s7 + $0xd8] sm:$0xff] }
 0x14a   : > { %3595 = vmatprep.subr.bf16.mxu0 %v5340_v31  ;;  %3759 = vmatprep.subr.bf16.mxu1 %v5342_v32  ;;  %v5398_v31 = vcombine.high %v800_v24, %v804_v25  ;;  %v807_v32 = vld [vmem:[%s6073_s7 + $0xf80] sm:$0xff]  ;;  %v345_v23 = vld [vmem:[%s6073_s7 + $0x110] sm:$0xff] }
 0x14b   : > { %v5403_v46 = vcombine.low %v807_v32, %v811_v33 }
 0x14d   : > { %3596 = vmatpush1.bf16.msra.mxu0 %v5339_v37  ;;  %3760 = vmatpush1.bf16.msra.mxu1 %v5341_v38  ;;  %v5397_v37 = vcombine.low %v800_v24, %v804_v25  ;;  %v5404_v38 = vcombine.high %v807_v32, %v811_v33  ;;  %v349_v24 = vld [vmem:[%s6073_s7 + $0x130] sm:$0xff]  ;;  %v346_v25 = vld [vmem:[%s6073_s7 + $0x118] sm:$0xff] }
 0x14e   : > { %3597 = vmatprep.subr.bf16.mxu0 %v5348_v39  ;;  %3761 = vmatprep.subr.bf16.mxu1 %v5350_v41  ;;  %v5406_v39 = vcombine.high %v808_v34, %v812_v35  ;;  %v815_v41 = vld [vmem:[%s6073_s7 + $0xfc0] sm:$0xff]  ;;  %v353_v32 = vld [vmem:[%s6073_s7 + $0x150] sm:$0xff] }
 0x14f   : > { %v5411_v55 = vcombine.low %v815_v41, %v819_v42  ;;  %v357_v33 = vld [vmem:[%s6073_s7 + $0x170] sm:$0xff] }
 0x151   : > { %3598 = vmatpush1.bf16.msra.mxu0 %v5347_v47  ;;  %3762 = vmatpush1.bf16.msra.mxu1 %v5349_v48  ;;  %v5405_v47 = vcombine.low %v808_v34, %v812_v35  ;;  %v5412_v48 = vcombine.high %v815_v41, %v819_v42  ;;  %v354_v34 = vld [vmem:[%s6073_s7 + $0x158] sm:$0xff]  ;;  %v361_v41 = vld [vmem:[%s6073_s7 + $0x190] sm:$0xff] }
 0x152   : > { %3599 = vmatprep.subr.bf16.mxu0 %v5356_v49  ;;  %3763 = vmatprep.subr.bf16.mxu1 %v5358_v50  ;;  %v5414_v49 = vcombine.high %v816_v43, %v820_v45  ;;  %v313_v50 = vld [vmem:[%s6073_s7 + $0x10] sm:$0xff]  ;;  %v358_v35 = vld [vmem:[%s6073_s7 + $0x178] sm:$0xff] }
 0x153   : > { %v365_v42 = vld [vmem:[%s6073_s7 + $0x1b0] sm:$0xff] }
 0x155   : > { %3600 = vmatpush1.bf16.msra.mxu0 %v5355_v56  ;;  %3764 = vmatpush1.bf16.msra.mxu1 %v5357_v57  ;;  %v301_v56 = vld [vmem:[#allocation2 + $0x30] sm:$0xff]  ;;  %v5413_v57 = vcombine.low %v816_v43, %v820_v45  ;;  %v362_v43 = vld [vmem:[%s6073_s7 + $0x198] sm:$0xff] }
 0x156   : > { %3601 = vmatprep.subr.bf16.mxu0 %v5364_v58  ;;  %3765 = vmatprep.subr.bf16.mxu1 %v5366_v59  ;;  %v4912_v58 = vcombine.high %v313_v50, %v317_v51  ;;  %v4914_v59 = vcombine.high %v314_v52, %v318_v53  ;;  %v6406_v62 = vpack.c.bf16 %v301_v56, %v301_v56  ;;  %v366_v45 = vld [vmem:[%s6073_s7 + $0x1b8] sm:$0xff] }
 0x157   : > { %v4961_v56 = vcombine.low %v362_v43, %v366_v45 }
 0x159   : > { %3602 = vmatpush1.bf16.msra.mxu0 %v5363_v0  ;;  %3766 = vmatpush1.bf16.msra.mxu1 %v5365_v2  ;;  %v326_v0 = vld [vmem:[%s6073_s7 + $0x78] sm:$0xff]  ;;  %v4911_v2 = vcombine.low %v313_v50, %v317_v51  ;;  %v369_v50 = vld [vmem:[%s6073_s7 + $0x1d0] sm:$0xff] }
 0x15a   : > { %3603 = vmatprep.subr.bf16.mxu0 %v5372_v3  ;;  %3767 = vmatprep.subr.bf16.mxu1 %v5374_v4  ;;  %v4913_v3 = vcombine.low %v314_v52, %v318_v53  ;;  %v4920_v4 = vcombine.high %v321_v60, %v325_v61  ;;  %v4922_v5 = vcombine.high %v322_v63, %v326_v0  ;;  %v373_v51 = vld [vmem:[%s6073_s7 + $0x1f0] sm:$0xff]  ;;  %v370_v52 = vld [vmem:[%s6073_s7 + $0x1d8] sm:$0xff] }
 0x15b   : > { %v374_v53 = vld [vmem:[%s6073_s7 + $0x1f8] sm:$0xff] }
 0x15d   : > { %3604 = vmatpush1.bf16.msra.mxu0 %v5371_v9  ;;  %3768 = vmatpush1.bf16.msra.mxu1 %v5373_v10  ;;  %v334_v9 = vld [vmem:[%s6073_s7 + $0xb8] sm:$0xff]  ;;  %v4919_v10 = vcombine.low %v321_v60, %v325_v61  ;;  %v381_v60 = vld [vmem:[%s6073_s7 + $0x230] sm:$0xff] }
 0x15e   : > { %3605 = vmatprep.subr.bf16.mxu0 %v5380_v11  ;;  %3769 = vmatprep.subr.bf16.mxu1 %v5382_v12  ;;  %v4921_v11 = vcombine.low %v322_v63, %v326_v0  ;;  %v4928_v12 = vcombine.high %v329_v6, %v333_v7  ;;  %v4930_v13 = vcombine.high %v330_v8, %v334_v9  ;;  %v378_v61 = vld [vmem:[%s6073_s7 + $0x218] sm:$0xff] }
 0x15f   : > { %v382_v63 = vld [vmem:[%s6073_s7 + $0x238] sm:$0xff]  ;;  %v4967_v0 = vcombine.low %v369_v50, %v373_v51 }
 0x161   : > { %3606 = vmatpush1.bf16.msra.mxu0 %v5379_v17  ;;  %3770 = vmatpush1.bf16.msra.mxu1 %v5381_v18  ;;  %v342_v17 = vld [vmem:[%s6073_s7 + $0xf8] sm:$0xff]  ;;  %v4927_v18 = vcombine.low %v329_v6, %v333_v7  ;;  %v389_v6 = vld [vmem:[%s6073_s7 + $0x270] sm:$0xff] }
 0x162   : > { %3607 = vmatprep.subr.bf16.mxu0 %v5388_v19  ;;  %3771 = vmatprep.subr.bf16.mxu1 %v5390_v21  ;;  %v4929_v19 = vcombine.low %v330_v8, %v334_v9  ;;  %v4936_v21 = vcombine.high %v337_v14, %v341_v15  ;;  %v4938_v22 = vcombine.high %v338_v16, %v342_v17  ;;  %v386_v7 = vld [vmem:[%s6073_s7 + $0x258] sm:$0xff] }
 0x163   : > { %v390_v8 = vld [vmem:[%s6073_s7 + $0x278] sm:$0xff] }
 0x165   : > { %3608 = vmatpush1.bf16.msra.mxu0 %v5387_v26  ;;  %3772 = vmatpush1.bf16.msra.mxu1 %v5389_v27  ;;  %v350_v26 = vld [vmem:[%s6073_s7 + $0x138] sm:$0xff]  ;;  %v4935_v27 = vcombine.low %v337_v14, %v341_v15  ;;  %v397_v14 = vld [vmem:[%s6073_s7 + $0x2b0] sm:$0xff] }
 0x166   : > { %3609 = vmatprep.subr.bf16.mxu0 %v5396_v28  ;;  %3773 = vmatprep.subr.bf16.mxu1 %v5398_v31  ;;  %v4944_v28 = vcombine.high %v345_v23, %v349_v24  ;;  %v4946_v31 = vcombine.high %v346_v25, %v350_v26  ;;  %v394_v15 = vld [vmem:[%s6073_s7 + $0x298] sm:$0xff] }
 0x169   : > { %3610 = vmatpush1.bf16.msra.mxu0 %v5395_v36  ;;  %3774 = vmatpush1.bf16.msra.mxu1 %v5397_v37  ;;  %v4943_v36 = vcombine.low %v345_v23, %v349_v24  ;;  %v4945_v37 = vcombine.low %v346_v25, %v350_v26  ;;  %v405_v23 = vld [vmem:[%s6073_s7 + $0x2f0] sm:$0xff]  ;;  %v402_v24 = vld [vmem:[%s6073_s7 + $0x2d8] sm:$0xff] }
 0x16a   : > { %3611 = vmatprep.subr.bf16.mxu0 %v5404_v38  ;;  %3775 = vmatprep.subr.bf16.mxu1 %v5406_v39  ;;  %v4952_v38 = vcombine.high %v353_v32, %v357_v33  ;;  %v4954_v39 = vcombine.high %v354_v34, %v358_v35  ;;  %v406_v25 = vld [vmem:[%s6073_s7 + $0x2f8] sm:$0xff] }
 0x16d   : > { %3612 = vmatpush1.bf16.msra.mxu0 %v5403_v46  ;;  %3776 = vmatpush1.bf16.msra.mxu1 %v5405_v47  ;;  %v4951_v46 = vcombine.low %v353_v32, %v357_v33  ;;  %v4953_v47 = vcombine.low %v354_v34, %v358_v35  ;;  %v413_v32 = vld [vmem:[%s6073_s7 + $0x330] sm:$0xff]  ;;  %v410_v33 = vld [vmem:[%s6073_s7 + $0x318] sm:$0xff] }
 0x16e   : > { %3613 = vmatprep.subr.bf16.mxu0 %v5412_v48  ;;  %3777 = vmatprep.subr.bf16.mxu1 %v5414_v49  ;;  %v4960_v48 = vcombine.high %v361_v41, %v365_v42  ;;  %v4962_v49 = vcombine.high %v362_v43, %v366_v45  ;;  %v414_v34 = vld [vmem:[%s6073_s7 + $0x338] sm:$0xff] }
 0x16f   : > { %v422_v43 = vld [vmem:[%s6073_s7 + $0x378] sm:$0xff] }
 0x171   : > { %3614 = vmatpush1.bf16.msra.mxu0 %v5411_v55  ;;  %3778 = vmatpush1.bf16.msra.mxu1 %v5413_v57  ;;  %v4959_v55 = vcombine.low %v361_v41, %v365_v42  ;;  %v4968_v57 = vcombine.high %v369_v50, %v373_v51  ;;  %v421_v41 = vld [vmem:[%s6073_s7 + $0x370] sm:$0xff]  ;;  %v418_v42 = vld [vmem:[%s6073_s7 + $0x358] sm:$0xff] }
 0x172   : > { %3788 = vmatprep.subr.bf16.mxu0 %v4912_v58  ;;  %3952 = vmatprep.subr.bf16.mxu1 %v4914_v59  ;;  %v4970_v58 = vcombine.high %v370_v52, %v374_v53  ;;  %v377_v59 = vld [vmem:[%s6073_s7 + $0x210] sm:$0xff]  ;;  %v426_v51 = vld [vmem:[%s6073_s7 + $0x398] sm:$0xff] }
 0x173   : > { %v4975_v9 = vcombine.low %v377_v59, %v381_v60  ;;  %v429_v50 = vld [vmem:[%s6073_s7 + $0x3b0] sm:$0xff] }
 0x174   : > { %3616 = vmatmul.mubr.bf16.vlgmr.msra.gmra.mrb[0].mxu0 %v6406_v62  ;;  %3780 = vmatmul.mubr.bf16.vlgmr.msra.gmra.mrb[0].mxu1 %v6406_v62 }
 0x175   : > { %3789 = vmatpush1.bf16.msra.mxu0 %v4911_v2  ;;  %3953 = vmatpush1.bf16.msra.mxu1 %v4913_v3  ;;  %v4969_v2 = vcombine.low %v370_v52, %v374_v53  ;;  %v4976_v3 = vcombine.high %v377_v59, %v381_v60  ;;  %v430_v52 = vld [vmem:[%s6073_s7 + $0x3b8] sm:$0xff]  ;;  %v437_v59 = vld [vmem:[%s6073_s7 + $0x3f0] sm:$0xff] }
 0x176   : > { %3790 = vmatprep.subr.bf16.mxu0 %v4920_v4  ;;  %3954 = vmatprep.subr.bf16.mxu1 %v4922_v5  ;;  %v4978_v4 = vcombine.high %v378_v61, %v382_v63  ;;  %v385_v5 = vld [vmem:[%s6073_s7 + $0x250] sm:$0xff]  ;;  %v434_v60 = vld [vmem:[%s6073_s7 + $0x3d8] sm:$0xff] }
 0x177   : > { %3820 = vmatprep.mubr.bf16.mxu0 %v6146_v1  ;;  %3984 = vmatprep.mubr.bf16.mxu1 %v6146_v1  ;;  %v4937_v1 = vcombine.low %v338_v16, %v342_v17  ;;  %v398_v16 = vld [vmem:[%s6073_s7 + $0x2b8] sm:$0xff]  ;;  %v4983_v17 = vcombine.low %v385_v5, %v389_v6 }
 0x179   : > { %3791 = vmatpush1.bf16.msra.mxu0 %v4919_v10  ;;  %3955 = vmatpush1.bf16.msra.mxu1 %v4921_v11  ;;  %v4977_v10 = vcombine.low %v378_v61, %v382_v63  ;;  %v4984_v11 = vcombine.high %v385_v5, %v389_v6  ;;  %v438_v61 = vld [vmem:[%s6073_s7 + $0x3f8] sm:$0xff]  ;;  %v445_v5 = vld [vmem:[%s6073_s7 + $0x430] sm:$0xff] }
 0x17a   : > { %3792 = vmatprep.subr.bf16.mxu0 %v4928_v12  ;;  %3956 = vmatprep.subr.bf16.mxu1 %v4930_v13  ;;  %v4986_v12 = vcombine.high %v386_v7, %v390_v8  ;;  %v393_v13 = vld [vmem:[%s6073_s7 + $0x290] sm:$0xff]  ;;  %v442_v6 = vld [vmem:[%s6073_s7 + $0x418] sm:$0xff] }
 0x17b   : > { %v4991_v26 = vcombine.low %v393_v13, %v397_v14 }
 0x17d   : > { %3793 = vmatpush1.bf16.msra.mxu0 %v4927_v18  ;;  %3957 = vmatpush1.bf16.msra.mxu1 %v4929_v19  ;;  %v4985_v18 = vcombine.low %v386_v7, %v390_v8  ;;  %v4992_v19 = vcombine.high %v393_v13, %v397_v14  ;;  %v446_v7 = vld [vmem:[%s6073_s7 + $0x438] sm:$0xff]  ;;  %v453_v13 = vld [vmem:[%s6073_s7 + $0x470] sm:$0xff] }
 0x17e   : > { %3794 = vmatprep.subr.bf16.mxu0 %v4936_v21  ;;  %3958 = vmatprep.subr.bf16.mxu1 %v4938_v22  ;;  %v4994_v21 = vcombine.high %v394_v15, %v398_v16  ;;  %v401_v22 = vld [vmem:[%s6073_s7 + $0x2d0] sm:$0xff]  ;;  %v450_v14 = vld [vmem:[%s6073_s7 + $0x458] sm:$0xff] }
 0x17f   : > { %v4999_v35 = vcombine.low %v401_v22, %v405_v23 }
 0x181   : > { %3795 = vmatpush1.bf16.msra.mxu0 %v4935_v27  ;;  %3959 = vmatpush1.bf16.msra.mxu1 %v4937_v1  ;;  %v4993_v27 = vcombine.low %v394_v15, %v398_v16  ;;  %v5000_v1 = vcombine.high %v401_v22, %v405_v23  ;;  %v454_v15 = vld [vmem:[%s6073_s7 + $0x478] sm:$0xff]  ;;  %v461_v22 = vld [vmem:[%s6073_s7 + $0x4b0] sm:$0xff] }
 0x182   : > { %3796 = vmatprep.subr.bf16.mxu0 %v4944_v28  ;;  %3960 = vmatprep.subr.bf16.mxu1 %v4946_v31  ;;  %v5002_v28 = vcombine.high %v402_v24, %v406_v25  ;;  %v409_v31 = vld [vmem:[%s6073_s7 + $0x310] sm:$0xff]  ;;  %v458_v23 = vld [vmem:[%s6073_s7 + $0x498] sm:$0xff] }
 0x183   : > { %v5007_v45 = vcombine.low %v409_v31, %v413_v32 }
 0x185   : > { %3797 = vmatpush1.bf16.msra.mxu0 %v4943_v36  ;;  %3961 = vmatpush1.bf16.msra.mxu1 %v4945_v37  ;;  %v5001_v36 = vcombine.low %v402_v24, %v406_v25  ;;  %v5008_v37 = vcombine.high %v409_v31, %v413_v32  ;;  %v462_v24 = vld [vmem:[%s6073_s7 + $0x4b8] sm:$0xff]  ;;  %v469_v31 = vld [vmem:[%s6073_s7 + $0x4f0] sm:$0xff] }
 0x186   : > { %3798 = vmatprep.subr.bf16.mxu0 %v4952_v38  ;;  %3962 = vmatprep.subr.bf16.mxu1 %v4954_v39  ;;  %v5010_v38 = vcombine.high %v410_v33, %v414_v34  ;;  %v417_v39 = vld [vmem:[%s6073_s7 + $0x350] sm:$0xff]  ;;  %v466_v32 = vld [vmem:[%s6073_s7 + $0x4d8] sm:$0xff] }
 0x187   : > { %v5015_v53 = vcombine.low %v417_v39, %v421_v41 }
 0x189   : > { %3799 = vmatpush1.bf16.msra.mxu0 %v4951_v46  ;;  %3963 = vmatpush1.bf16.msra.mxu1 %v4953_v47  ;;  %v5009_v46 = vcombine.low %v410_v33, %v414_v34  ;;  %v5016_v47 = vcombine.high %v417_v39, %v421_v41  ;;  %v470_v33 = vld [vmem:[%s6073_s7 + $0x4f8] sm:$0xff]  ;;  %v5057_v34 = vcombine.low %v458_v23, %v462_v24 }
 0x18a   : > { %3800 = vmatprep.subr.bf16.mxu0 %v4960_v48  ;;  %3964 = vmatprep.subr.bf16.mxu1 %v4962_v49  ;;  %v5018_v48 = vcombine.high %v418_v42, %v422_v43  ;;  %v425_v49 = vld [vmem:[%s6073_s7 + $0x390] sm:$0xff]  ;;  %v474_v39 = vld [vmem:[%s6073_s7 + $0x518] sm:$0xff] }
 0x18b   : > { %v5023_v63 = vcombine.low %v425_v49, %v429_v50  ;;  %v478_v41 = vld [vmem:[%s6073_s7 + $0x538] sm:$0xff] }
 0x18d   : > { %3801 = vmatpush1.bf16.msra.mxu0 %v4959_v55  ;;  %3965 = vmatpush1.bf16.msra.mxu1 %v4961_v56  ;;  %v5017_v55 = vcombine.low %v418_v42, %v422_v43  ;;  %v5024_v56 = vcombine.high %v425_v49, %v429_v50  ;;  %v486_v49 = vld [vmem:[%s6073_s7 + $0x578] sm:$0xff] }
 0x18e   : > { %3802 = vmatprep.subr.bf16.mxu0 %v4968_v57  ;;  %3966 = vmatprep.subr.bf16.mxu1 %v4970_v58  ;;  %v5026_v57 = vcombine.high %v426_v51, %v430_v52  ;;  %v433_v58 = vld [vmem:[%s6073_s7 + $0x3d0] sm:$0xff] }
 0x18f   : > { %v5031_v8 = vcombine.low %v433_v58, %v437_v59 }
 0x191   : > { %3803 = vmatpush1.bf16.msra.mxu0 %v4967_v0  ;;  %3967 = vmatpush1.bf16.msra.mxu1 %v4969_v2  ;;  %v5025_v0 = vcombine.low %v426_v51, %v430_v52  ;;  %v5032_v2 = vcombine.high %v433_v58, %v437_v59  ;;  %v5073_v51 = vcombine.low %v474_v39, %v478_v41  ;;  %v494_v58 = vld [vmem:[%s6073_s7 + $0x5b8] sm:$0xff] }
 0x192   : > { %3804 = vmatprep.subr.bf16.mxu0 %v4976_v3  ;;  %3968 = vmatprep.subr.bf16.mxu1 %v4978_v4  ;;  %v5034_v3 = vcombine.high %v434_v60, %v438_v61  ;;  %v441_v4 = vld [vmem:[%s6073_s7 + $0x410] sm:$0xff] }
 0x193   : > { %v5039_v16 = vcombine.low %v441_v4, %v445_v5 }
 0x195   : > { %3805 = vmatpush1.bf16.msra.mxu0 %v4975_v9  ;;  %3969 = vmatpush1.bf16.msra.mxu1 %v4977_v10  ;;  %v5033_v9 = vcombine.low %v434_v60, %v438_v61  ;;  %v5040_v10 = vcombine.high %v441_v4, %v445_v5  ;;  %v502_v4 = vld [vmem:[%s6073_s7 + $0x5f8] sm:$0xff] }
 0x196   : > { %3806 = vmatprep.subr.bf16.mxu0 %v4984_v11  ;;  %3970 = vmatprep.subr.bf16.mxu1 %v4986_v12  ;;  %v5042_v11 = vcombine.high %v442_v6, %v446_v7  ;;  %v449_v12 = vld [vmem:[%s6073_s7 + $0x450] sm:$0xff] }
 0x197   : > { %v5047_v25 = vcombine.low %v449_v12, %v453_v13 }
 0x199   : > { %3807 = vmatpush1.bf16.msra.mxu0 %v4983_v17  ;;  %3971 = vmatpush1.bf16.msra.mxu1 %v4985_v18  ;;  %v5041_v17 = vcombine.low %v442_v6, %v446_v7  ;;  %v5048_v18 = vcombine.high %v449_v12, %v453_v13  ;;  %v510_v12 = vld [vmem:[%s6073_s7 + $0x638] sm:$0xff] }
 0x19a   : > { %3808 = vmatprep.subr.bf16.mxu0 %v4992_v19  ;;  %3972 = vmatprep.subr.bf16.mxu1 %v4994_v21  ;;  %v5050_v19 = vcombine.high %v450_v14, %v454_v15  ;;  %v457_v21 = vld [vmem:[%s6073_s7 + $0x490] sm:$0xff] }
 0x19d   : > { %3809 = vmatpush1.bf16.msra.mxu0 %v4991_v26  ;;  %3973 = vmatpush1.bf16.msra.mxu1 %v4993_v27  ;;  %v5049_v26 = vcombine.low %v450_v14, %v454_v15  ;;  %v5056_v27 = vcombine.high %v457_v21, %v461_v22 }
 0x19e   : > { %3810 = vmatprep.subr.bf16.mxu0 %v5000_v1  ;;  %3974 = vmatprep.subr.bf16.mxu1 %v5002_v28  ;;  %v5058_v1 = vcombine.high %v458_v23, %v462_v24  ;;  %v465_v28 = vld [vmem:[%s6073_s7 + $0x4d0] sm:$0xff] }
 0x19f   : > { %v5063_v42 = vcombine.low %v465_v28, %v469_v31 }
 0x1a1   : > { %3811 = vmatpush1.bf16.msra.mxu0 %v4999_v35  ;;  %3975 = vmatpush1.bf16.msra.mxu1 %v5001_v36  ;;  %v5064_v35 = vcombine.high %v465_v28, %v469_v31  ;;  %v5066_v36 = vcombine.high %v466_v32, %v470_v33  ;;  %v526_v28 = vld [vmem:[%s6073_s7 + $0x6b8] sm:$0xff] }
 0x1a2   : > { %3812 = vmatprep.subr.bf16.mxu0 %v5008_v37  ;;  %3976 = vmatprep.subr.bf16.mxu1 %v5010_v38  ;;  %v473_v37 = vld [vmem:[%s6073_s7 + $0x510] sm:$0xff] }
 0x1a3   : > { %v477_v38 = vld [vmem:[%s6073_s7 + $0x530] sm:$0xff] }
 0x1a4   : > { %v5072_v43 = vcombine.high %v473_v37, %v477_v38  ;;  %v5071_v50 = vcombine.low %v473_v37, %v477_v38  ;;  %v534_v37 = vld [vmem:[%s6073_s7 + $0x6f8] sm:$0xff] }
 0x1a5   : > { %3813 = vmatpush1.bf16.msra.mxu0 %v5007_v45  ;;  %3977 = vmatpush1.bf16.msra.mxu1 %v5009_v46  ;;  %v5074_v45 = vcombine.high %v474_v39, %v478_v41  ;;  %v481_v46 = vld [vmem:[%s6073_s7 + $0x550] sm:$0xff] }
 0x1a6   : > { %3814 = vmatprep.subr.bf16.mxu0 %v5016_v47  ;;  %3978 = vmatprep.subr.bf16.mxu1 %v5018_v48  ;;  %v485_v47 = vld [vmem:[%s6073_s7 + $0x570] sm:$0xff]  ;;  %v482_v48 = vld [vmem:[%s6073_s7 + $0x558] sm:$0xff] }
 0x1a7   : > { %v5080_v52 = vcombine.high %v481_v46, %v485_v47  ;;  %v5079_v59 = vcombine.low %v481_v46, %v485_v47  ;;  %v5081_v60 = vcombine.low %v482_v48, %v486_v49  ;;  %v542_v46 = vld [vmem:[%s6073_s7 + $0x738] sm:$0xff] }
 0x1a9   : > { %3815 = vmatpush1.bf16.msra.mxu0 %v5015_v53  ;;  %3979 = vmatpush1.bf16.msra.mxu1 %v5017_v55  ;;  %v5082_v53 = vcombine.high %v482_v48, %v486_v49  ;;  %v489_v55 = vld [vmem:[%s6073_s7 + $0x590] sm:$0xff] }
 0x1aa   : > { %3816 = vmatprep.subr.bf16.mxu0 %v5024_v56  ;;  %3980 = vmatprep.subr.bf16.mxu1 %v5026_v57  ;;  %v493_v56 = vld [vmem:[%s6073_s7 + $0x5b0] sm:$0xff]  ;;  %v490_v57 = vld [vmem:[%s6073_s7 + $0x598] sm:$0xff] }
 0x1ab   : > { %v5088_v61 = vcombine.high %v489_v55, %v493_v56  ;;  %v5087_v5 = vcombine.low %v489_v55, %v493_v56  ;;  %v5089_v6 = vcombine.low %v490_v57, %v494_v58  ;;  %v550_v55 = vld [vmem:[%s6073_s7 + $0x778] sm:$0xff] }
 0x1ad   : > { %3817 = vmatpush1.bf16.msra.mxu0 %v5023_v63  ;;  %3981 = vmatpush1.bf16.msra.mxu1 %v5025_v0  ;;  %v5090_v63 = vcombine.high %v490_v57, %v494_v58  ;;  %v497_v0 = vld [vmem:[%s6073_s7 + $0x5d0] sm:$0xff] }
 0x1ae   : > { %3818 = vmatprep.subr.bf16.mxu0 %v5032_v2  ;;  %3982 = vmatprep.subr.bf16.mxu1 %v5034_v3  ;;  %v501_v2 = vld [vmem:[%s6073_s7 + $0x5f0] sm:$0xff]  ;;  %v498_v3 = vld [vmem:[%s6073_s7 + $0x5d8] sm:$0xff] }
 0x1af   : > { %v5096_v7 = vcombine.high %v497_v0, %v501_v2  ;;  %v5095_v13 = vcombine.low %v497_v0, %v501_v2  ;;  %v5097_v14 = vcombine.low %v498_v3, %v502_v4  ;;  %v558_v0 = vld [vmem:[%s6073_s7 + $0x7b8] sm:$0xff] }
 0x1b1   : > { %3819 = vmatpush1.bf16.msra.mxu0 %v5031_v8  ;;  %3983 = vmatpush1.bf16.msra.mxu1 %v5033_v9  ;;  %v5098_v8 = vcombine.high %v498_v3, %v502_v4  ;;  %v505_v9 = vld [vmem:[%s6073_s7 + $0x610] sm:$0xff] }
 0x1b2   : > { %3829 = vmatprep.subr.bf16.mxu0 %v5040_v10  ;;  %3993 = vmatprep.subr.bf16.mxu1 %v5042_v11  ;;  %v509_v10 = vld [vmem:[%s6073_s7 + $0x630] sm:$0xff]  ;;  %v506_v11 = vld [vmem:[%s6073_s7 + $0x618] sm:$0xff] }
 0x1b3   : > { %v5104_v15 = vcombine.high %v505_v9, %v509_v10  ;;  %v5105_v23 = vcombine.low %v506_v11, %v510_v12 }
 0x1b4   : > { %3821 = vmatmul.mubr.bf16.vlgmr.msra.gmra.mrb[4].mxu0 %v6190_v20  ;;  %3985 = vmatmul.mubr.bf16.vlgmr.msra.gmra.mrb[4].mxu1 %v6190_v20  ;;  %v5055_v20 = vcombine.low %v457_v21, %v461_v22  ;;  %v518_v21 = vld [vmem:[%s6073_s7 + $0x678] sm:$0xff]  ;;  %v5103_v22 = vcombine.low %v505_v9, %v509_v10 }
 0x1b5   : > { %3830 = vmatpush1.bf16.msra.mxu0 %v5039_v16  ;;  %3994 = vmatpush1.bf16.msra.mxu1 %v5041_v17  ;;  %v5106_v16 = vcombine.high %v506_v11, %v510_v12  ;;  %v513_v17 = vld [vmem:[%s6073_s7 + $0x650] sm:$0xff]  ;;  %v566_v9 = vld [vmem:[%s6073_s7 + $0x7f8] sm:$0xff] }
 0x1b6   : > { %3831 = vmatprep.subr.bf16.mxu0 %v5048_v18  ;;  %3995 = vmatprep.subr.bf16.mxu1 %v5050_v19  ;;  %v517_v18 = vld [vmem:[%s6073_s7 + $0x670] sm:$0xff]  ;;  %v514_v19 = vld [vmem:[%s6073_s7 + $0x658] sm:$0xff] }
 0x1b7   : > { %3861 = vmatprep.mubr.bf16.mxu0 %v6196_v30  ;;  %4025 = vmatprep.mubr.bf16.mxu1 %v6196_v30  ;;  %v5065_v30 = vcombine.low %v466_v32, %v470_v33  ;;  %v5112_v24 = vcombine.high %v513_v17, %v517_v18  ;;  %v5111_v31 = vcombine.low %v513_v17, %v517_v18  ;;  %v574_v17 = vld [vmem:[%s6073_s7 + $0x838] sm:$0xff] }
 0x1b8   : > { %v5113_v32 = vcombine.low %v514_v19, %v518_v21 }
 0x1b9   : > { %3832 = vmatpush1.bf16.msra.mxu0 %v5047_v25  ;;  %3996 = vmatpush1.bf16.msra.mxu1 %v5049_v26  ;;  %v5114_v25 = vcombine.high %v514_v19, %v518_v21  ;;  %v521_v26 = vld [vmem:[%s6073_s7 + $0x690] sm:$0xff] }
 0x1ba   : > { %3833 = vmatprep.subr.bf16.mxu0 %v5056_v27  ;;  %3997 = vmatprep.subr.bf16.mxu1 %v5058_v1  ;;  %v525_v27 = vld [vmem:[%s6073_s7 + $0x6b0] sm:$0xff]  ;;  %v522_v1 = vld [vmem:[%s6073_s7 + $0x698] sm:$0xff] }
 0x1bb   : > { %v5120_v33 = vcombine.high %v521_v26, %v525_v27  ;;  %v5119_v38 = vcombine.low %v521_v26, %v525_v27  ;;  %v5121_v39 = vcombine.low %v522_v1, %v526_v28  ;;  %v582_v26 = vld [vmem:[%s6073_s7 + $0x878] sm:$0xff] }
 0x1bd   : > { %3834 = vmatpush1.bf16.msra.mxu0 %v5055_v20  ;;  %3998 = vmatpush1.bf16.msra.mxu1 %v5057_v34  ;;  %v5122_v20 = vcombine.high %v522_v1, %v526_v28  ;;  %v529_v34 = vld [vmem:[%s6073_s7 + $0x6d0] sm:$0xff] }
 0x1be   : > { %3835 = vmatprep.subr.bf16.mxu0 %v5064_v35  ;;  %3999 = vmatprep.subr.bf16.mxu1 %v5066_v36  ;;  %v533_v35 = vld [vmem:[%s6073_s7 + $0x6f0] sm:$0xff]  ;;  %v530_v36 = vld [vmem:[%s6073_s7 + $0x6d8] sm:$0xff] }
 0x1bf   : > { %v5128_v41 = vcombine.high %v529_v34, %v533_v35  ;;  %v5127_v47 = vcombine.low %v529_v34, %v533_v35  ;;  %v5129_v48 = vcombine.low %v530_v36, %v534_v37  ;;  %v590_v34 = vld [vmem:[%s6073_s7 + $0x8b8] sm:$0xff] }
 0x1c1   : > { %3836 = vmatpush1.bf16.msra.mxu0 %v5063_v42  ;;  %4000 = vmatpush1.bf16.msra.mxu1 %v5065_v30  ;;  %v5130_v42 = vcombine.high %v530_v36, %v534_v37  ;;  %v537_v30 = vld [vmem:[%s6073_s7 + $0x710] sm:$0xff] }
 0x1c2   : > { %3837 = vmatprep.subr.bf16.mxu0 %v5072_v43  ;;  %4001 = vmatprep.subr.bf16.mxu1 %v5074_v45  ;;  %v541_v43 = vld [vmem:[%s6073_s7 + $0x730] sm:$0xff]  ;;  %v538_v45 = vld [vmem:[%s6073_s7 + $0x718] sm:$0xff] }
 0x1c3   : > { %v5136_v49 = vcombine.high %v537_v30, %v541_v43  ;;  %v5135_v56 = vcombine.low %v537_v30, %v541_v43  ;;  %v5137_v57 = vcombine.low %v538_v45, %v542_v46  ;;  %v598_v30 = vld [vmem:[%s6073_s7 + $0x8f8] sm:$0xff] }
 0x1c5   : > { %3838 = vmatpush1.bf16.msra.mxu0 %v5071_v50  ;;  %4002 = vmatpush1.bf16.msra.mxu1 %v5073_v51  ;;  %v5138_v50 = vcombine.high %v538_v45, %v542_v46  ;;  %v545_v51 = vld [vmem:[%s6073_s7 + $0x750] sm:$0xff] }
 0x1c6   : > { %3839 = vmatprep.subr.bf16.mxu0 %v5080_v52  ;;  %4003 = vmatprep.subr.bf16.mxu1 %v5082_v53  ;;  %v549_v52 = vld [vmem:[%s6073_s7 + $0x770] sm:$0xff]  ;;  %v546_v53 = vld [vmem:[%s6073_s7 + $0x758] sm:$0xff] }
 0x1c7   : > { %v5144_v58 = vcombine.high %v545_v51, %v549_v52  ;;  %v5143_v2 = vcombine.low %v545_v51, %v549_v52  ;;  %v5145_v3 = vcombine.low %v546_v53, %v550_v55 }
 0x1c9   : > { %3840 = vmatpush1.bf16.msra.mxu0 %v5079_v59  ;;  %4004 = vmatpush1.bf16.msra.mxu1 %v5081_v60  ;;  %v5146_v59 = vcombine.high %v546_v53, %v550_v55  ;;  %v553_v60 = vld [vmem:[%s6073_s7 + $0x790] sm:$0xff] }
 0x1ca   : > { %3841 = vmatprep.subr.bf16.mxu0 %v5088_v61  ;;  %4005 = vmatprep.subr.bf16.mxu1 %v5090_v63  ;;  %v557_v61 = vld [vmem:[%s6073_s7 + $0x7b0] sm:$0xff]  ;;  %v554_v63 = vld [vmem:[%s6073_s7 + $0x798] sm:$0xff] }
 0x1cb   : > { %v5152_v4 = vcombine.high %v553_v60, %v557_v61  ;;  %v5151_v10 = vcombine.low %v553_v60, %v557_v61  ;;  %v5153_v11 = vcombine.low %v554_v63, %v558_v0  ;;  %v609_v55 = vld [vmem:[%s6073_s7 + $0x950] sm:$0xff] }
 0x1cd   : > { %3842 = vmatpush1.bf16.msra.mxu0 %v5087_v5  ;;  %4006 = vmatpush1.bf16.msra.mxu1 %v5089_v6  ;;  %v5154_v5 = vcombine.high %v554_v63, %v558_v0  ;;  %v561_v6 = vld [vmem:[%s6073_s7 + $0x7d0] sm:$0xff] }
 0x1ce   : > { %3843 = vmatprep.subr.bf16.mxu0 %v5096_v7  ;;  %4007 = vmatprep.subr.bf16.mxu1 %v5098_v8  ;;  %v565_v7 = vld [vmem:[%s6073_s7 + $0x7f0] sm:$0xff]  ;;  %v562_v8 = vld [vmem:[%s6073_s7 + $0x7d8] sm:$0xff] }
 0x1cf   : > { %v5160_v12 = vcombine.high %v561_v6, %v565_v7  ;;  %v5159_v18 = vcombine.low %v561_v6, %v565_v7  ;;  %v5161_v19 = vcombine.low %v562_v8, %v566_v9  ;;  %v617_v0 = vld [vmem:[%s6073_s7 + $0x990] sm:$0xff] }
 0x1d1   : > { %3844 = vmatpush1.bf16.msra.mxu0 %v5095_v13  ;;  %4008 = vmatpush1.bf16.msra.mxu1 %v5097_v14  ;;  %v5162_v13 = vcombine.high %v562_v8, %v566_v9  ;;  %v569_v14 = vld [vmem:[%s6073_s7 + $0x810] sm:$0xff] }
 0x1d2   : > { %3845 = vmatprep.subr.bf16.mxu0 %v5104_v15  ;;  %4009 = vmatprep.subr.bf16.mxu1 %v5106_v16  ;;  %v573_v15 = vld [vmem:[%s6073_s7 + $0x830] sm:$0xff]  ;;  %v570_v16 = vld [vmem:[%s6073_s7 + $0x818] sm:$0xff] }
 0x1d3   : > { %v5168_v21 = vcombine.high %v569_v14, %v573_v15  ;;  %v5167_v27 = vcombine.low %v569_v14, %v573_v15  ;;  %v5169_v1 = vcombine.low %v570_v16, %v574_v17  ;;  %v625_v9 = vld [vmem:[%s6073_s7 + $0x9d0] sm:$0xff] }
 0x1d5   : > { %3846 = vmatpush1.bf16.msra.mxu0 %v5103_v22  ;;  %4010 = vmatpush1.bf16.msra.mxu1 %v5105_v23  ;;  %v5170_v22 = vcombine.high %v570_v16, %v574_v17  ;;  %v577_v23 = vld [vmem:[%s6073_s7 + $0x850] sm:$0xff] }
 0x1d6   : > { %3847 = vmatprep.subr.bf16.mxu0 %v5112_v24  ;;  %4011 = vmatprep.subr.bf16.mxu1 %v5114_v25  ;;  %v581_v24 = vld [vmem:[%s6073_s7 + $0x870] sm:$0xff]  ;;  %v578_v25 = vld [vmem:[%s6073_s7 + $0x858] sm:$0xff] }
 0x1d7   : > { %v5176_v28 = vcombine.high %v577_v23, %v581_v24  ;;  %v5175_v35 = vcombine.low %v577_v23, %v581_v24  ;;  %v5177_v36 = vcombine.low %v578_v25, %v582_v26  ;;  %v633_v17 = vld [vmem:[%s6073_s7 + $0xa10] sm:$0xff] }
 0x1d9   : > { %3848 = vmatpush1.bf16.msra.mxu0 %v5111_v31  ;;  %4012 = vmatpush1.bf16.msra.mxu1 %v5113_v32  ;;  %v5178_v31 = vcombine.high %v578_v25, %v582_v26  ;;  %v585_v32 = vld [vmem:[%s6073_s7 + $0x890] sm:$0xff] }
 0x1da   : > { %3849 = vmatprep.subr.bf16.mxu0 %v5120_v33  ;;  %4013 = vmatprep.subr.bf16.mxu1 %v5122_v20  ;;  %v589_v33 = vld [vmem:[%s6073_s7 + $0x8b0] sm:$0xff]  ;;  %v586_v20 = vld [vmem:[%s6073_s7 + $0x898] sm:$0xff] }
 0x1db   : > { %v5184_v37 = vcombine.high %v585_v32, %v589_v33  ;;  %v5185_v43 = vcombine.low %v586_v20, %v590_v34  ;;  %v641_v26 = vld [vmem:[%s6073_s7 + $0xa50] sm:$0xff] }
 0x1dd   : > { %3850 = vmatpush1.bf16.msra.mxu0 %v5119_v38  ;;  %4014 = vmatpush1.bf16.msra.mxu1 %v5121_v39  ;;  %v5186_v38 = vcombine.high %v586_v20, %v590_v34  ;;  %v593_v39 = vld [vmem:[%s6073_s7 + $0x8d0] sm:$0xff] }
 0x1de   : > { %3851 = vmatprep.subr.bf16.mxu0 %v5128_v41  ;;  %4015 = vmatprep.subr.bf16.mxu1 %v5130_v42  ;;  %v597_v41 = vld [vmem:[%s6073_s7 + $0x8f0] sm:$0xff]  ;;  %v594_v42 = vld [vmem:[%s6073_s7 + $0x8d8] sm:$0xff] }
 0x1df   : > { %v5192_v45 = vcombine.high %v593_v39, %v597_v41  ;;  %v5194_v46 = vcombine.high %v594_v42, %v598_v30  ;;  %v5191_v51 = vcombine.low %v593_v39, %v597_v41  ;;  %v649_v34 = vld [vmem:[%s6073_s7 + $0xa90] sm:$0xff] }
 0x1e1   : > { %3852 = vmatpush1.bf16.msra.mxu0 %v5127_v47  ;;  %4016 = vmatpush1.bf16.msra.mxu1 %v5129_v48  ;;  %v601_v47 = vld [vmem:[%s6073_s7 + $0x910] sm:$0xff] }
 0x1e2   : > { %3853 = vmatprep.subr.bf16.mxu0 %v5136_v49  ;;  %4017 = vmatprep.subr.bf16.mxu1 %v5138_v50  ;;  %v605_v48 = vld [vmem:[%s6073_s7 + $0x930] sm:$0xff]  ;;  %v602_v49 = vld [vmem:[%s6073_s7 + $0x918] sm:$0xff] }
 0x1e3   : > { %v606_v50 = vld [vmem:[%s6073_s7 + $0x938] sm:$0xff]  ;;  %v5200_v52 = vcombine.high %v601_v47, %v605_v48 }
 0x1e4   : > { %v5202_v53 = vcombine.high %v602_v49, %v606_v50  ;;  %v5201_v60 = vcombine.low %v602_v49, %v606_v50  ;;  %v665_v50 = vld [vmem:[%s6073_s7 + $0xb10] sm:$0xff] }
 0x1e5   : > { %3854 = vmatpush1.bf16.msra.mxu0 %v5135_v56  ;;  %4018 = vmatpush1.bf16.msra.mxu1 %v5137_v57  ;;  %v613_v56 = vld [vmem:[%s6073_s7 + $0x970] sm:$0xff]  ;;  %v610_v57 = vld [vmem:[%s6073_s7 + $0x958] sm:$0xff] }
 0x1e6   : > { %3855 = vmatprep.subr.bf16.mxu0 %v5144_v58  ;;  %4019 = vmatprep.subr.bf16.mxu1 %v5146_v59  ;;  %v614_v58 = vld [vmem:[%s6073_s7 + $0x978] sm:$0xff]  ;;  %v5199_v59 = vcombine.low %v601_v47, %v605_v48  ;;  %v5208_v61 = vcombine.high %v609_v55, %v613_v56 }
 0x1e7   : > { %v5210_v63 = vcombine.high %v610_v57, %v614_v58  ;;  %v5209_v6 = vcombine.low %v610_v57, %v614_v58  ;;  %v673_v58 = vld [vmem:[%s6073_s7 + $0xb50] sm:$0xff] }
 0x1e9   : > { %3856 = vmatpush1.bf16.msra.mxu0 %v5143_v2  ;;  %4020 = vmatpush1.bf16.msra.mxu1 %v5145_v3  ;;  %v621_v2 = vld [vmem:[%s6073_s7 + $0x9b0] sm:$0xff]  ;;  %v618_v3 = vld [vmem:[%s6073_s7 + $0x998] sm:$0xff] }
 0x1ea   : > { %3857 = vmatprep.subr.bf16.mxu0 %v5152_v4  ;;  %4021 = vmatprep.subr.bf16.mxu1 %v5154_v5  ;;  %v622_v4 = vld [vmem:[%s6073_s7 + $0x9b8] sm:$0xff]  ;;  %v5207_v5 = vcombine.low %v609_v55, %v613_v56  ;;  %v5216_v7 = vcombine.high %v617_v0, %v621_v2 }
 0x1eb   : > { %v5218_v8 = vcombine.high %v618_v3, %v622_v4  ;;  %v5217_v14 = vcombine.low %v618_v3, %v622_v4  ;;  %v681_v4 = vld [vmem:[%s6073_s7 + $0xb90] sm:$0xff] }
 0x1ed   : > { %3858 = vmatpush1.bf16.msra.mxu0 %v5151_v10  ;;  %4022 = vmatpush1.bf16.msra.mxu1 %v5153_v11  ;;  %v629_v10 = vld [vmem:[%s6073_s7 + $0x9f0] sm:$0xff]  ;;  %v626_v11 = vld [vmem:[%s6073_s7 + $0x9d8] sm:$0xff] }
 0x1ee   : > { %3859 = vmatprep.subr.bf16.mxu0 %v5160_v12  ;;  %4023 = vmatprep.subr.bf16.mxu1 %v5162_v13  ;;  %v630_v12 = vld [vmem:[%s6073_s7 + $0x9f8] sm:$0xff]  ;;  %v5215_v13 = vcombine.low %v617_v0, %v621_v2  ;;  %v5224_v15 = vcombine.high %v625_v9, %v629_v10 }
 0x1ef   : > { %v5226_v16 = vcombine.high %v626_v11, %v630_v12  ;;  %v5225_v23 = vcombine.low %v626_v11, %v630_v12  ;;  %v689_v12 = vld [vmem:[%s6073_s7 + $0xbd0] sm:$0xff] }
 0x1f1   : > { %3860 = vmatpush1.bf16.msra.mxu0 %v5159_v18  ;;  %4024 = vmatpush1.bf16.msra.mxu1 %v5161_v19  ;;  %v637_v18 = vld [vmem:[%s6073_s7 + $0xa30] sm:$0xff]  ;;  %v634_v19 = vld [vmem:[%s6073_s7 + $0xa18] sm:$0xff] }
 0x1f2   : > { %3870 = vmatprep.subr.bf16.mxu0 %v5168_v21  ;;  %4034 = vmatprep.subr.bf16.mxu1 %v5170_v22  ;;  %v638_v21 = vld [vmem:[%s6073_s7 + $0xa38] sm:$0xff]  ;;  %v5223_v22 = vcombine.low %v625_v9, %v629_v10  ;;  %v5232_v24 = vcombine.high %v633_v17, %v637_v18 }
 0x1f3   : > { %v5234_v25 = vcombine.high %v634_v19, %v638_v21 }
 0x1f4   : > { %3862 = vmatmul.mubr.bf16.vlgmr.msra.gmra.mrb[4].mxu0 %v6262_v29  ;;  %4026 = vmatmul.mubr.bf16.vlgmr.msra.gmra.mrb[4].mxu1 %v6262_v29  ;;  %v5183_v29 = vcombine.low %v585_v32, %v589_v33  ;;  %v5233_v32 = vcombine.low %v634_v19, %v638_v21  ;;  %v697_v21 = vld [vmem:[%s6073_s7 + $0xc10] sm:$0xff] }
 0x1f5   : > { %3871 = vmatpush1.bf16.msra.mxu0 %v5167_v27  ;;  %4035 = vmatpush1.bf16.msra.mxu1 %v5169_v1  ;;  %v645_v27 = vld [vmem:[%s6073_s7 + $0xa70] sm:$0xff]  ;;  %v642_v1 = vld [vmem:[%s6073_s7 + $0xa58] sm:$0xff] }
 0x1f6   : > { %3872 = vmatprep.subr.bf16.mxu0 %v5176_v28  ;;  %4036 = vmatprep.subr.bf16.mxu1 %v5178_v31  ;;  %v646_v28 = vld [vmem:[%s6073_s7 + $0xa78] sm:$0xff]  ;;  %v5231_v31 = vcombine.low %v633_v17, %v637_v18  ;;  %v5240_v33 = vcombine.high %v641_v26, %v645_v27 }
 0x1f7   : > { %3902 = vmatprep.mubr.bf16.mxu0 %v6268_v40  ;;  %4066 = vmatprep.mubr.bf16.mxu1 %v6268_v40  ;;  %v5193_v40 = vcombine.low %v594_v42, %v598_v30  ;;  %v5242_v20 = vcombine.high %v642_v1, %v646_v28  ;;  %v5241_v39 = vcombine.low %v642_v1, %v646_v28  ;;  %v657_v30 = vld [vmem:[%s6073_s7 + $0xad0] sm:$0xff] }
 0x1f8   : > { %v705_v28 = vld [vmem:[%s6073_s7 + $0xc50] sm:$0xff] }
 0x1f9   : > { %3873 = vmatpush1.bf16.msra.mxu0 %v5175_v35  ;;  %4037 = vmatpush1.bf16.msra.mxu1 %v5177_v36  ;;  %v653_v35 = vld [vmem:[%s6073_s7 + $0xab0] sm:$0xff]  ;;  %v650_v36 = vld [vmem:[%s6073_s7 + $0xa98] sm:$0xff] }
 0x1fa   : > { %3874 = vmatprep.subr.bf16.mxu0 %v5184_v37  ;;  %4038 = vmatprep.subr.bf16.mxu1 %v5186_v38  ;;  %v654_v37 = vld [vmem:[%s6073_s7 + $0xab8] sm:$0xff]  ;;  %v5239_v38 = vcombine.low %v641_v26, %v645_v27  ;;  %v5248_v41 = vcombine.high %v649_v34, %v653_v35 }
 0x1fb   : > { %v5250_v42 = vcombine.high %v650_v36, %v654_v37  ;;  %v5249_v47 = vcombine.low %v650_v36, %v654_v37  ;;  %v713_v37 = vld [vmem:[%s6073_s7 + $0xc90] sm:$0xff] }
 0x1fd   : > { %3875 = vmatpush1.bf16.msra.mxu0 %v5183_v29  ;;  %4039 = vmatpush1.bf16.msra.mxu1 %v5185_v43  ;;  %v661_v29 = vld [vmem:[%s6073_s7 + $0xaf0] sm:$0xff]  ;;  %v658_v43 = vld [vmem:[%s6073_s7 + $0xad8] sm:$0xff] }
 0x1fe   : > { %3876 = vmatprep.subr.bf16.mxu0 %v5192_v45  ;;  %4040 = vmatprep.subr.bf16.mxu1 %v5194_v46  ;;  %v662_v45 = vld [vmem:[%s6073_s7 + $0xaf8] sm:$0xff]  ;;  %v5247_v46 = vcombine.low %v649_v34, %v653_v35  ;;  %v5256_v48 = vcombine.high %v657_v30, %v661_v29 }
 0x1ff   : > { %v5258_v49 = vcombine.high %v658_v43, %v662_v45  ;;  %v5257_v55 = vcombine.low %v658_v43, %v662_v45 }
 0x201   : > { %3877 = vmatpush1.bf16.msra.mxu0 %v5191_v51  ;;  %4041 = vmatpush1.bf16.msra.mxu1 %v5193_v40  ;;  %v669_v51 = vld [vmem:[%s6073_s7 + $0xb30] sm:$0xff]  ;;  %v666_v40 = vld [vmem:[%s6073_s7 + $0xb18] sm:$0xff] }
 0x202   : > { %3878 = vmatprep.subr.bf16.mxu0 %v5200_v52  ;;  %4042 = vmatprep.subr.bf16.mxu1 %v5202_v53  ;;  %v670_v52 = vld [vmem:[%s6073_s7 + $0xb38] sm:$0xff]  ;;  %v5255_v53 = vcombine.low %v657_v30, %v661_v29  ;;  %v5264_v56 = vcombine.high %v665_v50, %v669_v51 }
 0x203   : > { %v5266_v57 = vcombine.high %v666_v40, %v670_v52  ;;  %v5265_v0 = vcombine.low %v666_v40, %v670_v52 }
 0x205   : > { %3879 = vmatpush1.bf16.msra.mxu0 %v5199_v59  ;;  %4043 = vmatpush1.bf16.msra.mxu1 %v5201_v60  ;;  %v677_v59 = vld [vmem:[%s6073_s7 + $0xb70] sm:$0xff]  ;;  %v674_v60 = vld [vmem:[%s6073_s7 + $0xb58] sm:$0xff] }
 0x206   : > { %3880 = vmatprep.subr.bf16.mxu0 %v5208_v61  ;;  %4044 = vmatprep.subr.bf16.mxu1 %v5210_v63  ;;  %v678_v61 = vld [vmem:[%s6073_s7 + $0xb78] sm:$0xff]  ;;  %v5263_v63 = vcombine.low %v665_v50, %v669_v51  ;;  %v5272_v2 = vcombine.high %v673_v58, %v677_v59  ;;  %v6629_v51 = vld [vmem:[%s6088_s21] sm:$0xff] }
 0x207   : > { %v5274_v3 = vcombine.high %v674_v60, %v678_v61  ;;  %v5273_v9 = vcombine.low %v674_v60, %v678_v61 }
 0x209   : > { %3881 = vmatpush1.bf16.msra.mxu0 %v5207_v5  ;;  %4045 = vmatpush1.bf16.msra.mxu1 %v5209_v6  ;;  %v685_v5 = vld [vmem:[%s6073_s7 + $0xbb0] sm:$0xff]  ;;  %v682_v6 = vld [vmem:[%s6073_s7 + $0xb98] sm:$0xff] }
 0x20a   : > { %3882 = vmatprep.subr.bf16.mxu0 %v5216_v7  ;;  %4046 = vmatprep.subr.bf16.mxu1 %v5218_v8  ;;  %v686_v7 = vld [vmem:[%s6073_s7 + $0xbb8] sm:$0xff]  ;;  %v5271_v8 = vcombine.low %v673_v58, %v677_v59  ;;  %v5280_v10 = vcombine.high %v681_v4, %v685_v5  ;;  %v824_v59 = vunpack.c.l.bf16 %v6629_v51 }
 0x20b   : > { %v5282_v11 = vcombine.high %v682_v6, %v686_v7  ;;  %v5281_v17 = vcombine.low %v682_v6, %v686_v7  ;;  %v734_v58 = vld [vmem:[%s6073_s7 + $0xd38] sm:$0xff]  ;;  %v741_v6 = vld [vmem:[%s6073_s7 + $0xd70] sm:$0xff] }
 0x20d   : > { %3883 = vmatpush1.bf16.msra.mxu0 %v5215_v13  ;;  %4047 = vmatpush1.bf16.msra.mxu1 %v5217_v14  ;;  %v693_v13 = vld [vmem:[%s6073_s7 + $0xbf0] sm:$0xff]  ;;  %v690_v14 = vld [vmem:[%s6073_s7 + $0xbd8] sm:$0xff] }
 0x20e   : > { %3884 = vmatprep.subr.bf16.mxu0 %v5224_v15  ;;  %4048 = vmatprep.subr.bf16.mxu1 %v5226_v16  ;;  %v694_v15 = vld [vmem:[%s6073_s7 + $0xbf8] sm:$0xff]  ;;  %v5279_v16 = vcombine.low %v681_v4, %v685_v5  ;;  %v5288_v18 = vcombine.high %v689_v12, %v693_v13  ;;  %v737_v5 = vld [vmem:[%s6073_s7 + $0xd50] sm:$0xff] }
 0x20f   : > { %v5290_v19 = vcombine.high %v690_v14, %v694_v15  ;;  %v5289_v26 = vcombine.low %v690_v14, %v694_v15  ;;  %v5336_v15 = vcombine.high %v737_v5, %v741_v6 }
 0x211   : > { %3885 = vmatpush1.bf16.msra.mxu0 %v5223_v22  ;;  %4049 = vmatpush1.bf16.msra.mxu1 %v5225_v23  ;;  %v701_v22 = vld [vmem:[%s6073_s7 + $0xc30] sm:$0xff]  ;;  %v698_v23 = vld [vmem:[%s6073_s7 + $0xc18] sm:$0xff] }
 0x212   : > { %3886 = vmatprep.subr.bf16.mxu0 %v5232_v24  ;;  %4050 = vmatprep.subr.bf16.mxu1 %v5234_v25  ;;  %v702_v24 = vld [vmem:[%s6073_s7 + $0xc38] sm:$0xff]  ;;  %v5287_v25 = vcombine.low %v689_v12, %v693_v13  ;;  %v5296_v27 = vcombine.high %v697_v21, %v701_v22 }
 0x213   : > { %v5298_v1 = vcombine.high %v698_v23, %v702_v24  ;;  %v5297_v34 = vcombine.low %v698_v23, %v702_v24 }
 0x215   : > { %3887 = vmatpush1.bf16.msra.mxu0 %v5231_v31  ;;  %4051 = vmatpush1.bf16.msra.mxu1 %v5233_v32  ;;  %v709_v31 = vld [vmem:[%s6073_s7 + $0xc70] sm:$0xff]  ;;  %v706_v32 = vld [vmem:[%s6073_s7 + $0xc58] sm:$0xff] }
 0x216   : > { %3888 = vmatprep.subr.bf16.mxu0 %v5240_v33  ;;  %4052 = vmatprep.subr.bf16.mxu1 %v5242_v20  ;;  %v710_v33 = vld [vmem:[%s6073_s7 + $0xc78] sm:$0xff]  ;;  %v5295_v20 = vcombine.low %v697_v21, %v701_v22  ;;  %v5304_v35 = vcombine.high %v705_v28, %v709_v31  ;;  %v5303_v30 = vcombine.low %v705_v28, %v709_v31 }
 0x217   : > { %v5306_v36 = vcombine.high %v706_v32, %v710_v33  ;;  %v5305_v29 = vcombine.low %v706_v32, %v710_v33  ;;  %v746_v21 = vld [vmem:[%s6073_s7 + $0xd98] sm:$0xff]  ;;  %v753_v32 = vld [vmem:[%s6073_s7 + $0xdd0] sm:$0xff] }
 0x218   : > { %v750_v22 = vld [vmem:[%s6073_s7 + $0xdb8] sm:$0xff]  ;;  %v757_v33 = vld [vmem:[%s6073_s7 + $0xdf0] sm:$0xff] }
 0x219   : > { %3889 = vmatpush1.bf16.msra.mxu0 %v5239_v38  ;;  %4053 = vmatpush1.bf16.msra.mxu1 %v5241_v39  ;;  %v717_v38 = vld [vmem:[%s6073_s7 + $0xcb0] sm:$0xff]  ;;  %v714_v39 = vld [vmem:[%s6073_s7 + $0xc98] sm:$0xff]  ;;  %v5346_v31 = vcombine.high %v746_v21, %v750_v22 }
 0x21a   : > { %3890 = vmatprep.subr.bf16.mxu0 %v5248_v41  ;;  %4054 = vmatprep.subr.bf16.mxu1 %v5250_v42  ;;  %v718_v41 = vld [vmem:[%s6073_s7 + $0xcb8] sm:$0xff]  ;;  %v828_v42 = vlaneseq  ;;  %v5312_v43 = vcombine.high %v713_v37, %v717_v38 }
 0x21b   : > { %v5314_v45 = vcombine.high %v714_v39, %v718_v41  ;;  %v5313_v40 = vcombine.low %v714_v39, %v718_v41 }
 0x21c   : > { %v6625_v50 = vshrl.u32 %v828_v42, 7 }
 0x21d   : > { %3891 = vmatpush1.bf16.msra.mxu0 %v5247_v46  ;;  %4055 = vmatpush1.bf16.msra.mxu1 %v5249_v47  ;;  %v721_v46 = vld [vmem:[%s6073_s7 + $0xcd0] sm:$0xff] }
 0x21e   : > { %3892 = vmatprep.subr.bf16.mxu0 %v5256_v48  ;;  %4056 = vmatprep.subr.bf16.mxu1 %v5258_v49  ;;  %v725_v47 = vld [vmem:[%s6073_s7 + $0xcf0] sm:$0xff]  ;;  %v722_v48 = vld [vmem:[%s6073_s7 + $0xcd8] sm:$0xff]  ;;  %v838_v61 = vsub.s32 4, %v6625_v50 }
 0x21f   : > { %v726_v49 = vld [vmem:[%s6073_s7 + $0xcf8] sm:$0xff]  ;;  %v5320_v52 = vcombine.high %v721_v46, %v725_v47  ;;  %v5319_v60 = vcombine.low %v721_v46, %v725_v47  ;;  %v5345_v47 = vcombine.low %v746_v21, %v750_v22  ;;  %v785_v21 = vld [vmem:[%s6073_s7 + $0xed0] sm:$0xff] }
 0x220   : > { %v789_v22 = vld [vmem:[%s6073_s7 + $0xef0] sm:$0xff] }
 0x221   : > { %3893 = vmatpush1.bf16.msra.mxu0 %v5255_v53  ;;  %4057 = vmatpush1.bf16.msra.mxu1 %v5257_v55  ;;  %v5322_v53 = vcombine.high %v722_v48, %v726_v49  ;;  %v729_v55 = vld [vmem:[%s6073_s7 + $0xd10] sm:$0xff] }
 0x222   : > { %3894 = vmatprep.subr.bf16.mxu0 %v5264_v56  ;;  %4058 = vmatprep.subr.bf16.mxu1 %v5266_v57  ;;  %v733_v56 = vld [vmem:[%s6073_s7 + $0xd30] sm:$0xff]  ;;  %v730_v57 = vld [vmem:[%s6073_s7 + $0xd18] sm:$0xff] }
 0x223   : > { %v5330_v4 = vcombine.high %v730_v57, %v734_v58  ;;  %v5329_v13 = vcombine.low %v730_v57, %v734_v58  ;;  %v762_v57 = vld [vmem:[%s6073_s7 + $0xe18] sm:$0xff] }
 0x224   : > { %v766_v58 = vld [vmem:[%s6073_s7 + $0xe38] sm:$0xff] }
 0x225   : > { %3895 = vmatpush1.bf16.msra.mxu0 %v5263_v63  ;;  %4059 = vmatpush1.bf16.msra.mxu1 %v5265_v0  ;;  %v834_v63 = vsub.s32 2, %v6625_v50  ;;  %v5321_v0 = vcombine.low %v722_v48, %v726_v49  ;;  %v5352_v48 = vcombine.high %v753_v32, %v757_v33 }
 0x226   : > { %3896 = vmatprep.subr.bf16.mxu0 %v5272_v2  ;;  %4060 = vmatprep.subr.bf16.mxu1 %v5274_v3  ;;  %v5328_v2 = vcombine.high %v729_v55, %v733_v56  ;;  %v842_v3 = vsub.s32 6, %v6625_v50 }
 0x227   : > { %v835_v12 = vrot.slane %v824_v59, %v834_v63 }
 0x228   : > { %v843_v14 = vrot.slane %v824_v59, %v842_v3 }
 0x229   : > { %3897 = vmatpush1.bf16.msra.mxu0 %v5271_v8  ;;  %4061 = vmatpush1.bf16.msra.mxu1 %v5273_v9  ;;  %v738_v8 = vld [vmem:[%s6073_s7 + $0xd58] sm:$0xff] }
 0x22a   : > { %3898 = vmatprep.subr.bf16.mxu0 %v5280_v10  ;;  %4062 = vmatprep.subr.bf16.mxu1 %v5282_v11  ;;  %v742_v9 = vld [vmem:[%s6073_s7 + $0xd78] sm:$0xff]  ;;  %v5327_v10 = vcombine.low %v729_v55, %v733_v56  ;;  %v839_v11 = vrot.slane %v824_v59, %v838_v61  ;;  %v765_v55 = vld [vmem:[%s6073_s7 + $0xe30] sm:$0xff] }
 0x22d   : > { %3899 = vmatpush1.bf16.msra.mxu0 %v5279_v16  ;;  %4063 = vmatpush1.bf16.msra.mxu1 %v5281_v17  ;;  %v5338_v16 = vcombine.high %v738_v8, %v742_v9  ;;  %v745_v17 = vld [vmem:[%s6073_s7 + $0xd90] sm:$0xff] }
 0x22e   : > { %3900 = vmatprep.subr.bf16.mxu0 %v5288_v18  ;;  %4064 = vmatprep.subr.bf16.mxu1 %v5290_v19  ;;  %v749_v18 = vld [vmem:[%s6073_s7 + $0xdb0] sm:$0xff] }
 0x231   : > { %3901 = vmatpush1.bf16.msra.mxu0 %v5287_v25  ;;  %4065 = vmatpush1.bf16.msra.mxu1 %v5289_v26  ;;  %v5335_v25 = vcombine.low %v737_v5, %v741_v6  ;;  %v773_v5 = vld [vmem:[%s6073_s7 + $0xe70] sm:$0xff]  ;;  %v770_v6 = vld [vmem:[%s6073_s7 + $0xe58] sm:$0xff] }
 0x232   : > { %3911 = vmatprep.subr.bf16.mxu0 %v5296_v27  ;;  %4075 = vmatprep.subr.bf16.mxu1 %v5298_v1  ;;  %v5337_v27 = vcombine.low %v738_v8, %v742_v9  ;;  %v5344_v1 = vcombine.high %v745_v17, %v749_v18  ;;  %v5361_v9 = vcombine.low %v762_v57, %v766_v58 }
 0x234   : > { %3903 = vmatmul.mubr.bf16.vlgmr.msra.gmra.mrb[4].mxu0 %v6334_v44  ;;  %4067 = vmatmul.mubr.bf16.vlgmr.msra.gmra.mrb[4].mxu1 %v6334_v44  ;;  %v5311_v44 = vcombine.low %v713_v37, %v717_v38  ;;  %v758_v37 = vld [vmem:[%s6073_s7 + $0xdf8] sm:$0xff] }
 0x235   : > { %3912 = vmatpush1.bf16.msra.mxu0 %v5295_v20  ;;  %4076 = vmatpush1.bf16.msra.mxu1 %v5297_v34 }
 0x236   : > { %3913 = vmatprep.subr.bf16.mxu0 %v5304_v35  ;;  %4077 = vmatprep.subr.bf16.mxu1 %v5306_v36  ;;  %v754_v36 = vld [vmem:[%s6073_s7 + $0xdd8] sm:$0xff] }
 0x237   : > { %3943 = vmatprep.mubr.bf16.mxu0 %v6340_v54  ;;  %4107 = vmatprep.mubr.bf16.mxu1 %v6340_v54  ;;  %v6637_v54 = vsub.s32 0, %v6625_v50 }
 0x239   : > { %3914 = vmatpush1.bf16.msra.mxu0 %v5303_v30  ;;  %4078 = vmatpush1.bf16.msra.mxu1 %v5305_v29  ;;  %v831_v7 = vrot.slane %v824_v59, %v6637_v54  ;;  %v879_v23 = vrot.slane %v839_v11, %v6637_v54  ;;  %v875_v24 = vrot.slane %v835_v12, %v6637_v54  ;;  %v777_v12 = vld [vmem:[%s6073_s7 + $0xe90] sm:$0xff] }
 0x23a   : > { %3915 = vmatprep.subr.bf16.mxu0 %v5312_v43  ;;  %4079 = vmatprep.subr.bf16.mxu1 %v5314_v45  ;;  %v883_v26 = vrot.slane %v843_v14, %v6637_v54  ;;  %v5343_v30 = vcombine.low %v745_v17, %v749_v18  ;;  %v5351_v59 = vcombine.low %v753_v32, %v757_v33  ;;  %v778_v14 = vld [vmem:[%s6073_s7 + $0xe98] sm:$0xff] }
 0x23b   : > { %v871_v19 = vrot.slane %v831_v7, %v6637_v54  ;;  %v774_v7 = vld [vmem:[%s6073_s7 + $0xe78] sm:$0xff] }
 0x23c   : > { %v5370_v11 = vcombine.high %v770_v6, %v774_v7  ;;  %v5369_v17 = vcombine.low %v770_v6, %v774_v7  ;;  %v794_v32 = vld [vmem:[%s6073_s7 + $0xf18] sm:$0xff] }
 0x23d   : > { %3916 = vmatpush1.bf16.msra.mxu0 %v5311_v44  ;;  %4080 = vmatpush1.bf16.msra.mxu1 %v5313_v40  ;;  %v798_v33 = vld [vmem:[%s6073_s7 + $0xf38] sm:$0xff] }
 0x23e   : > { %3917 = vmatprep.subr.bf16.mxu0 %v5320_v52  ;;  %4081 = vmatprep.subr.bf16.mxu1 %v5322_v53  ;;  %v5354_v52 = vcombine.high %v754_v36, %v758_v37  ;;  %v761_v53 = vld [vmem:[%s6073_s7 + $0xe10] sm:$0xff] }
 0x23f   : > { %v5359_v8 = vcombine.low %v761_v53, %v765_v55 }
 0x241   : > { %3918 = vmatpush1.bf16.msra.mxu0 %v5319_v60  ;;  %4082 = vmatpush1.bf16.msra.mxu1 %v5321_v0  ;;  %v5353_v60 = vcombine.low %v754_v36, %v758_v37  ;;  %v5360_v0 = vcombine.high %v761_v53, %v765_v55  ;;  %v5394_v36 = vcombine.high %v794_v32, %v798_v33  ;;  %v801_v37 = vld [vmem:[%s6073_s7 + $0xf50] sm:$0xff] }
 0x242   : > { %3919 = vmatprep.subr.bf16.mxu0 %v5328_v2  ;;  %4083 = vmatprep.subr.bf16.mxu1 %v5330_v4  ;;  %v5362_v2 = vcombine.high %v762_v57, %v766_v58  ;;  %v769_v4 = vld [vmem:[%s6073_s7 + $0xe50] sm:$0xff] }
 0x243   : > { %v817_v58 = vld [vmem:[%s6073_s7 + $0xfd0] sm:$0xff] }
 0x245   : > { %3920 = vmatpush1.bf16.msra.mxu0 %v5327_v10  ;;  %4084 = vmatpush1.bf16.msra.mxu1 %v5329_v13  ;;  %v5368_v10 = vcombine.high %v769_v4, %v773_v5  ;;  %v781_v13 = vld [vmem:[%s6073_s7 + $0xeb0] sm:$0xff] }
 0x246   : > { %3921 = vmatprep.subr.bf16.mxu0 %v5336_v15  ;;  %4085 = vmatprep.subr.bf16.mxu1 %v5338_v16  ;;  %v782_v15 = vld [vmem:[%s6073_s7 + $0xeb8] sm:$0xff]  ;;  %v5367_v16 = vcombine.low %v769_v4, %v773_v5  ;;  %v5376_v18 = vcombine.high %v777_v12, %v781_v13 }
 0x247   : > { %v3617_v28 = vpop.f32.mrb[0].mxu0  ;;  %v3781_v34 = vpop.f32.mrb[0].mxu1 }
 0x248   : > { %v5575_v20 = vadd.f32 %v3617_v28, %v871_v19  ;;  %v3619_v35 = vpop.f32.mrb[1].mxu0  ;;  %v5577_v38 = vadd.f32 %v3781_v34, %v879_v23  ;;  %v3783_v41 = vpop.f32.mrb[1].mxu1  ;;  %v5378_v19 = vcombine.high %v778_v14, %v782_v15  ;;  %v786_v23 = vld [vmem:[%s6073_s7 + $0xed8] sm:$0xff]  ;;  %v793_v28 = vld [vmem:[%s6073_s7 + $0xf10] sm:$0xff] }
 0x249   : > { %v5576_v39 = vadd.f32 %v3619_v35, %v875_v24  ;;  %v3621_v42 = vpop.f32.mrb[2].mxu0  ;;  %3922 = vmatpush1.bf16.msra.mxu0 %v5335_v25  ;;  %v5578_v43 = vadd.f32 %v3783_v41, %v883_v26  ;;  %v3785_v45 = vpop.f32.mrb[2].mxu1  ;;  %4086 = vmatpush1.bf16.msra.mxu1 %v5337_v27  ;;  %v790_v24 = vld [vmem:[%s6073_s7 + $0xef8] sm:$0xff]  ;;  %v5375_v25 = vcombine.low %v777_v12, %v781_v13 }
 0x24a   : > { %v6665_v29 = vmax.f32 %v5575_v20, 0.0  ;;  %v3622_v46 = vpop.f32.mrb[3].mxu0  ;;  %3923 = vmatprep.subr.bf16.mxu0 %v5344_v1  ;;  %v6667_v49 = vmax.f32 %v5577_v38, 0.0  ;;  %v3786_v40 = vpop.f32.mrb[3].mxu1  ;;  %4087 = vmatprep.subr.bf16.mxu1 %v5346_v31  ;;  %v5377_v26 = vcombine.low %v778_v14, %v782_v15  ;;  %v5384_v27 = vcombine.high %v785_v21, %v789_v22  ;;  %v797_v31 = vld [vmem:[%s6073_s7 + $0xf30] sm:$0xff]  ;;  %v806_v41 = vld [vmem:[%s6073_s7 + $0xf78] sm:$0xff] }
 0x24b   : > { %v6669_v44 = vmax.f32 %v5576_v39, 0.0  ;;  %v6674_v56 = vmax.f32 %v5578_v43, 0.0  ;;  %v5386_v1 = vcombine.high %v786_v23, %v790_v24  ;;  %v5383_v20 = vcombine.low %v785_v21, %v789_v22  ;;  %v805_v38 = vld [vmem:[%s6073_s7 + $0xf70] sm:$0xff]  ;;  %v802_v39 = vld [vmem:[%s6073_s7 + $0xf58] sm:$0xff] }
 0x24c   : > { %4124 = vst [vmem:[#allocation2] sm:$0xff] %v6665_v29  ;;  %4126 = vst [vmem:[#allocation2 + $0x10] sm:$0xff] %v6667_v49  ;;  %v5385_v34 = vcombine.low %v786_v23, %v790_v24  ;;  %v5392_v35 = vcombine.high %v793_v28, %v797_v31  ;;  %v5391_v42 = vcombine.low %v793_v28, %v797_v31  ;;  %v809_v46 = vld [vmem:[%s6073_s7 + $0xf90] sm:$0xff]  ;;  %v814_v40 = vld [vmem:[%s6073_s7 + $0xfb8] sm:$0xff] }
 0x24d   : > { %4125 = vst [vmem:[#allocation2 + $0x8] sm:$0xff] %v6669_v44  ;;  %3924 = vmatpush1.bf16.msra.mxu0 %v5343_v30  ;;  %4127 = vst [vmem:[#allocation2 + $0x18] sm:$0xff] %v6674_v56  ;;  %4088 = vmatpush1.bf16.msra.mxu1 %v5345_v47  ;;  %v5393_v30 = vcombine.low %v794_v32, %v798_v33  ;;  %v5400_v43 = vcombine.high %v801_v37, %v805_v38  ;;  %v813_v47 = vld [vmem:[%s6073_s7 + $0xfb0] sm:$0xff]  ;;  %v5695_v28 = vld [vmem:[#allocation5 + $0x40] sm:$0xff] (!%p5419_p9)  }
 0x24e   : > { %3925 = vmatprep.subr.bf16.mxu0 %v5352_v48  ;;  %4089 = vmatprep.subr.bf16.mxu1 %v5354_v52  ;;  %v5402_v45 = vcombine.high %v802_v39, %v806_v41  ;;  %v810_v48 = vld [vmem:[%s6073_s7 + $0xf98] sm:$0xff]  ;;  %v5399_v52 = vcombine.low %v801_v37, %v805_v38  ;;  %v5401_v53 = vcombine.low %v802_v39, %v806_v41  ;;  %v5696_v33 = vld [vmem:[#allocation5 + $0xc0] sm:$0xff] (!%p5419_p9)   ;;  %v5701_v37 = vld [vmem:[#allocation5 + $0x8] sm:$0xff] (!%p5419_p9)  }
 0x24f   : > { %v5408_v55 = vcombine.high %v809_v46, %v813_v47  ;;  %v5410_v57 = vcombine.high %v810_v48, %v814_v40  ;;  %v5409_v4 = vcombine.low %v810_v48, %v814_v40  ;;  %v4137_v31 = vpack.c.bf16 (!%p5419_p9), %v6669_v44, %v6669_v44  ;;  %v5702_v38 = vld [vmem:[#allocation5 + $0x88] sm:$0xff] (!%p5419_p9)   ;;  %v5703_v44 = vld [vmem:[#allocation5 + $0x50] sm:$0xff] (!%p5419_p9)   ;;  %v5713_v48 = vld [vmem:[#allocation5 + $0x20] sm:$0xff] (!%p5419_p9)  }
 0x250   : > { %v4139_v32 = vpack.c.bf16 (!%p5419_p9), %v6674_v56, %v6674_v56  ;;  %v5704_v39 = vld [vmem:[#allocation5 + $0xd0] sm:$0xff] (!%p5419_p9)   ;;  %v5714_v40 = vld [vmem:[#allocation5 + $0xa0] sm:$0xff] (!%p5419_p9)  }
 0x251   : > { %3926 = vmatpush1.bf16.msra.mxu0 %v5351_v59  ;;  %4090 = vmatpush1.bf16.msra.mxu1 %v5353_v60  ;;  %v821_v59 = vld [vmem:[%s6073_s7 + $0xff0] sm:$0xff]  ;;  %v818_v60 = vld [vmem:[%s6073_s7 + $0xfd8] sm:$0xff] }
 0x252   : > { %3927 = vmatprep.subr.bf16.mxu0 %v5360_v0  ;;  %4091 = vmatprep.subr.bf16.mxu1 %v5362_v2  ;;  %v822_v0 = vld [vmem:[%s6073_s7 + $0xff8] sm:$0xff]  ;;  %v5407_v2 = vcombine.low %v809_v46, %v813_v47  ;;  %v5416_v5 = vcombine.high %v817_v58, %v821_v59  ;;  %v5415_v7 = vcombine.low %v817_v58, %v821_v59  ;;  %v5705_v56 = vld [vmem:[#allocation5 + $0x10] sm:$0xff] (!%p5419_p9)   ;;  %v5711_v46 = vld [vmem:[#allocation5 + $0x60] sm:$0xff] (!%p5419_p9)  }
 0x253   : > { %v5418_v6 = vcombine.high %v818_v60, %v822_v0  ;;  %v5706_v41 = vld [vmem:[#allocation5 + $0x90] sm:$0xff] (!%p5419_p9)   ;;  %v5712_v47 = vld [vmem:[#allocation5 + $0xe0] sm:$0xff] (!%p5419_p9)  }
 0x254   : > { %v5719_v58 = vld [vmem:[#allocation5 + $0x70] sm:$0xff] (!%p5419_p9)  }
 0x255   : > { %3928 = vmatpush1.bf16.msra.mxu0 %v5359_v8  ;;  %4092 = vmatpush1.bf16.msra.mxu1 %v5361_v9  ;;  %v5417_v8 = vcombine.low %v818_v60, %v822_v0  ;;  %v825_v9 = vunpack.c.h.bf16 %v6629_v51  ;;  %v5720_v59 = vld [vmem:[#allocation5 + $0xf0] sm:$0xff] (!%p5419_p9)  }
 0x256   : > { %3929 = vmatprep.subr.bf16.mxu0 %v5368_v10  ;;  %4093 = vmatprep.subr.bf16.mxu1 %v5370_v11  ;;  %v5721_v60 = vld [vmem:[#allocation5 + $0x30] sm:$0xff] (!%p5419_p9)  }
 0x257   : > { %v847_v10 = vrot.slane %v825_v9, %v6637_v54  ;;  %v855_v11 = vrot.slane %v825_v9, %v838_v61  ;;  %v851_v12 = vrot.slane %v825_v9, %v834_v63  ;;  %v859_v13 = vrot.slane %v825_v9, %v842_v3  ;;  %v5722_v0 = vld [vmem:[#allocation5 + $0xb0] sm:$0xff] (!%p5419_p9)   ;;  %v5727_v9 = vld [vmem:[#allocation5 + $0x140] sm:$0xff] (!%p5419_p9)  }
 0x259   : > { %3930 = vmatpush1.bf16.msra.mxu0 %v5367_v16  ;;  %4094 = vmatpush1.bf16.msra.mxu1 %v5369_v17  ;;  %v887_v14 = vrot.slane %v847_v10, %v6637_v54  ;;  %v895_v15 = vrot.slane %v855_v11, %v6637_v54  ;;  %v891_v16 = vrot.slane %v851_v12, %v6637_v54  ;;  %v5728_v10 = vld [vmem:[#allocation5 + $0x1c0] sm:$0xff] (!%p5419_p9)  }
 0x25a   : > { %3931 = vmatprep.subr.bf16.mxu0 %v5376_v18  ;;  %4095 = vmatprep.subr.bf16.mxu1 %v5378_v19  ;;  %v5729_v12 = vld [vmem:[#allocation5 + $0x100] sm:$0xff] (!%p5419_p9)  }
 0x25d   : > { %3932 = vmatpush1.bf16.msra.mxu0 %v5375_v25  ;;  %4096 = vmatpush1.bf16.msra.mxu1 %v5377_v26 }
 0x25e   : > { %3933 = vmatprep.subr.bf16.mxu0 %v5384_v27  ;;  %4097 = vmatprep.subr.bf16.mxu1 %v5386_v1 }
 0x261   : > { %3934 = vmatpush1.bf16.msra.mxu0 %v5383_v20  ;;  %4098 = vmatpush1.bf16.msra.mxu1 %v5385_v34  ;;  %v5697_v20 = vld [vmem:[#allocation5] sm:$0xff] (!%p5419_p9)  }
 0x262   : > { %3935 = vmatprep.subr.bf16.mxu0 %v5392_v35  ;;  %4099 = vmatprep.subr.bf16.mxu1 %v5394_v36  ;;  %v5698_v34 = vld [vmem:[#allocation5 + $0x80] sm:$0xff] (!%p5419_p9)   ;;  %v5699_v35 = vld [vmem:[#allocation5 + $0x48] sm:$0xff] (!%p5419_p9)  }
 0x263   : > { %v5700_v36 = vld [vmem:[#allocation5 + $0xc8] sm:$0xff] (!%p5419_p9)  }
 0x265   : > { %3936 = vmatpush1.bf16.msra.mxu0 %v5391_v42  ;;  %4100 = vmatpush1.bf16.msra.mxu1 %v5393_v30  ;;  %v5707_v42 = vld [vmem:[#allocation5 + $0x58] sm:$0xff] (!%p5419_p9)  }
 0x266   : > { %3937 = vmatprep.subr.bf16.mxu0 %v5400_v43  ;;  %4101 = vmatprep.subr.bf16.mxu1 %v5402_v45  ;;  %v5708_v30 = vld [vmem:[#allocation5 + $0xd8] sm:$0xff] (!%p5419_p9)  }
 0x267   : > { %v5709_v43 = vld [vmem:[#allocation5 + $0x18] sm:$0xff] (!%p5419_p9)  }
 0x268   : > { %v5710_v45 = vld [vmem:[#allocation5 + $0x98] sm:$0xff] (!%p5419_p9)  }
 0x269   : > { %3938 = vmatpush1.bf16.msra.mxu0 %v5399_v52  ;;  %4102 = vmatpush1.bf16.msra.mxu1 %v5401_v53  ;;  %v5715_v52 = vld [vmem:[#allocation5 + $0x68] sm:$0xff] (!%p5419_p9)  }
 0x26a   : > { %3939 = vmatprep.subr.bf16.mxu0 %v5408_v55  ;;  %4103 = vmatprep.subr.bf16.mxu1 %v5410_v57  ;;  %v5716_v53 = vld [vmem:[#allocation5 + $0xe8] sm:$0xff] (!%p5419_p9)  }
 0x26b   : > { %v5717_v55 = vld [vmem:[#allocation5 + $0x28] sm:$0xff] (!%p5419_p9)  }
 0x26c   : > { %v5718_v57 = vld [vmem:[#allocation5 + $0xa8] sm:$0xff] (!%p5419_p9)  }
 0x26d   : > { %3940 = vmatpush1.bf16.msra.mxu0 %v5407_v2  ;;  %4104 = vmatpush1.bf16.msra.mxu1 %v5409_v4  ;;  %v5723_v2 = vld [vmem:[#allocation5 + $0x78] sm:$0xff] (!%p5419_p9)  }
 0x26e   : > { %3941 = vmatprep.subr.bf16.mxu0 %v5416_v5  ;;  %4105 = vmatprep.subr.bf16.mxu1 %v5418_v6  ;;  %v5724_v4 = vld [vmem:[#allocation5 + $0xf8] sm:$0xff] (!%p5419_p9)  }
 0x26f   : > { %v5725_v5 = vld [vmem:[#allocation5 + $0x38] sm:$0xff] (!%p5419_p9)  }
 0x270   : > { %v5726_v6 = vld [vmem:[#allocation5 + $0xb8] sm:$0xff] (!%p5419_p9)  }
 0x271   : > { %3942 = vmatpush1.bf16.msra.mxu0 %v5415_v7  ;;  %4106 = vmatpush1.bf16.msra.mxu1 %v5417_v8  ;;  %v4136_v7 = vpack.c.bf16 (!%p5419_p9), %v6665_v29, %v6665_v29  ;;  %v4138_v8 = vpack.c.bf16 (!%p5419_p9), %v6667_v49, %v6667_v49  ;;  %v5731_v29 = vld [vmem:[#allocation5 + $0x148] sm:$0xff] (!%p5419_p9)  }
 0x272   : > { %5487 = vmatprep.subr.bf16.mxu0 (!%p5419_p9), %v5695_v28  ;;  %5509 = vmatprep.subr.bf16.mxu1 (!%p5419_p9), %v5696_v33  ;;  %v5733_v49 = vld [vmem:[#allocation5 + $0x108] sm:$0xff] (!%p5419_p9)   ;;  %v5753_v33 = vld [vmem:[#allocation5 + $0x130] sm:$0xff] (!%p5419_p9)  }
 0x273   : > { %v5750_v28 = vld [vmem:[#allocation5 + $0x1a8] sm:$0xff] (!%p5419_p9)  }
 0x274   : > { %3944 = vmatmul.mubr.bf16.vlgmr.msra.gmra.mrb[4].mxu0 %v6406_v62  ;;  %4108 = vmatmul.mubr.bf16.vlgmr.msra.gmra.mrb[4].mxu1 %v6406_v62  ;;  %v899_v62 = vrot.slane %v859_v13, %v6637_v54 }
 0x275   : > { %4694 = vmatprep.mubr.bf16.mxu0 (!%p5419_p9), %v4137_v31  ;;  %4734 = vmatprep.mubr.bf16.mxu1 (!%p5419_p9), %v4139_v32  ;;  %v5751_v31 = vld [vmem:[#allocation5 + $0x170] sm:$0xff] (!%p5419_p9)  }
 0x276   : > { %5488 = vmatpush3.bf16.msra.mxu0 (!%p5419_p9), %v5697_v20  ;;  %5510 = vmatpush3.bf16.msra.mxu1 (!%p5419_p9), %v5698_v34  ;;  %v5752_v32 = vld [vmem:[#allocation5 + $0x1f0] sm:$0xff] (!%p5419_p9)   ;;  %v5755_v34 = vld [vmem:[#allocation5 + $0x178] sm:$0xff] (!%p5419_p9)  }
 0x277   : > { %5489 = vmatprep.subr.bf16.mxu0 (!%p5419_p9), %v5699_v35  ;;  %5511 = vmatprep.subr.bf16.mxu1 (!%p5419_p9), %v5700_v36  ;;  %v5754_v20 = vld [vmem:[#allocation5 + $0x1b0] sm:$0xff] (!%p5419_p9)   ;;  %v5756_v35 = vld [vmem:[#allocation5 + $0x1f8] sm:$0xff] (!%p5419_p9)  }
 0x278   : > { %v5757_v36 = vld [vmem:[#allocation5 + $0x138] sm:$0xff] (!%p5419_p9)  }
 0x27a   : > { %5490 = vmatpush3.bf16.msra.mxu0 (!%p5419_p9), %v5701_v37  ;;  %5512 = vmatpush3.bf16.msra.mxu1 (!%p5419_p9), %v5702_v38  ;;  %v5758_v37 = vld [vmem:[#allocation5 + $0x1b8] sm:$0xff] (!%p5419_p9)  }
 0x27b   : > { %5491 = vmatprep.subr.bf16.mxu0 (!%p5419_p9), %v5703_v44  ;;  %5513 = vmatprep.subr.bf16.mxu1 (!%p5419_p9), %v5704_v39  ;;  %v4272_v39 = vld [vmem:[#allocation7] sm:$0x1] (!%p5419_p9) }
 0x27e   : > { %5492 = vmatpush3.bf16.msra.mxu0 (!%p5419_p9), %v5705_v56  ;;  %5514 = vmatpush3.bf16.msra.mxu1 (!%p5419_p9), %v5706_v41  ;;  %v4273_v56 = vunpack.c.l.bf16 (!%p5419_p9), %v4272_v39 }
 0x27f   : > { %5493 = vmatprep.subr.bf16.mxu0 (!%p5419_p9), %v5707_v42  ;;  %5515 = vmatprep.subr.bf16.mxu1 (!%p5419_p9), %v5708_v30 }
 0x280   : > { %v4277_v42 = vrot.slane (!%p5419_p9), %v4273_v56, %v6637_v54 }
 0x282   : > { %5494 = vmatpush3.bf16.msra.mxu0 (!%p5419_p9), %v5709_v43  ;;  %5516 = vmatpush3.bf16.msra.mxu1 (!%p5419_p9), %v5710_v45 }
 0x283   : > { %5495 = vmatprep.subr.bf16.mxu0 (!%p5419_p9), %v5711_v46  ;;  %5517 = vmatprep.subr.bf16.mxu1 (!%p5419_p9), %v5712_v47 }
 0x286   : > { %5496 = vmatpush3.bf16.msra.mxu0 (!%p5419_p9), %v5713_v48  ;;  %5518 = vmatpush3.bf16.msra.mxu1 (!%p5419_p9), %v5714_v40 }
 0x287   : > { %5497 = vmatprep.subr.bf16.mxu0 (!%p5419_p9), %v5715_v52  ;;  %5519 = vmatprep.subr.bf16.mxu1 (!%p5419_p9), %v5716_v53 }
 0x28a   : > { %5498 = vmatpush3.bf16.msra.mxu0 (!%p5419_p9), %v5717_v55  ;;  %5520 = vmatpush3.bf16.msra.mxu1 (!%p5419_p9), %v5718_v57 }
 0x28b   : > { %5499 = vmatprep.subr.bf16.mxu0 (!%p5419_p9), %v5719_v58  ;;  %5521 = vmatprep.subr.bf16.mxu1 (!%p5419_p9), %v5720_v59 }
 0x28e   : > { %5500 = vmatpush3.bf16.msra.mxu0 (!%p5419_p9), %v5721_v60  ;;  %5522 = vmatpush3.bf16.msra.mxu1 (!%p5419_p9), %v5722_v0 }
 0x28f   : > { %5501 = vmatprep.subr.bf16.mxu0 (!%p5419_p9), %v5723_v2  ;;  %5523 = vmatprep.subr.bf16.mxu1 (!%p5419_p9), %v5724_v4 }
 0x292   : > { %5502 = vmatpush3.bf16.msra.mxu0 (!%p5419_p9), %v5725_v5  ;;  %5524 = vmatpush3.bf16.msra.mxu1 (!%p5419_p9), %v5726_v6 }
 0x293   : > { %5531 = vmatprep.subr.bf16.mxu0 (!%p5419_p9), %v5727_v9  ;;  %5553 = vmatprep.subr.bf16.mxu1 (!%p5419_p9), %v5728_v10 }
 0x295   : > { %4695 = vmatmul.mubr.bf16.vlgmr.msra.gmra.mrb[0].mxu0 (!%p5419_p9), %v4136_v7  ;;  %4735 = vmatmul.mubr.bf16.vlgmr.msra.gmra.mrb[0].mxu1 (!%p5419_p9), %v4138_v8 }
 0x296   : > { %5532 = vmatpush3.bf16.msra.mxu0 (!%p5419_p9), %v5729_v12 }
 0x297   : > { %5533 = vmatprep.subr.bf16.mxu0 (!%p5419_p9), %v5731_v29 }
 0x29a   : > { %5534 = vmatpush3.bf16.msra.mxu0 (!%p5419_p9), %v5733_v49 }
 0x347   : > { %v3945_v51 = vpop.f32.mrb[4].mxu0  ;;  %v4109_v18 = vpop.f32.mrb[4].mxu1  ;;  %4135 = sbr.rel (%p5419_p9) target bundleno = 1090 (0x442), region = 60 }
 0x348   : > { %v5579_v17 = vadd.f32 %v3945_v51, %v887_v14  ;;  %v3947_v19 = vpop.f32.mrb[5].mxu0  ;;  %v5581_v21 = vadd.f32 %v4109_v18, %v895_v15  ;;  %v4111_v22 = vpop.f32.mrb[5].mxu1  ;;  %v5730_v14 = vld [vmem:[#allocation5 + $0x180] sm:$0xff] (!%p5419_p9)   ;;  %v5732_v15 = vld [vmem:[#allocation5 + $0x1c8] sm:$0xff] (!%p5419_p9)   ;;  %v5736_v51 = vld [vmem:[#allocation5 + $0x1d0] sm:$0xff] (!%p5419_p9)  }
 0x349   : > { %v5580_v61 = vadd.f32 %v3947_v19, %v891_v16  ;;  %v3949_v23 = vpop.f32.mrb[6].mxu0  ;;  %v5582_v50 = vadd.f32 %v4111_v22, %v899_v62  ;;  %v4113_v3 = vpop.f32.mrb[6].mxu1  ;;  %5554 = vmatpush3.bf16.msra.mxu1 (!%p5419_p9), %v5730_v14  ;;  %v5734_v16 = vld [vmem:[#allocation5 + $0x188] sm:$0xff] (!%p5419_p9)   ;;  %v5735_v62 = vld [vmem:[#allocation5 + $0x150] sm:$0xff] (!%p5419_p9)   ;;  %v5739_v19 = vld [vmem:[#allocation5 + $0x158] sm:$0xff] (!%p5419_p9)  }
 0x34a   : > { %v6723_v63 = vmax.f32 %v5579_v17, 0.0  ;;  %v3950_v24 = vpop.f32.mrb[7].mxu0  ;;  %v6725_v25 = vmax.f32 %v5581_v21, 0.0  ;;  %v4114_v27 = vpop.f32.mrb[7].mxu1  ;;  %5555 = vmatprep.subr.bf16.mxu1 (!%p5419_p9), %v5732_v15  ;;  %5535 = vmatprep.subr.bf16.mxu0 (!%p5419_p9), %v5735_v62  ;;  %v5737_v17 = vld [vmem:[#allocation5 + $0x110] sm:$0xff] (!%p5419_p9)   ;;  %v5740_v21 = vld [vmem:[#allocation5 + $0x1d8] sm:$0xff] (!%p5419_p9)  }
 0x34b   : > { %v6727_v26 = vmax.f32 %v5580_v61, 0.0  ;;  %v6730_v1 = vmax.f32 %v5582_v50, 0.0  ;;  %v5738_v18 = vld [vmem:[#allocation5 + $0x190] sm:$0xff] (!%p5419_p9)   ;;  %5536 = vmatpush3.bf16.msra.mxu0 (!%p5419_p9), %v5737_v17  ;;  %v5741_v61 = vld [vmem:[#allocation5 + $0x118] sm:$0xff] (!%p5419_p9)   ;;  %v5743_v23 = vld [vmem:[#allocation5 + $0x160] sm:$0xff] (!%p5419_p9)  }
 0x34c   : > { %4128 = vst [vmem:[#allocation2 + $0x20] sm:$0xff] %v6723_v63  ;;  %4130 = vst [vmem:[#allocation2 + $0x30] sm:$0xff] %v6725_v25  ;;  %5537 = vmatprep.subr.bf16.mxu0 (!%p5419_p9), %v5739_v19  ;;  %v5742_v22 = vld [vmem:[#allocation5 + $0x198] sm:$0xff] (!%p5419_p9)   ;;  %v5744_v50 = vld [vmem:[#allocation5 + $0x1e0] sm:$0xff] (!%p5419_p9)   ;;  %v4140_v38 = vpack.c.bf16 (!%p5419_p9), %v6723_v63, %v6723_v63  ;;  %v4142_v44 = vpack.c.bf16 (!%p5419_p9), %v6725_v25, %v6725_v25 }
 0x34d   : > { %4129 = vst [vmem:[#allocation2 + $0x28] sm:$0xff] %v6727_v26  ;;  %4131 = vst [vmem:[#allocation2 + $0x38] sm:$0xff] %v6730_v1  ;;  %v4141_v11 = vpack.c.bf16 (!%p5419_p9), %v6727_v26, %v6727_v26  ;;  %v4143_v13 = vpack.c.bf16 (!%p5419_p9), %v6730_v1, %v6730_v1  ;;  %5556 = vmatpush3.bf16.msra.mxu1 (!%p5419_p9), %v5734_v16  ;;  %v5745_v3 = vld [vmem:[#allocation5 + $0x120] sm:$0xff] (!%p5419_p9)   ;;  %v5747_v26 = vld [vmem:[#allocation5 + $0x168] sm:$0xff] (!%p5419_p9)  }
 0x34e   : > { %5557 = vmatprep.subr.bf16.mxu1 %v5736_v51  ;;  %v5746_v24 = vld [vmem:[#allocation5 + $0x1a0] sm:$0xff]   ;;  %v5748_v27 = vld [vmem:[#allocation5 + $0x1e8] sm:$0xff]  }
 0x34f   : > { %4774 = vmatprep.mubr.bf16.mxu0 %v4141_v11  ;;  %4814 = vmatprep.mubr.bf16.mxu1 %v4143_v13  ;;  %v5749_v1 = vld [vmem:[#allocation5 + $0x128] sm:$0xff]  }
 0x350   : > { %5538 = vmatpush3.bf16.msra.mxu0 %v5741_v61 }
 0x351   : > { %5558 = vmatpush3.bf16.msra.mxu1 %v5738_v18  ;;  %5539 = vmatprep.subr.bf16.mxu0 %v5743_v23 }
 0x352   : > { %5559 = vmatprep.subr.bf16.mxu1 %v5740_v21 }
 0x354   : > { %5540 = vmatpush3.bf16.msra.mxu0 %v5745_v3 }
 0x355   : > { %5560 = vmatpush3.bf16.msra.mxu1 %v5742_v22  ;;  %5541 = vmatprep.subr.bf16.mxu0 %v5747_v26 }
 0x356   : > { %5561 = vmatprep.subr.bf16.mxu1 %v5744_v50 }
 0x358   : > { %5542 = vmatpush3.bf16.msra.mxu0 %v5749_v1 }
 0x359   : > { %5562 = vmatpush3.bf16.msra.mxu1 %v5746_v24  ;;  %5543 = vmatprep.subr.bf16.mxu0 %v5751_v31 }
 0x35a   : > { %5563 = vmatprep.subr.bf16.mxu1 %v5748_v27 }
 0x35c   : > { %5544 = vmatpush3.bf16.msra.mxu0 %v5753_v33 }
 0x35d   : > { %5564 = vmatpush3.bf16.msra.mxu1 %v5750_v28  ;;  %5545 = vmatprep.subr.bf16.mxu0 %v5755_v34 }
 0x35e   : > { %5565 = vmatprep.subr.bf16.mxu1 %v5752_v32 }
 0x360   : > { %5546 = vmatpush3.bf16.msra.mxu0 %v5757_v36 }
 0x361   : > { %5566 = vmatpush3.bf16.msra.mxu1 %v5754_v20 }
 0x362   : > { %5567 = vmatprep.subr.bf16.mxu1 %v5756_v35 }
 0x363   : > { %4775 = vmatmul.mubr.bf16.vlgmr.msra.gmra.mrb[4].mxu0 %v4140_v38 }
 0x365   : > { %5568 = vmatpush3.bf16.msra.mxu1 %v5758_v37 }
 0x368   : > { %4815 = vmatmul.mubr.bf16.vlgmr.msra.gmra.mrb[4].mxu1 %v4142_v44  ;;  %v5503_v41 = vpop.f32.mrb[0].mxu0  ;;  %v5525_v30 = vpop.f32.mrb[0].mxu1 }
 0x369   : > { %v5504_v43 = vpop.f32.mrb[1].mxu0  ;;  %v5526_v46 = vpop.f32.mrb[1].mxu1 }
 0x36a   : > { %v5505_v45 = vadd.f32 %v5504_v43, %v5503_v41  ;;  %v5506_v47 = vpop.f32.mrb[2].mxu0  ;;  %v5527_v48 = vadd.f32 %v5526_v46, %v5525_v30  ;;  %v5528_v40 = vpop.f32.mrb[2].mxu1 }
 0x36b   : > { %v5507_v63 = vpop.f32.mrb[3].mxu0  ;;  %v5529_v53 = vpop.f32.mrb[3].mxu1 }
 0x36c   : > { %v4697_v52 = vadd.f32 %v5505_v45, %v4277_v42 }
 0x36e   : > { %v4737_v55 = vadd.f32 %v5527_v48, %v4697_v52 }
 0x436   : > { %v5547_v25 = vpop.f32.mrb[4].mxu0 }
 0x437   : > { %v5548_v58 = vpop.f32.mrb[5].mxu0 }
 0x438   : > { %v5549_v59 = vadd.f32 %v5548_v58, %v5547_v25  ;;  %v5550_v0 = vpop.f32.mrb[6].mxu0 }
 0x439   : > { %v5551_v54 = vpop.f32.mrb[7].mxu0 }
 0x43a   : > { %v4777_v5 = vadd.f32 %v5549_v59, %v4737_v55 }
 0x43b   : > { %v5569_v57 = vpop.f32.mrb[4].mxu1 }
 0x43c   : > { %v5570_v60 = vpop.f32.mrb[5].mxu1 }
 0x43d   : > { %v5571_v2 = vadd.f32 %v5570_v60, %v5569_v57  ;;  %v5572_v4 = vpop.f32.mrb[6].mxu1 }
 0x43e   : > { %v5573_v6 = vpop.f32.mrb[7].mxu1 }
 0x43f   : > { %v4817_v7 = vadd.f32 %v5571_v2, %v4777_v5 }
 0x441   : > { %4822 = vst [vmem:[%s6774_s5] sm:$0xff] %v4817_v7 }
 0x442 PF: > { %p16_p1 = scmp.ge.s32.totalorder %s6017_s11, 4   ;;  %s6787_s18 = smov %s5875_s19 }
 0x443   : > { %s6788_s19 = smov %s5879_s20  ;;  %s6789_s20 = smov %s6028_s14 }
 0x444   : > { %s6790_s21 = smov %s6017_s11  ;;  %18 = sbr.rel (!%p16_p1) target bundleno = 4 (0x4), region = 95 }
 0x44b   :  { %4834 = vsyncpa [#allocation4], 1 }
 0x44c   :  { %4836 = vsyncpa [#allocation4 + $0x1], 1 }
 0x44d   :  { %4837 = vsyncpa [#allocation6], 1 }

</bundles_post_ra>
